<compile_context>
chip_gen: v7x
topology: tpu7x:2x2x1
jax: 0.10.0
libtpu: 0.0.40
codegen_flags: <defaults>
</compile_context>

<pallas_src>
import functools

import jax
import jax.numpy as jnp
from jax import lax
from jax.experimental import pallas as pl
from jax.experimental.pallas import tpu as pltpu


# ----------------------------------------------------------------------------
# Pallas kernel: full bottleneck for one batch element per grid step.
# ----------------------------------------------------------------------------
def bottleneck_kernel(x_ref, mask_ref, w1_ref, s1_ref, b1_ref,
                      w2_ref, s2_ref, b2_ref, w3_ref, s3_ref, b3_ref,
                      out_ref, *, H, W):
    # x_ref   : (1, (H+2)*(W+2), Cp)   bf16, spatially zero-padded, flattened
    # mask_ref: ((H+2)*(W+2), 1)       f32, 1.0 interior / 0.0 halo
    # w1_ref  : (Cp, Pp) bf16          w2_ref: (3, 3*Pp, Pp) bf16 (dx fused on K)
    # w3_ref  : (Pp, Cp) bf16          s*/b*: (1, Pp|Cp) f32 folded BN
    # out_ref : (1, H*(W+2)-2, Cp)     f32, W+2-strided flat layout
    Wp = W + 2
    Ltap = H * Wp - 2

    x = x_ref[0]                                            # (Npad, Cp) bf16

    # ---- conv1 (1x1) + bn1 + relu, computed on the padded slab --------------
    o1 = jnp.dot(x, w1_ref[...], preferred_element_type=jnp.float32)
    o1 = jnp.maximum(o1 * s1_ref[...] + b1_ref[...], 0.0)
    # zero the spatial halo (conv2 expects zero padding there; relu(b1) != 0)
    o1 = (o1 * mask_ref[...]).astype(jnp.bfloat16)          # (Npad, Pp) bf16

    # ---- conv2 (3x3, stride 1, pad 1) + bn2 + relu ---------------------------
    # Each tap is a flat static sublane-shifted slice; the 3 dx taps are
    # concatenated along channels and contracted in one K=3*Pp matmul per dy.
    Pp = o1.shape[1]
    acc = jnp.zeros((Ltap, Pp), jnp.float32)
    for dy in range(3):
        base = dy * Wp
        lhs = jnp.concatenate(
            [o1[base + dx:base + dx + Ltap, :] for dx in range(3)], axis=-1)
        acc = acc + jnp.dot(lhs, w2_ref[dy],
                            preferred_element_type=jnp.float32)
    o2 = jnp.maximum(acc * s2_ref[...] + b2_ref[...], 0.0).astype(jnp.bfloat16)

    # ---- conv3 (1x1) + bn3 + identity residual + relu ------------------------
    o3 = jnp.dot(o2, w3_ref[...], preferred_element_type=jnp.float32)
    o3 = o3 * s3_ref[...] + b3_ref[...]
    # residual for flat output index m lives at padded-input index m + Wp + 1
    residual = x[Wp + 1:Wp + 1 + Ltap, :].astype(jnp.float32)
    out_ref[0] = jnp.maximum(o3 + residual, 0.0)


# ----------------------------------------------------------------------------
# Wrapper: BN folding, channel/spatial padding, pallas_call, unpadding.
# ----------------------------------------------------------------------------
def fold_bn(gamma, beta, mean, var, eps=1e-5):
    scale = gamma / jnp.sqrt(var + eps)
    bias = beta - mean * scale
    return scale[None, :].astype(jnp.float32), bias[None, :].astype(jnp.float32)


def _round_up(n, m):
    return ((n + m - 1) // m) * m


def bottleneck_forward(x_nchw, params):
    (w1, s1, b1, w2, s2, b2, w3, s3, b3) = params
    B, Cin, H, W = x_nchw.shape
    P = w1.shape[1]
    Cout = w3.shape[1]
    assert Cin == Cout, "identity residual requires inplanes == planes*4"

    LANE = 128
    Cp = _round_up(Cin, LANE)        # lane-dense channel dims
    Pp = _round_up(P, LANE)
    Wp = W + 2
    Npad = (H + 2) * Wp
    Ltap = H * Wp - 2

    # NCHW -> NHWC, spatial zero-pad for the 3x3 conv, channel-pad to 128,
    # flatten spatial dims, cast matmul operand to bf16.
    x = jnp.transpose(x_nchw, (0, 2, 3, 1))
    x = jnp.pad(x, ((0, 0), (1, 1), (1, 1), (0, Cp - Cin)))
    x = x.reshape(B, Npad, Cp).astype(jnp.bfloat16)

    # Interior mask (zeroes the spatial halo of the conv1 output).
    mask = jnp.pad(jnp.ones((H, W), jnp.float32), ((1, 1), (1, 1)))
    mask = mask.reshape(Npad, 1)

    # Weights: channel-pad, cast to bf16; fuse the 3 dx taps of w2 along K.
    w1p = jnp.pad(w1, ((0, Cp - Cin), (0, Pp - P))).astype(jnp.bfloat16)
    w2p = jnp.pad(w2, ((0, 0), (0, Pp - P), (0, Pp - P)))          # (9, Pp, Pp)
    w2f = w2p.reshape(3, 3 * Pp, Pp).astype(jnp.bfloat16)          # (3, 3Pp, Pp)
    w3p = jnp.pad(w3, ((0, Pp - P), (0, Cp - Cout))).astype(jnp.bfloat16)

    def pad_vec(v, n):
        return jnp.pad(v, ((0, 0), (0, n - v.shape[1]))).astype(jnp.float32)

    s1p, b1p = pad_vec(s1, Pp), pad_vec(b1, Pp)
    s2p, b2p = pad_vec(s2, Pp), pad_vec(b2, Pp)
    s3p, b3p = pad_vec(s3, Cp), pad_vec(b3, Cp)

    full2 = lambda b: (0, 0)
    full3 = lambda b: (0, 0, 0)

    out_flat = pl.pallas_call(
        functools.partial(bottleneck_kernel, H=H, W=W),
        out_shape=jax.ShapeDtypeStruct((B, Ltap, Cp), jnp.float32),
        grid_spec=pltpu.PrefetchScalarGridSpec(
            num_scalar_prefetch=0,
            grid=(B,),
            in_specs=[
                pl.BlockSpec((1, Npad, Cp), lambda b: (b, 0, 0)),   # x (padded)
                pl.BlockSpec((Npad, 1), full2),                     # halo mask
                pl.BlockSpec((Cp, Pp), full2),                      # w1
                pl.BlockSpec((1, Pp), full2),                       # bn1 scale
                pl.BlockSpec((1, Pp), full2),                       # bn1 bias
                pl.BlockSpec((3, 3 * Pp, Pp), full3),               # w2 fused
                pl.BlockSpec((1, Pp), full2),                       # bn2 scale
                pl.BlockSpec((1, Pp), full2),                       # bn2 bias
                pl.BlockSpec((Pp, Cp), full2),                      # w3
                pl.BlockSpec((1, Cp), full2),                       # bn3 scale
                pl.BlockSpec((1, Cp), full2),                       # bn3 bias
            ],
            out_specs=pl.BlockSpec((1, Ltap, Cp), lambda b: (b, 0, 0)),
        ),
        compiler_params=pltpu.CompilerParams(
            dimension_semantics=("parallel",),
            vmem_limit_bytes=64 * 1024 * 1024,
        ),
    )(x, mask, w1p, s1p, b1p, w2f, s2p, b2p, w3p, s3p, b3p)

    # Drop the 2 garbage columns per row and the channel padding (cheap XLA).
    out = jnp.pad(out_flat, ((0, 0), (0, H * Wp - Ltap), (0, 0)))
    out = out.reshape(B, H, Wp, Cp)[:, :, :W, :Cout]
    return jnp.transpose(out, (0, 3, 1, 2))                 # back to NCHW


# ----------------------------------------------------------------------------
# Pure-JAX reference (lax.conv, f32, HIGHEST precision) for correctness check.
# ----------------------------------------------------------------------------
def reference_forward(x_nchw, params):
    (w1, s1, b1, w2, s2, b2, w3, s3, b3) = params
    x = jnp.transpose(x_nchw, (0, 2, 3, 1)).astype(jnp.float32)   # NHWC
    dn = lax.conv_dimension_numbers(x.shape, (1, 1, 1, 1),
                                    ("NHWC", "HWIO", "NHWC"))

    def conv(inp, w_hwio, pad):
        return lax.conv_general_dilated(inp, w_hwio, (1, 1), pad,
                                        dimension_numbers=dn,
                                        precision=lax.Precision.HIGHEST)

    P = w1.shape[1]
    o = conv(x, w1.reshape(1, 1, *w1.shape), "VALID")
    o = jnp.maximum(o * s1[0] + b1[0], 0.0)
    o = conv(o, w2.reshape(3, 3, P, P), [(1, 1), (1, 1)])
    o = jnp.maximum(o * s2[0] + b2[0], 0.0)
    o = conv(o, w3.reshape(1, 1, *w3.shape), "VALID")
    o = o * s3[0] + b3[0]
    o = jnp.maximum(o + x, 0.0)
    return jnp.transpose(o, (0, 3, 1, 2))


# ----------------------------------------------------------------------------
# Deterministic synthetic parameters (eval-mode BN folded into scale/bias).
# ----------------------------------------------------------------------------
# TODO(synk): PyTorch BatchNorm2d in training mode uses batch statistics; this
#             reproduces eval-mode semantics (running stats folded).
def make_params(key, inplanes, planes):
    expansion = 4
    keys = jax.random.split(key, 12)
    w1 = 0.1 * jax.random.normal(keys[0], (inplanes, planes), jnp.float32)
    w2 = 0.1 * jax.random.normal(keys[1], (9, planes, planes), jnp.float32)
    w3 = 0.1 * jax.random.normal(keys[2], (planes, planes * expansion), jnp.float32)

    def bn(kg, kb, km, kv, c):
        gamma = 1.0 + 0.1 * jax.random.normal(kg, (c,), jnp.float32)
        beta = 0.1 * jax.random.normal(kb, (c,), jnp.float32)
        mean = 0.1 * jax.random.normal(km, (c,), jnp.float32)
        var = jnp.abs(jax.random.normal(kv, (c,), jnp.float32)) + 0.5
        return fold_bn(gamma, beta, mean, var)

    s1, b1 = bn(keys[3], keys[4], keys[5], keys[6], planes)
    s2, b2 = bn(keys[7], keys[8], keys[9], keys[10], planes)
    s3, b3 = bn(keys[11], keys[3], keys[5], keys[7], planes * expansion)
    return (w1, s1, b1, w2, s2, b2, w3, s3, b3)


if __name__ == "__main__":
    key = jax.random.PRNGKey(0)
    planes = 8
    inplanes = planes * 4           # identity residual (downsample=None)
    B, H, W = 2, 16, 16

    kx, kp = jax.random.split(key)
    x = jax.random.normal(kx, (B, inplanes, H, W), jnp.float32)   # NCHW input
    params = make_params(kp, inplanes, planes)

    # Pre-quantize matmul operands to bf16-representable values so the f32
    # reference isolates structural errors from bf16 input rounding.
    q = lambda a: a.astype(jnp.bfloat16).astype(jnp.float32)
    x = q(x)
    (w1, s1, b1, w2, s2, b2, w3, s3, b3) = params
    params = (q(w1), s1, b1, q(w2), s2, b2, q(w3), s3, b3)

    out = jax.block_until_ready(bottleneck_forward(x, params))
    ref = reference_forward(x, params)
    assert out.shape == (B, inplanes, H, W)
    assert jnp.allclose(out, ref, rtol=2e-3, atol=2e-3), "mismatch vs reference"

    print("KERNEL_OK")
</pallas_src>

<mosaic_0001>
module attributes {stable_mosaic.version = 11 : i64} {
  func.func @bottleneck_kernel(%arg0: i32, %arg1: memref<1x324x128xbf16, #tpu.memory_space<vmem>>, %arg2: memref<324x1xf32, #tpu.memory_space<vmem>>, %arg3: memref<128x128xbf16, #tpu.memory_space<vmem>>, %arg4: memref<1x128xf32, #tpu.memory_space<vmem>>, %arg5: memref<1x128xf32, #tpu.memory_space<vmem>>, %arg6: memref<3x384x128xbf16, #tpu.memory_space<vmem>>, %arg7: memref<1x128xf32, #tpu.memory_space<vmem>>, %arg8: memref<1x128xf32, #tpu.memory_space<vmem>>, %arg9: memref<128x128xbf16, #tpu.memory_space<vmem>>, %arg10: memref<1x128xf32, #tpu.memory_space<vmem>>, %arg11: memref<1x128xf32, #tpu.memory_space<vmem>>, %arg12: memref<1x286x128xf32, #tpu.memory_space<vmem>>) attributes {dimension_semantics = [#tpu.dimension_semantics<parallel>], iteration_bounds = array<i64: 2>, scalar_prefetch = 0 : i64, scratch_operands = 0 : i64, tpu.core_type = #tpu.core_type<tc>, window_params = [{transform_indices = @transform_0, window_bounds = array<i64: 1, 324, 128>}, {pipeline_mode = #tpu.pipeline_mode<synchronous>, transform_indices = @transform_1, window_bounds = array<i64: 324, 1>}, {pipeline_mode = #tpu.pipeline_mode<synchronous>, transform_indices = @transform_2, window_bounds = array<i64: 128, 128>}, {pipeline_mode = #tpu.pipeline_mode<synchronous>, transform_indices = @transform_3, window_bounds = array<i64: 1, 128>}, {pipeline_mode = #tpu.pipeline_mode<synchronous>, transform_indices = @transform_4, window_bounds = array<i64: 1, 128>}, {pipeline_mode = #tpu.pipeline_mode<synchronous>, transform_indices = @transform_5, window_bounds = array<i64: 3, 384, 128>}, {pipeline_mode = #tpu.pipeline_mode<synchronous>, transform_indices = @transform_6, window_bounds = array<i64: 1, 128>}, {pipeline_mode = #tpu.pipeline_mode<synchronous>, transform_indices = @transform_7, window_bounds = array<i64: 1, 128>}, {pipeline_mode = #tpu.pipeline_mode<synchronous>, transform_indices = @transform_8, window_bounds = array<i64: 128, 128>}, {pipeline_mode = #tpu.pipeline_mode<synchronous>, transform_indices = @transform_9, window_bounds = array<i64: 1, 128>}, {pipeline_mode = #tpu.pipeline_mode<synchronous>, transform_indices = @transform_10, window_bounds = array<i64: 1, 128>}, {transform_indices = @transform_11, window_bounds = array<i64: 1, 286, 128>}]} {
    %c0 = arith.constant 0 : index
    %c0_0 = arith.constant 0 : index
    %c0_1 = arith.constant 0 : index
    %0 = vector.load %arg1[%c0, %c0_0, %c0_1] : memref<1x324x128xbf16, #tpu.memory_space<vmem>>, vector<1x324x128xbf16>
    %1 = vector.shape_cast %0 : vector<1x324x128xbf16> to vector<324x128xbf16>
    %c0_2 = arith.constant 0 : index
    %c0_3 = arith.constant 0 : index
    %2 = vector.load %arg3[%c0_2, %c0_3] : memref<128x128xbf16, #tpu.memory_space<vmem>>, vector<128x128xbf16>
    %cst = arith.constant dense<0.000000e+00> : vector<324x128xf32>
    %3 = tpu.matmul %1, %2, %cst {dimension_numbers = #tpu.dot_dimension_numbers<[1], [0], [0], [1], [0, 0, 1, 1], [], []>} : vector<324x128xbf16>, vector<128x128xbf16>, vector<324x128xf32> -> vector<324x128xf32>
    %c0_4 = arith.constant 0 : index
    %c0_5 = arith.constant 0 : index
    %4 = vector.load %arg4[%c0_4, %c0_5] : memref<1x128xf32, #tpu.memory_space<vmem>>, vector<1x128xf32>
    %5 = vector.broadcast %4 : vector<1x128xf32> to vector<324x128xf32>
    %6 = arith.mulf %3, %5 : vector<324x128xf32>
    %c0_6 = arith.constant 0 : index
    %c0_7 = arith.constant 0 : index
    %7 = vector.load %arg5[%c0_6, %c0_7] : memref<1x128xf32, #tpu.memory_space<vmem>>, vector<1x128xf32>
    %8 = vector.broadcast %7 : vector<1x128xf32> to vector<324x128xf32>
    %9 = arith.addf %6, %8 : vector<324x128xf32>
    %cst_8 = arith.constant 0.000000e+00 : f32
    %10 = vector.broadcast %cst_8 : f32 to vector<324x128xf32>
    %11 = arith.maximumf %9, %10 : vector<324x128xf32>
    %c0_9 = arith.constant 0 : index
    %c0_10 = arith.constant 0 : index
    %12 = vector.load %arg2[%c0_9, %c0_10] : memref<324x1xf32, #tpu.memory_space<vmem>>, vector<324x1xf32>
    %13 = vector.broadcast %12 : vector<324x1xf32> to vector<324x128xf32>
    %14 = arith.mulf %11, %13 : vector<324x128xf32>
    %15 = arith.truncf %14 : vector<324x128xf32> to vector<324x128xbf16>
    %cst_11 = arith.constant 0.000000e+00 : f32
    %16 = vector.broadcast %cst_11 : f32 to vector<286x128xf32>
    %17 = vector.extract_strided_slice %15 {offsets = [0, 0], sizes = [286, 128], strides = [1, 1]} : vector<324x128xbf16> to vector<286x128xbf16>
    %18 = vector.extract_strided_slice %15 {offsets = [1, 0], sizes = [286, 128], strides = [1, 1]} : vector<324x128xbf16> to vector<286x128xbf16>
    %19 = vector.extract_strided_slice %15 {offsets = [2, 0], sizes = [286, 128], strides = [1, 1]} : vector<324x128xbf16> to vector<286x128xbf16>
    %20 = tpu.concatenate %17, %18, %19 in 1 : vector<286x128xbf16>, vector<286x128xbf16>, vector<286x128xbf16> -> vector<286x384xbf16>
    %c0_12 = arith.constant 0 : index
    %c0_13 = arith.constant 0 : index
    %c0_14 = arith.constant 0 : index
    %21 = vector.load %arg6[%c0_12, %c0_13, %c0_14] : memref<3x384x128xbf16, #tpu.memory_space<vmem>>, vector<1x384x128xbf16>
    %22 = vector.shape_cast %21 : vector<1x384x128xbf16> to vector<384x128xbf16>
    %cst_15 = arith.constant dense<0.000000e+00> : vector<286x128xf32>
    %23 = tpu.matmul %20, %22, %cst_15 {dimension_numbers = #tpu.dot_dimension_numbers<[1], [0], [0], [1], [0, 0, 1, 1], [], []>} : vector<286x384xbf16>, vector<384x128xbf16>, vector<286x128xf32> -> vector<286x128xf32>
    %24 = arith.addf %16, %23 : vector<286x128xf32>
    %25 = vector.extract_strided_slice %15 {offsets = [18, 0], sizes = [286, 128], strides = [1, 1]} : vector<324x128xbf16> to vector<286x128xbf16>
    %26 = vector.extract_strided_slice %15 {offsets = [19, 0], sizes = [286, 128], strides = [1, 1]} : vector<324x128xbf16> to vector<286x128xbf16>
    %27 = vector.extract_strided_slice %15 {offsets = [20, 0], sizes = [286, 128], strides = [1, 1]} : vector<324x128xbf16> to vector<286x128xbf16>
    %28 = tpu.concatenate %25, %26, %27 in 1 : vector<286x128xbf16>, vector<286x128xbf16>, vector<286x128xbf16> -> vector<286x384xbf16>
    %c1 = arith.constant 1 : index
    %c0_16 = arith.constant 0 : index
    %c0_17 = arith.constant 0 : index
    %29 = vector.load %arg6[%c1, %c0_16, %c0_17] : memref<3x384x128xbf16, #tpu.memory_space<vmem>>, vector<1x384x128xbf16>
    %30 = vector.shape_cast %29 : vector<1x384x128xbf16> to vector<384x128xbf16>
    %cst_18 = arith.constant dense<0.000000e+00> : vector<286x128xf32>
    %31 = tpu.matmul %28, %30, %cst_18 {dimension_numbers = #tpu.dot_dimension_numbers<[1], [0], [0], [1], [0, 0, 1, 1], [], []>} : vector<286x384xbf16>, vector<384x128xbf16>, vector<286x128xf32> -> vector<286x128xf32>
    %32 = arith.addf %24, %31 : vector<286x128xf32>
    %33 = vector.extract_strided_slice %15 {offsets = [36, 0], sizes = [286, 128], strides = [1, 1]} : vector<324x128xbf16> to vector<286x128xbf16>
    %34 = vector.extract_strided_slice %15 {offsets = [37, 0], sizes = [286, 128], strides = [1, 1]} : vector<324x128xbf16> to vector<286x128xbf16>
    %35 = vector.extract_strided_slice %15 {offsets = [38, 0], sizes = [286, 128], strides = [1, 1]} : vector<324x128xbf16> to vector<286x128xbf16>
    %36 = tpu.concatenate %33, %34, %35 in 1 : vector<286x128xbf16>, vector<286x128xbf16>, vector<286x128xbf16> -> vector<286x384xbf16>
    %c2 = arith.constant 2 : index
    %c0_19 = arith.constant 0 : index
    %c0_20 = arith.constant 0 : index
    %37 = vector.load %arg6[%c2, %c0_19, %c0_20] : memref<3x384x128xbf16, #tpu.memory_space<vmem>>, vector<1x384x128xbf16>
    %38 = vector.shape_cast %37 : vector<1x384x128xbf16> to vector<384x128xbf16>
    %cst_21 = arith.constant dense<0.000000e+00> : vector<286x128xf32>
    %39 = tpu.matmul %36, %38, %cst_21 {dimension_numbers = #tpu.dot_dimension_numbers<[1], [0], [0], [1], [0, 0, 1, 1], [], []>} : vector<286x384xbf16>, vector<384x128xbf16>, vector<286x128xf32> -> vector<286x128xf32>
    %40 = arith.addf %32, %39 : vector<286x128xf32>
    %c0_22 = arith.constant 0 : index
    %c0_23 = arith.constant 0 : index
    %41 = vector.load %arg7[%c0_22, %c0_23] : memref<1x128xf32, #tpu.memory_space<vmem>>, vector<1x128xf32>
    %42 = vector.broadcast %41 : vector<1x128xf32> to vector<286x128xf32>
    %43 = arith.mulf %40, %42 : vector<286x128xf32>
    %c0_24 = arith.constant 0 : index
    %c0_25 = arith.constant 0 : index
    %44 = vector.load %arg8[%c0_24, %c0_25] : memref<1x128xf32, #tpu.memory_space<vmem>>, vector<1x128xf32>
    %45 = vector.broadcast %44 : vector<1x128xf32> to vector<286x128xf32>
    %46 = arith.addf %43, %45 : vector<286x128xf32>
    %cst_26 = arith.constant 0.000000e+00 : f32
    %47 = vector.broadcast %cst_26 : f32 to vector<286x128xf32>
    %48 = arith.maximumf %46, %47 : vector<286x128xf32>
    %49 = arith.truncf %48 : vector<286x128xf32> to vector<286x128xbf16>
    %c0_27 = arith.constant 0 : index
    %c0_28 = arith.constant 0 : index
    %50 = vector.load %arg9[%c0_27, %c0_28] : memref<128x128xbf16, #tpu.memory_space<vmem>>, vector<128x128xbf16>
    %cst_29 = arith.constant dense<0.000000e+00> : vector<286x128xf32>
    %51 = tpu.matmul %49, %50, %cst_29 {dimension_numbers = #tpu.dot_dimension_numbers<[1], [0], [0], [1], [0, 0, 1, 1], [], []>} : vector<286x128xbf16>, vector<128x128xbf16>, vector<286x128xf32> -> vector<286x128xf32>
    %c0_30 = arith.constant 0 : index
    %c0_31 = arith.constant 0 : index
    %52 = vector.load %arg10[%c0_30, %c0_31] : memref<1x128xf32, #tpu.memory_space<vmem>>, vector<1x128xf32>
    %53 = vector.broadcast %52 : vector<1x128xf32> to vector<286x128xf32>
    %54 = arith.mulf %51, %53 : vector<286x128xf32>
    %c0_32 = arith.constant 0 : index
    %c0_33 = arith.constant 0 : index
    %55 = vector.load %arg11[%c0_32, %c0_33] : memref<1x128xf32, #tpu.memory_space<vmem>>, vector<1x128xf32>
    %56 = vector.broadcast %55 : vector<1x128xf32> to vector<286x128xf32>
    %57 = arith.addf %54, %56 : vector<286x128xf32>
    %58 = vector.extract_strided_slice %1 {offsets = [19, 0], sizes = [286, 128], strides = [1, 1]} : vector<324x128xbf16> to vector<286x128xbf16>
    %59 = arith.extf %58 : vector<286x128xbf16> to vector<286x128xf32>
    %60 = arith.addf %57, %59 : vector<286x128xf32>
    %cst_34 = arith.constant 0.000000e+00 : f32
    %61 = vector.broadcast %cst_34 : f32 to vector<286x128xf32>
    %62 = arith.maximumf %60, %61 : vector<286x128xf32>
    %c0_35 = arith.constant 0 : index
    %c0_36 = arith.constant 0 : index
    %c0_37 = arith.constant 0 : index
    %63 = vector.load %arg12[%c0_35, %c0_36, %c0_37] : memref<1x286x128xf32, #tpu.memory_space<vmem>>, vector<1x286x128xf32>
    %64 = vector.shape_cast %63 : vector<1x286x128xf32> to vector<286x128xf32>
    %65 = vector.shape_cast %62 : vector<286x128xf32> to vector<1x286x128xf32>
    tpu.vector_store %arg12[%c0_35, %c0_36, %c0_37], %65 {strides = array<i32>} : memref<1x286x128xf32, #tpu.memory_space<vmem>>, vector<1x286x128xf32>,
    return
  }
  func.func @transform_0(%arg0: i32) -> (i32, i32, i32) {
    %c0_i32 = arith.constant 0 : i32
    %c0_i32_0 = arith.constant 0 : i32
    %c0_i32_1 = arith.constant 0 : i32
    return %arg0, %c0_i32, %c0_i32_0 : i32, i32, i32
  }
  func.func @transform_1(%arg0: i32) -> (i32, i32) {
    %c0_i32 = arith.constant 0 : i32
    %c0_i32_0 = arith.constant 0 : i32
    %c0_i32_1 = arith.constant 0 : i32
    return %c0_i32, %c0_i32_0 : i32, i32
  }
  func.func @transform_2(%arg0: i32) -> (i32, i32) {
    %c0_i32 = arith.constant 0 : i32
    %c0_i32_0 = arith.constant 0 : i32
    %c0_i32_1 = arith.constant 0 : i32
    return %c0_i32, %c0_i32_0 : i32, i32
  }
  func.func @transform_3(%arg0: i32) -> (i32, i32) {
    %c0_i32 = arith.constant 0 : i32
    %c0_i32_0 = arith.constant 0 : i32
    %c0_i32_1 = arith.constant 0 : i32
    return %c0_i32, %c0_i32_0 : i32, i32
  }
  func.func @transform_4(%arg0: i32) -> (i32, i32) {
    %c0_i32 = arith.constant 0 : i32
    %c0_i32_0 = arith.constant 0 : i32
    %c0_i32_1 = arith.constant 0 : i32
    return %c0_i32, %c0_i32_0 : i32, i32
  }
  func.func @transform_5(%arg0: i32) -> (i32, i32, i32) {
    %c0_i32 = arith.constant 0 : i32
    %c0_i32_0 = arith.constant 0 : i32
    %c0_i32_1 = arith.constant 0 : i32
    %c0_i32_2 = arith.constant 0 : i32
    return %c0_i32, %c0_i32_0, %c0_i32_1 : i32, i32, i32
  }
  func.func @transform_6(%arg0: i32) -> (i32, i32) {
    %c0_i32 = arith.constant 0 : i32
    %c0_i32_0 = arith.constant 0 : i32
    %c0_i32_1 = arith.constant 0 : i32
    return %c0_i32, %c0_i32_0 : i32, i32
  }
  func.func @transform_7(%arg0: i32) -> (i32, i32) {
    %c0_i32 = arith.constant 0 : i32
    %c0_i32_0 = arith.constant 0 : i32
    %c0_i32_1 = arith.constant 0 : i32
    return %c0_i32, %c0_i32_0 : i32, i32
  }
  func.func @transform_8(%arg0: i32) -> (i32, i32) {
    %c0_i32 = arith.constant 0 : i32
    %c0_i32_0 = arith.constant 0 : i32
    %c0_i32_1 = arith.constant 0 : i32
    return %c0_i32, %c0_i32_0 : i32, i32
  }
  func.func @transform_9(%arg0: i32) -> (i32, i32) {
    %c0_i32 = arith.constant 0 : i32
    %c0_i32_0 = arith.constant 0 : i32
    %c0_i32_1 = arith.constant 0 : i32
    return %c0_i32, %c0_i32_0 : i32, i32
  }
  func.func @transform_10(%arg0: i32) -> (i32, i32) {
    %c0_i32 = arith.constant 0 : i32
    %c0_i32_0 = arith.constant 0 : i32
    %c0_i32_1 = arith.constant 0 : i32
    return %c0_i32, %c0_i32_0 : i32, i32
  }
  func.func @transform_11(%arg0: i32) -> (i32, i32, i32) {
    %c0_i32 = arith.constant 0 : i32
    %c0_i32_0 = arith.constant 0 : i32
    %c0_i32_1 = arith.constant 0 : i32
    return %arg0, %c0_i32, %c0_i32_0 : i32, i32, i32
  }
}

</mosaic_0001>

<bundles_post_ra>
// kernel: tpu_custom_call.1
= control target key start
LH: loop header
LB: loop body
LE: loop exit
PB: predicated region body
PF: predicated region fallthrough
CT: control target
= control target key end

     0   :  { %s8007_s0 = inlined_call_operand.hbm [shape: bf16[2,324,128], index: 0, kind: input, shape index: {}]   ;;  %s8008_s1 = inlined_call_operand.hbm [shape: f32[324,1], index: 1, kind: input, shape index: {}]   ;;  %s8009_s2 = inlined_call_operand.hbm [shape: bf16[128,128], index: 2, kind: input, shape index: {}]   ;;  %s8010_s3 = inlined_call_operand.hbm [shape: f32[1,128], index: 3, kind: input, shape index: {}]   ;;  %s8011_s4 = inlined_call_operand.hbm [shape: f32[1,128], index: 4, kind: input, shape index: {}]   ;;  %s8012_s5 = inlined_call_operand.hbm [shape: bf16[3,384,128], index: 5, kind: input, shape index: {}]   ;;  %s8013_s6 = inlined_call_operand.hbm [shape: f32[1,128], index: 6, kind: input, shape index: {}]   ;;  %s8014_s7 = inlined_call_operand.hbm [shape: f32[1,128], index: 7, kind: input, shape index: {}]   ;;  %s8015_s8 = inlined_call_operand.hbm [shape: bf16[128,128], index: 8, kind: input, shape index: {}]   ;;  %s8016_s9 = inlined_call_operand.hbm [shape: f32[1,128], index: 9, kind: input, shape index: {}]   ;;  %s8017_s10 = inlined_call_operand.hbm [shape: f32[1,128], index: 10, kind: input, shape index: {}]   ;;  %s8018_s11 = inlined_call_operand.hbm [shape: f32[2,286,128], index: 11, kind: output, shape index: {}]  }
   0x1   :  { %8073 = sst [smem:[#allocation49_spill]] %s8007_s0 }
   0x2   :  { %8074 = sst [smem:[#allocation50_spill]] %s8008_s1 }
   0x3   :  { %8075 = sst [smem:[#allocation51_spill]] %s8009_s2 }
   0x4   :  { %8076 = sst [smem:[#allocation52_spill]] %s8010_s3 }
   0x5   :  { %8077 = sst [smem:[#allocation53_spill]] %s8018_s11 }
   0x6   :  { %16 = vsyncpa [#allocation3], 0 }
   0x7   :  { %18 = vsyncpa [#allocation3 + $0x1], 0 }
   0x8   :  { %19 = vsyncpa [#allocation6], 0 }
   0x9   :  { %20 = vsyncpa [#allocation9], 0 }
   0xa   :  { %21 = vsyncpa [#allocation12], 0 }
   0xb   :  { %22 = vsyncpa [#allocation15], 0 }
   0xc   :  { %23 = vsyncpa [#allocation18], 0 }
   0xd   :  { %24 = vsyncpa [#allocation4], 0 }
   0xe   :  { %26 = vsyncpa [#allocation4 + $0x1], 0  ;;  %s5946_s17 = smov 0   ;;  %s5948_s18 = smov 0  }
   0xf   :  { %s5950_s19 = smov 0   ;;  %s5952_s20 = smov 0  }
  0x10 LB: > { %s5865_s21 = smov [#allocation5]   ;;  %s5967_s23 = sadd.s32 4294967295, %s5863_s20   ;;  %s5863_s20 = sphi %s5952_s20, %s8192_s20   ;;  %s5859_s19 = sphi %s5950_s19, %s8191_s19   ;;  %s5855_s18 = sphi %s5948_s18, %s8190_s18   ;;  %s5851_s17 = sphi %s5946_s17, %s8189_s17  }
  0x11   : > { %s311_s22 = sshll.u32 %s5865_s21, 4  ;;  %p4572_p0 = scmp.ge.s32.totalorder %s5863_s20, 1  ;;  %s5972_s22 = int_to_ptr.vmem [resolvable:$true] %s311_s22 }
  0x12   : > { %p8022_p1 = scmp.eq.s32.totalorder %s5967_s23, 0  ;;  %p299_p2 = scmp.lt.s32.totalorder %s5863_s20, 3 }
  0x13   : > { %s5866_s25 = smov [#allocation8]   ;;  %s5867_s28 = smov [#allocation11]  }
  0x14   : > { %p5974_p3 = pnand %p4572_p0, %p299_p2  ;;  %s338_s26 = sshll.u32 %s5866_s25, 4  ;;  %s5987_s26 = int_to_ptr.vmem [resolvable:$true] %s338_s26 }
  0x15   : > { %s5989_s29 = sshll.u32 %s5867_s28, 4  ;;  %s8081_s1 = sld [smem:[#allocation50_spill]]  ;;  %s360_s29 = int_to_ptr.vmem [resolvable:$true] %s5989_s29 }
  0x16   : > { %s8078_s24 = scalar_select %p5974_p3, 1, 0 }
  0x17   : > { %p5204_p5 = pneg %p5974_p3 }
  0x18   : > { %8079 = sst [smem:[#allocation28_spill]] %s8078_s24 }
  0x19   : > { %p5983_p6 = pnand %p5204_p5, %p8022_p1 }
  0x1b   : > { %s5467_s13 = scalar_lea.hbm %s8081_s1, 5248  ;;  %p5999_p8 = pneg %p5983_p6 }
  0x1c   : > { %p5468_p7 = scmp.ne.s32.totalorder %s8081_s1, %s5467_s13  ;;  %p5474_p11 = scmp.lt.u32.totalorder %s5467_s13, %s8081_s1 }
  0x1e   : > { %p5470_p9 = pnand %p5999_p8, %p5468_p7 }
  0x20   : > { %p5471_p10 = pneg %p5470_p9 }
  0x22   : > { %p5476_p12 = pnand %p5474_p11, %p5471_p10 }
  0x24   : > { %5479 = shalt.err (!%p5476_p12)
}
  0x25   : > { %s5480_s28 = scalar_lea.vmem %s5972_s22, 5248  ;;  %p5488_p5 = scmp.lt.s32.totalorder %s5972_s22, %s5972_s22 }
  0x26   : > { %p5481_p13 = scmp.ne.s32.totalorder %s5972_s22, %s5480_s28  ;;  %p5489_p4 = scmp.lt.s32.totalorder %s5480_s28, %s5480_s28 }
  0x28   : > { %p5483_p0 = pnand %p5481_p13, %p5999_p8  ;;  %p5490_p7 = por %p5489_p4, %p5488_p5 }
  0x2a   : > { %p5484_p2 = pneg %p5483_p0 }
  0x2c   : > { %p5491_p9 = pnand %p5490_p7, %p5484_p2 }
  0x2e   : > { %5494 = shalt.err (!%p5491_p9)
}
  0x2f   : > { %s5868_s30 = smov 128   ;;  %s5869_s12 = smov 8  }
  0x30   : > { %5207 = dma.hbm_to_vmem [thread:$0]  (!%p5983_p6), %s8081_s1, 5248, %s5972_s22, [#allocation6], %s5868_s30, %s5868_s30, %s5869_s12  }
  0x31   : > { %s8083_s3 = sld [smem:[#allocation52_spill]] }
  0x37   : > { %s5495_s25 = scalar_lea.hbm %s8083_s3, 16 }
  0x38   : > { %p5496_p4 = scmp.ne.s32.totalorder %s8083_s3, %s5495_s25  ;;  %p5502_p12 = scmp.lt.u32.totalorder %s5495_s25, %s8083_s3 }
  0x3a   : > { %p5498_p10 = pnand %p5496_p4, %p5999_p8 }
  0x3c   : > { %p5499_p11 = pneg %p5498_p10 }
  0x3e   : > { %p5504_p13 = pnand %p5502_p12, %p5499_p11 }
  0x40   : > { %5507 = shalt.err (!%p5504_p13)
}
  0x41   : > { %s5508_s22 = scalar_lea.vmem %s5987_s26, 16  ;;  %s5515_s11 = scalar_lea.vmem %s5987_s26, 32 }
  0x42   : > { %p5509_p0 = scmp.ne.s32.totalorder %s5987_s26, %s5508_s22  ;;  %p5516_p7 = scmp.lt.s32.totalorder %s5987_s26, %s5987_s26 }
  0x43   : > { %p5517_p9 = scmp.lt.s32.totalorder %s5515_s11, %s5508_s22 }
  0x44   : > { %p5511_p2 = pnand %p5509_p0, %p5999_p8 }
  0x45   : > { %p5518_p4 = por %p5517_p9, %p5516_p7 }
  0x46   : > { %p5512_p5 = pneg %p5511_p2 }
  0x48   : > { %p5519_p10 = pnand %p5518_p4, %p5512_p5 }
  0x4a   : > { %5522 = shalt.err (!%p5519_p10)
}
  0x4b   : > { %5213 = dma.hbm_to_vmem [thread:$0]  (!%p5983_p6), %s8083_s3, 16, %s5987_s26, [#allocation9]  }
  0x4c   : > { %s5523_s13 = scalar_lea.hbm %s8012_s5, 9216 }
  0x4d   : > { %p5524_p11 = scmp.ne.s32.totalorder %s8012_s5, %s5523_s13  ;;  %p5530_p0 = scmp.lt.u32.totalorder %s5523_s13, %s8012_s5 }
  0x4f   : > { %p5526_p12 = pnand %p5524_p11, %p5999_p8 }
  0x51   : > { %p5527_p13 = pneg %p5526_p12 }
  0x53   : > { %p5532_p2 = pnand %p5530_p0, %p5527_p13 }
  0x55   : > { %5535 = shalt.err (!%p5532_p2)
}
  0x56   : > { %s5536_s28 = scalar_lea.vmem %s360_s29, 9216  ;;  %p5544_p4 = scmp.lt.s32.totalorder %s360_s29, %s360_s29 }
  0x57   : > { %p5537_p5 = scmp.ne.s32.totalorder %s360_s29, %s5536_s28  ;;  %p5545_p10 = scmp.lt.s32.totalorder %s5536_s28, %s5536_s28 }
  0x59   : > { %p5539_p7 = pnand %p5537_p5, %p5999_p8  ;;  %p5546_p1 = por %p5545_p10, %p5544_p4 }
  0x5b   : > { %p5540_p9 = pneg %p5539_p7 }
  0x5d   : > { %p5547_p3 = pnand %p5546_p1, %p5540_p9 }
  0x5f   : > { %5550 = shalt.err (!%p5547_p3)
}
  0x60   : > { %s8024_s26 = smov 64   ;;  %s8025_s22 = smov 4  }
  0x61   : > { %5219 = dma.hbm_to_vmem [thread:$0]  (!%p5983_p6), %s8012_s5, 9216, %s360_s29, [#allocation12], %s8024_s26, %s8024_s26, %s8025_s22  }
  0x62   : > { %s5872_s24 = smov [#allocation14]   ;;  %s5873_s12 = smov [#allocation17]  }
  0x63   : > { %s384_s30 = sshll.u32 %s5872_s24, 4  ;;  %s408_s13 = sshll.u32 %s5873_s12, 4  ;;  %s385_s30 = int_to_ptr.vmem [resolvable:$true] %s384_s30  ;;  %s409_s13 = int_to_ptr.vmem [resolvable:$true] %s408_s13 }
  0x64   : > { %s5551_s21 = scalar_lea.hbm %s8014_s7, 16 }
  0x65   : > { %p5552_p1 = scmp.ne.s32.totalorder %s8014_s7, %s5551_s21  ;;  %p5558_p12 = scmp.lt.u32.totalorder %s5551_s21, %s8014_s7 }
  0x67   : > { %p5554_p3 = pnand %p5552_p1, %p5999_p8 }
  0x69   : > { %p5555_p11 = pneg %p5554_p3 }
  0x6b   : > { %p5560_p13 = pnand %p5558_p12, %p5555_p11 }
  0x6d   : > { %5563 = shalt.err (!%p5560_p13)
}
  0x6e   : > { %s5564_s29 = scalar_lea.vmem %s385_s30, 16  ;;  %s5571_s11 = scalar_lea.vmem %s385_s30, 32 }
  0x6f   : > { %p5565_p0 = scmp.ne.s32.totalorder %s385_s30, %s5564_s29  ;;  %p5572_p7 = scmp.lt.s32.totalorder %s385_s30, %s385_s30 }
  0x70   : > { %p5573_p9 = scmp.lt.s32.totalorder %s5571_s11, %s5564_s29 }
  0x71   : > { %p5567_p2 = pnand %p5565_p0, %p5999_p8 }
  0x72   : > { %p5574_p4 = por %p5573_p9, %p5572_p7 }
  0x73   : > { %p5568_p5 = pneg %p5567_p2 }
  0x75   : > { %p5575_p10 = pnand %p5574_p4, %p5568_p5 }
  0x77   : > { %5578 = shalt.err (!%p5575_p10)
}
  0x78   : > { %5225 = dma.hbm_to_vmem [thread:$0]  (!%p5983_p6), %s8014_s7, 16, %s385_s30, [#allocation15]  }
  0x79   : > { %s5579_s12 = scalar_lea.hbm %s8016_s9, 16 }
  0x7a   : > { %p5580_p1 = scmp.ne.s32.totalorder %s8016_s9, %s5579_s12  ;;  %p5586_p12 = scmp.lt.u32.totalorder %s5579_s12, %s8016_s9 }
  0x7c   : > { %p5582_p3 = pnand %p5580_p1, %p5999_p8 }
  0x7e   : > { %p5583_p11 = pneg %p5582_p3 }
  0x80   : > { %p5588_p13 = pnand %p5586_p12, %p5583_p11 }
  0x82   : > { %5591 = shalt.err (!%p5588_p13)
}
  0x83   : > { %s5592_s28 = scalar_lea.vmem %s409_s13, 16  ;;  %s5599_s30 = scalar_lea.vmem %s409_s13, 32 }
  0x84   : > { %p5593_p0 = scmp.ne.s32.totalorder %s409_s13, %s5592_s28  ;;  %p5600_p7 = scmp.lt.s32.totalorder %s409_s13, %s409_s13 }
  0x85   : > { %p5601_p9 = scmp.lt.s32.totalorder %s5599_s30, %s5592_s28 }
  0x86   : > { %p5595_p2 = pnand %p5593_p0, %p5999_p8 }
  0x87   : > { %p5602_p4 = por %p5601_p9, %p5600_p7 }
  0x88   : > { %p5596_p5 = pneg %p5595_p2 }
  0x8a   : > { %p5603_p10 = pnand %p5602_p4, %p5596_p5 }
  0x8c   : > { %5606 = shalt.err (!%p5603_p10)
}
  0x8d   : > { %5231 = dma.hbm_to_vmem [thread:$0]  (!%p5983_p6), %s8016_s9, 16, %s409_s13, [#allocation18]  }
  0x8e   : > { %s5874_s0 = smov [#allocation7]   ;;  %s5875_s1 = smov [#allocation10]  }
  0x8f   : > { %s324_s24 = sshll.u32 %s5874_s0, 4  ;;  %s349_s3 = sshll.u32 %s5875_s1, 4  ;;  %s325_s24 = int_to_ptr.vmem [resolvable:$true] %s324_s24  ;;  %s350_s3 = int_to_ptr.vmem [resolvable:$true] %s349_s3 }
  0x90   : > { %s8084_s2 = sld [smem:[#allocation51_spill]] }
  0x96   : > { %s5607_s15 = scalar_lea.hbm %s8084_s2, 1024 }
  0x97   : > { %p5608_p1 = scmp.ne.s32.totalorder %s8084_s2, %s5607_s15  ;;  %p5614_p12 = scmp.lt.u32.totalorder %s5607_s15, %s8084_s2 }
  0x99   : > { %p5610_p3 = pnand %p5608_p1, %p5999_p8 }
  0x9b   : > { %p5611_p11 = pneg %p5610_p3 }
  0x9d   : > { %p5616_p13 = pnand %p5614_p12, %p5611_p11 }
  0x9f   : > { %5619 = shalt.err (!%p5616_p13)
}
  0xa0   : > { %s5620_s13 = scalar_lea.vmem %s325_s24, 1024  ;;  %p5628_p7 = scmp.lt.s32.totalorder %s325_s24, %s325_s24 }
  0xa1   : > { %p5621_p0 = scmp.ne.s32.totalorder %s325_s24, %s5620_s13  ;;  %p5629_p9 = scmp.lt.s32.totalorder %s5620_s13, %s5620_s13 }
  0xa3   : > { %p5623_p2 = pnand %p5621_p0, %p5999_p8  ;;  %p5630_p4 = por %p5629_p9, %p5628_p7 }
  0xa5   : > { %p5624_p5 = pneg %p5623_p2 }
  0xa7   : > { %p5631_p10 = pnand %p5630_p4, %p5624_p5 }
  0xa9   : > { %5634 = shalt.err (!%p5631_p10)
}
  0xaa   : > { %5210 = dma.hbm_to_vmem [thread:$0]  (!%p5983_p6), %s8084_s2, 1024, %s325_s24, [#allocation6], %s8024_s26, %s8024_s26, %s8025_s22  }
  0xab   : > { %s5635_s12 = scalar_lea.hbm %s8011_s4, 16 }
  0xac   : > { %p5636_p1 = scmp.ne.s32.totalorder %s8011_s4, %s5635_s12  ;;  %p5642_p12 = scmp.lt.u32.totalorder %s5635_s12, %s8011_s4 }
  0xae   : > { %p5638_p3 = pnand %p5636_p1, %p5999_p8 }
  0xb0   : > { %p5639_p11 = pneg %p5638_p3 }
  0xb2   : > { %p5644_p13 = pnand %p5642_p12, %p5639_p11 }
  0xb4   : > { %5647 = shalt.err (!%p5644_p13)
}
  0xb5   : > { %s5648_s28 = scalar_lea.vmem %s350_s3, 16  ;;  %s5655_s24 = scalar_lea.vmem %s350_s3, 32 }
  0xb6   : > { %p5649_p0 = scmp.ne.s32.totalorder %s350_s3, %s5648_s28  ;;  %p5656_p7 = scmp.lt.s32.totalorder %s350_s3, %s350_s3 }
  0xb7   : > { %p5657_p9 = scmp.lt.s32.totalorder %s5655_s24, %s5648_s28 }
  0xb8   : > { %p5651_p2 = pnand %p5649_p0, %p5999_p8 }
  0xb9   : > { %p5658_p4 = por %p5657_p9, %p5656_p7 }
  0xba   : > { %p5652_p5 = pneg %p5651_p2 }
  0xbc   : > { %p5659_p10 = pnand %p5658_p4, %p5652_p5 }
  0xbe   : > { %5662 = shalt.err (!%p5659_p10)
}
  0xbf   : > { %5216 = dma.hbm_to_vmem [thread:$0]  (!%p5983_p6), %s8011_s4, 16, %s350_s3, [#allocation9]  }
  0xc0   : > { %s5876_s29 = smov [#allocation13]   ;;  %s5877_s0 = smov [#allocation16]  }
  0xc1   : > { %s373_s11 = sshll.u32 %s5876_s29, 4  ;;  %s394_s1 = sshll.u32 %s5877_s0, 4  ;;  %s374_s11 = int_to_ptr.vmem [resolvable:$true] %s373_s11  ;;  %s395_s1 = int_to_ptr.vmem [resolvable:$true] %s394_s1 }
  0xc2   : > { %s5663_s15 = scalar_lea.hbm %s8013_s6, 16 }
  0xc3   : > { %p5664_p1 = scmp.ne.s32.totalorder %s8013_s6, %s5663_s15  ;;  %p5670_p12 = scmp.lt.u32.totalorder %s5663_s15, %s8013_s6 }
  0xc5   : > { %p5666_p3 = pnand %p5664_p1, %p5999_p8 }
  0xc7   : > { %p5667_p11 = pneg %p5666_p3 }
  0xc9   : > { %p5672_p13 = pnand %p5670_p12, %p5667_p11 }
  0xcb   : > { %5675 = shalt.err (!%p5672_p13)
}
  0xcc   : > { %s5676_s3 = scalar_lea.vmem %s374_s11, 16  ;;  %s5683_s30 = scalar_lea.vmem %s374_s11, 32 }
  0xcd   : > { %p5677_p0 = scmp.ne.s32.totalorder %s374_s11, %s5676_s3  ;;  %p5684_p7 = scmp.lt.s32.totalorder %s374_s11, %s374_s11 }
  0xce   : > { %p5685_p9 = scmp.lt.s32.totalorder %s5683_s30, %s5676_s3 }
  0xcf   : > { %p5679_p2 = pnand %p5677_p0, %p5999_p8 }
  0xd0   : > { %p5686_p4 = por %p5685_p9, %p5684_p7 }
  0xd1   : > { %p5680_p5 = pneg %p5679_p2 }
  0xd3   : > { %p5687_p10 = pnand %p5686_p4, %p5680_p5 }
  0xd5   : > { %5690 = shalt.err (!%p5687_p10)
}
  0xd6   : > { %5222 = dma.hbm_to_vmem [thread:$0]  (!%p5983_p6), %s8013_s6, 16, %s374_s11, [#allocation12]  }
  0xd7   : > { %s5691_s14 = scalar_lea.hbm %s8015_s8, 1024 }
  0xd8   : > { %p5692_p1 = scmp.ne.s32.totalorder %s8015_s8, %s5691_s14  ;;  %p5698_p12 = scmp.lt.u32.totalorder %s5691_s14, %s8015_s8 }
  0xda   : > { %p5694_p3 = pnand %p5692_p1, %p5999_p8 }
  0xdc   : > { %p5695_p11 = pneg %p5694_p3 }
  0xde   : > { %p5700_p13 = pnand %p5698_p12, %p5695_p11 }
  0xe0   : > { %5703 = shalt.err (!%p5700_p13)
}
  0xe1   : > { %s5704_s24 = scalar_lea.vmem %s395_s1, 1024  ;;  %p5712_p7 = scmp.lt.s32.totalorder %s395_s1, %s395_s1 }
  0xe2   : > { %p5705_p0 = scmp.ne.s32.totalorder %s395_s1, %s5704_s24  ;;  %p5713_p9 = scmp.lt.s32.totalorder %s5704_s24, %s5704_s24 }
  0xe4   : > { %p5707_p2 = pnand %p5705_p0, %p5999_p8  ;;  %p5714_p4 = por %p5713_p9, %p5712_p7 }
  0xe6   : > { %p5708_p5 = pneg %p5707_p2 }
  0xe8   : > { %p5715_p10 = pnand %p5714_p4, %p5708_p5 }
  0xea   : > { %5718 = shalt.err (!%p5715_p10)
}
  0xeb   : > { %5228 = dma.hbm_to_vmem [thread:$0]  (!%p5983_p6), %s8015_s8, 1024, %s395_s1, [#allocation15], %s8024_s26, %s8024_s26, %s8025_s22  }
  0xec   : > { %s5878_s30 = smov [#allocation19]   ;;  %s5719_s12 = scalar_lea.hbm %s8017_s10, 16 }
  0xed   : > { %s419_s13 = sshll.u32 %s5878_s30, 4  ;;  %p5720_p1 = scmp.ne.s32.totalorder %s8017_s10, %s5719_s12  ;;  %s420_s13 = int_to_ptr.vmem [resolvable:$true] %s419_s13 }
  0xee   : > { %p5726_p12 = scmp.lt.u32.totalorder %s5719_s12, %s8017_s10 }
  0xef   : > { %p5722_p3 = pnand %p5720_p1, %p5999_p8 }
  0xf1   : > { %p5723_p11 = pneg %p5722_p3 }
  0xf3   : > { %p5728_p13 = pnand %p5726_p12, %p5723_p11 }
  0xf5   : > { %5731 = shalt.err (!%p5728_p13)
}
  0xf6   : > { %s5732_s1 = scalar_lea.vmem %s420_s13, 16  ;;  %s5739_s28 = scalar_lea.vmem %s420_s13, 32 }
  0xf7   : > { %p5733_p0 = scmp.ne.s32.totalorder %s420_s13, %s5732_s1  ;;  %p5740_p7 = scmp.lt.s32.totalorder %s420_s13, %s420_s13 }
  0xf8   : > { %p5741_p9 = scmp.lt.s32.totalorder %s5739_s28, %s5732_s1 }
  0xf9   : > { %p5735_p2 = pnand %p5733_p0, %p5999_p8 }
  0xfa   : > { %p5742_p4 = por %p5741_p9, %p5740_p7 }
  0xfb   : > { %p5736_p5 = pneg %p5735_p2 }
  0xfd   : > { %p5743_p10 = pnand %p5742_p4, %p5736_p5 }
  0xff   : > { %5746 = shalt.err (!%p5743_p10)
}
 0x100   : > { %5234 = dma.hbm_to_vmem [thread:$0]  (!%p5983_p6), %s8017_s10, 16, %s420_s13, [#allocation18]  }
 0x101   : > { %s4571_s16 = sadd.s32 4294967294, %s5863_s20   ;;  %s6200_s27 = sadd.s32 1, %s5863_s20  }
 0x102   : > { %s36_s3 = ssub.s32 %s5863_s20, %s6200_s27  ;;  %s39_s30 = sadd.s32 1, %s5859_s19 }
 0x103   : > { %p37_p8 = scmp.eq.s32.totalorder %s36_s3, 0  ;;  %p46_p1 = scmp.ne.s32.totalorder %s5859_s19, %s5855_s18 }
 0x104   : > { %p47_p3 = scmp.eq.s32.totalorder %s5863_s20, 0  ;;  %p52_p11 = scmp.ne.s32.totalorder %s5855_s18, %s5851_s17 }
 0x105   : > { %s6211_s29 = scalar_select %p37_p8, %s5859_s19, %s39_s30  }
 0x106   : > { %p48_p12 = por %p47_p3, %p46_p1  ;;  %p8085_p13 = scmp.eq.s32.totalorder %s5967_s23, 0 }
 0x107   : > { %p286_p6 = scmp.eq.s32.totalorder %s5967_s23, 1  ;;  %p292_p2 = scmp.eq.s32.totalorder %s4571_s16, 1 }
 0x108   : > { %p6215_p0 = por %p8085_p13, %p52_p11  ;;  %p5253_p5 = scmp.lt.s32.totalorder %s5863_s20, 2 }
 0x109   : > { %s430_s13 = sand.u32 1, %s5859_s19   ;;  %p6222_p7 = por %p286_p6, %p46_p1 }
 0x10a   : > { %p6226_p9 = por %p292_p2, %p52_p11  ;;  %s5155_s15 = smul.u32 164, %s430_s13 }
 0x10b   : > { %s8087_s12 = scalar_select %p6222_p7, 1, 0 }
 0x10c   : > { %s8088_s14 = scalar_select %p6226_p9, 1, 0 }
 0x10d   : > { %s5156_s21 = smul.u32 2624, %s5863_s20  ;;  %p6231_p4 = pnand %p5253_p5, %p48_p12 }
 0x10e   : > { %s8090_s24 = sld [smem:[#allocation49_spill]]  ;;  %s434_s16 = scalar_lea.vmem [#allocation2], %s5155_s15 }
 0x10f   : > { %s441_s3 = sshll.u32 %s434_s16, 4  ;;  %s6242_s30 = scalar_lea.sflag [#allocation3], %s430_s13  ;;  %s6240_s3 = int_to_ptr.vmem [resolvable:$true] %s441_s3 }
 0x110   : > { %p5749_p8 = pneg %p6231_p4 }
 0x114   : > { %s6238_s11 = scalar_lea.hbm %s8090_s24, %s5156_s21  ;;  %s5752_s28 = scalar_lea.hbm %s8090_s24, 5248 }
 0x115   : > { %s5747_s26 = scalar_lea.hbm %s6238_s11, 2624  ;;  %p5753_p11 = scmp.lt.u32.totalorder %s6238_s11, %s8090_s24 }
 0x116   : > { %p5748_p10 = scmp.ne.s32.totalorder %s6238_s11, %s5747_s26  ;;  %p5754_p12 = scmp.lt.u32.totalorder %s5752_s28, %s5747_s26 }
 0x117   : > { %p5756_p6 = scmp.lt.u32.totalorder %s5747_s26, %s6238_s11 }
 0x118   : > { %p5750_p1 = pnand %p5749_p8, %p5748_p10  ;;  %p5755_p13 = por %p5754_p12, %p5753_p11 }
 0x11a   : > { %p5751_p3 = pneg %p5750_p1  ;;  %p5757_p2 = por %p5756_p6, %p5755_p13 }
 0x11c   : > { %p5758_p5 = pnand %p5757_p2, %p5751_p3 }
 0x11e   : > { %5761 = shalt.err (!%p5758_p5)
}
 0x11f   : > { %s5762_s13 = scalar_lea.vmem %s6240_s3, 2624  ;;  %s5879_s15 = smov [#allocation2]  }
 0x120   : > { %p5763_p10 = scmp.ne.s32.totalorder %s6240_s3, %s5762_s13  ;;  %s5767_s16 = sshll.u32 %s5879_s15, 4  ;;  %s5768_s16 = int_to_ptr.vmem [resolvable:$false] %s5767_s16 }
 0x121   : > { %s5769_s2 = scalar_lea.vmem %s5768_s16, 5248  ;;  %p5770_p7 = scmp.lt.s32.totalorder %s6240_s3, %s5768_s16 }
 0x122   : > { %p5765_p1 = pnand %p5763_p10, %p5749_p8  ;;  %p5771_p11 = scmp.lt.s32.totalorder %s5769_s2, %s5762_s13 }
 0x124   : > { %p5766_p9 = pneg %p5765_p1  ;;  %p5772_p12 = por %p5771_p11, %p5770_p7 }
 0x126   : > { %p5773_p13 = pnand %p5772_p12, %p5766_p9 }
 0x128   : > { %5776 = shalt.err (!%p5773_p13)
}
 0x129   : > { %s8091_s26 = smov 4   ;;  %s8092_s22 = smov 64  }
 0x12a   : > { %5238 = dma.hbm_to_vmem [thread:$0]  (!%p6231_p4), %s6238_s11, 2624, %s6240_s3, %s6242_s30, %s8092_s22, %s8092_s22, %s8091_s26  }
 0x12b   : > { %s8093_s21 = sld [smem:[#allocation28_spill]] }
 0x131   : > { %p8094_p8 = scmp.ne.s32.totalorder %s8093_s21, 0 }
 0x133   : > { %453 = sbr.rel (%p8094_p8) target bundleno = 1444 (0x5a4), region = 64 }
 0x13a   : > { %s6276_s1 = sand.u32 1, %s5855_s18  }
 0x13b   : > { %s5157_s28 = smul.u32 164, %s6276_s1  ;;  %s456_s13 = scalar_lea.sflag [#allocation3], %s6276_s1 }
 0x13d   : > { %s6280_s15 = scalar_lea.vmem [#allocation2], %s5157_s28 }
 0x13e   : > { %5822 = dma.done.wait (%p6215_p0), %s456_s13, 2624  }
 0x13f   : > { %5824 = vsyncadd (%p6215_p0), %s456_s13, 4294964672  ;;  %p8095_p7 = scmp.eq.s32.totalorder %s5967_s23, 0 }
 0x141   : > { %5826 = dma.done.wait (%p8095_p7), [#allocation6], 6272   ;;  %p8096_p9 = pmov %p8095_p7 }
 0x142   : > { %p8097_p4 = pmov %p8095_p7 }
 0x143   : > { %5828 = vsyncadd (%p8096_p9), [#allocation6], 4294961024 }
 0x144   : > { %5830 = dma.done.wait (%p8097_p4), [#allocation9], 32   ;;  %p8098_p3 = pmov %p8097_p4 }
 0x146   : > { %5832 = vsyncadd (%p8098_p3), [#allocation9], 4294967264  ;;  %p8099_p6 = pmov %p8098_p3 }
 0x147   : > { %p8100_p2 = pmov %p8098_p3 }
 0x148   : > { %5834 = dma.done.wait (%p8099_p6), [#allocation12], 9232  }
 0x149   : > { %5836 = vsyncadd (%p8100_p2), [#allocation12], 4294958064  ;;  %p8101_p0 = pmov %p8100_p2 }
 0x14b   : > { %5838 = dma.done.wait (%p8101_p0), [#allocation15], 1040   ;;  %p8102_p5 = pmov %p8101_p0 }
 0x14c   : > { %p8103_p10 = pmov %p8101_p0 }
 0x14d   : > { %5840 = vsyncadd (%p8102_p5), [#allocation15], 4294966256 }
 0x14e   : > { %5842 = dma.done.wait (%p8103_p10), [#allocation18], 32   ;;  %p8104_p1 = pmov %p8101_p0 }
 0x14f   : > { %v5880_v0 = vmov 0.0   ;;  %vm5881_vm0 = vmmov 0   ;;  %v8031_v1 = vmov 0   ;;  %v5318_v2 = vld [vmem:[#allocation7] sm:$0xff]   ;;  %v5319_v3 = vld [vmem:[#allocation7 + $0x8] sm:$0xff]   ;;  %v5320_v4 = vld [vmem:[#allocation7 + $0x10] sm:$0xff]  }
 0x150   : > { %5844 = vsyncadd (%p8104_p1), [#allocation18], 4294967264  ;;  %4847 = vmatprep.subr.bf16.mxu0 %v5880_v0  ;;  %4863 = vmatprep.mubr.msk.bf16.mxu0 %vm5881_vm0, %v5880_v0  ;;  %v1107_v5 = vld [vmem:[#allocation5 + $0x10] sm:$0xff]  ;;  %v1109_v6 = vld [vmem:[#allocation5 + $0x20] sm:$0xff]  ;;  %vm1593_vm1 = vcmask 1046528   ;;  %vm2930_vm3 = vcmask 1045504  }
 0x151   : > { %5316 = vset.pattern.permute.xlu0 %v8031_v1  ;;  %5317 = vset.pattern.permute.xlu1 %v8031_v1  ;;  %v5321_v7 = vld [vmem:[#allocation7 + $0x18] sm:$0xff]   ;;  %v1108_v8 = vld [vmem:[#allocation5 + $0x18] sm:$0xff]  ;;  %v1110_v9 = vld [vmem:[#allocation5 + $0x28] sm:$0xff]  ;;  %vm1413_vm2 = vsmask.f32 7424  ;;  %vm4171_vm4 = vcmask 1044480  }
 0x152   : > { %2015 = vmatprep.subr.bf16.mxu1 %v8031_v1  ;;  %4848 = vmatpush3.bf16.msra.mxu0 %v5318_v2  ;;  %v5322_v10 = vld [vmem:[#allocation7 + $0x20] sm:$0xff]   ;;  %v1111_v11 = vld [vmem:[#allocation5 + $0x30] sm:$0xff]  ;;  %v1112_v12 = vld [vmem:[#allocation5 + $0x38] sm:$0xff]  ;;  %s5158_s0 = smul.u32 288, %s6276_s1  ;;  %s8185_s2 = sld [smem:[#allocation53_spill]] }
 0x153   : > { %4849 = vmatprep.subr.bf16.mxu0 %v5880_v0  ;;  %1158 = vperm.xlu0 %5316, %v1107_v5   ;;  %v5323_v13 = vld [vmem:[#allocation7 + $0x28] sm:$0xff]   ;;  %v1113_v14 = vld [vmem:[#allocation5 + $0x40] sm:$0xff]  ;;  %v1114_v15 = vld [vmem:[#allocation5 + $0x48] sm:$0xff]  ;;  %s5159_s11 = smul.u32 4608, %s5967_s23  ;;  %s4390_s23 = scalar_lea.sflag [#allocation4], %s6276_s1 }
 0x154   : > { %1168 = vperm.xlu1 %5317, %v1109_v6   ;;  %v5324_v16 = vld [vmem:[#allocation7 + $0x30] sm:$0xff]   ;;  %v1115_v17 = vld [vmem:[#allocation5 + $0x50] sm:$0xff]  ;;  %v5325_v19 = vld [vmem:[#allocation7 + $0x38] sm:$0xff]   ;;  %s7790_s25 = scalar_lea.vmem [#allocation20], %s5158_s0  ;;  %p8186_p12 = scmp.ne.s32.totalorder %s8087_s12, 0 }
 0x155   : > { %v1116_v18 = vld [vmem:[#allocation5 + $0x58] sm:$0xff]  ;;  %v1117_v20 = vld [vmem:[#allocation5 + $0x60] sm:$0xff]  ;;  %v1118_v21 = vld [vmem:[#allocation5 + $0x68] sm:$0xff]  ;;  %s4403_s3 = sshll.u32 %s7790_s25, 4  ;;  %s5883_s21 = smov [#allocation20]   ;;  %s7960_s3 = int_to_ptr.vmem [resolvable:$true] %s4403_s3 }
 0x156   : > { %4850 = vmatpush3.bf16.msra.mxu0 %v5319_v3  ;;  %v5326_v22 = vld [vmem:[%s6280_s15] sm:$0xff]   ;;  %v1119_v23 = vld [vmem:[#allocation5 + $0x70] sm:$0xff]  ;;  %v541_v25 = vld [vmem:[%s6280_s15 + $0x8] sm:$0xff]   ;;  %s5777_s22 = scalar_lea.vmem %s7960_s3, 4608  ;;  %s5781_s28 = sshll.u32 %s5883_s21, 4  ;;  %s5782_s28 = int_to_ptr.vmem [resolvable:$false] %s5781_s28 }
 0x157   : > { %4851 = vmatprep.subr.bf16.mxu0 %v5880_v0  ;;  %1163 = vperm.xlu0 %5316, %v1108_v8   ;;  %v1120_v24 = vld [vmem:[#allocation5 + $0x78] sm:$0xff]  ;;  %v1121_v26 = vld [vmem:[#allocation5 + $0x80] sm:$0xff]  ;;  %v1122_v27 = vld [vmem:[#allocation5 + $0x88] sm:$0xff]  ;;  %p5778_p11 = scmp.ne.s32.totalorder %s7960_s3, %s5777_s22  ;;  %s5783_s13 = scalar_lea.vmem %s5782_s28, 9216 }
 0x158   : > { %1173 = vperm.xlu1 %5317, %v1110_v9   ;;  %v1123_v28 = vld [vmem:[#allocation5 + $0x90] sm:$0xff]  ;;  %v1124_v29 = vld [vmem:[#allocation5 + $0x98] sm:$0xff]  ;;  %v1125_v31 = vld [vmem:[#allocation5 + $0xa0] sm:$0xff]  ;;  %s7958_s26 = scalar_lea.hbm %s8185_s2, %s5159_s11  ;;  %p5784_p7 = scmp.lt.s32.totalorder %s7960_s3, %s5782_s28 }
 0x159   : > { %v543_v30 = vld [vmem:[%s6280_s15 + $0x10] sm:$0xff]   ;;  %v1128_v34 = vld [vmem:[#allocation5 + $0xb8] sm:$0xff]  ;;  %v1129_v36 = vld [vmem:[#allocation5 + $0xc0] sm:$0xff]  ;;  %p5779_p13 = pnand %p5778_p11, %p8186_p12  ;;  %p5785_p9 = scmp.lt.s32.totalorder %s5783_s13, %s5777_s22 }
 0x15a   : > { %4852 = vmatpush3.bf16.msra.mxu0 %v5320_v4  ;;  %v1126_v32 = vld [vmem:[#allocation5 + $0xa8] sm:$0xff]  ;;  %v1127_v33 = vld [vmem:[#allocation5 + $0xb0] sm:$0xff]  ;;  %v1132_v39 = vld [vmem:[#allocation5 + $0xd8] sm:$0xff] }
 0x15b   : > { %4853 = vmatprep.subr.bf16.mxu0 %v5880_v0  ;;  %1178 = vperm.xlu0 %5316, %v1111_v11   ;;  %v545_v35 = vld [vmem:[%s6280_s15 + $0x18] sm:$0xff]   ;;  %v1130_v37 = vld [vmem:[#allocation5 + $0xc8] sm:$0xff]  ;;  %v547_v40 = vld [vmem:[%s6280_s15 + $0x20] sm:$0xff]   ;;  %p5780_p8 = pneg %p5779_p13  ;;  %p5786_p4 = por %p5785_p9, %p5784_p7 }
 0x15c   : > { %1183 = vperm.xlu1 %5317, %v1112_v12   ;;  %v1131_v38 = vld [vmem:[#allocation5 + $0xd0] sm:$0xff]  ;;  %v1133_v41 = vld [vmem:[#allocation5 + $0xe0] sm:$0xff]  ;;  %v1134_v42 = vld [vmem:[#allocation5 + $0xe8] sm:$0xff] }
 0x15d   : > { %v1135_v43 = vld [vmem:[#allocation5 + $0xf0] sm:$0xff]  ;;  %v1136_v44 = vld [vmem:[#allocation5 + $0xf8] sm:$0xff]  ;;  %v549_v45 = vld [vmem:[%s6280_s15 + $0x28] sm:$0xff]   ;;  %p5787_p3 = pnand %p5786_p4, %p5780_p8 }
 0x15e   : > { %4854 = vmatpush3.bf16.msra.mxu0 %v5321_v7  ;;  %v1137_v46 = vld [vmem:[#allocation5 + $0x100] sm:$0xff]  ;;  %v5347_v47 = vld [vmem:[#allocation11 + $0x140] sm:$0xff]   ;;  %v5348_v48 = vld [vmem:[#allocation11 + $0x148] sm:$0xff]  }
 0x15f   : > { %4855 = vmatprep.subr.bf16.mxu0 %v5880_v0  ;;  %1188 = vperm.xlu0 %5316, %v1113_v14   ;;  %v5349_v49 = vld [vmem:[#allocation11 + $0xc0] sm:$0xff]   ;;  %v5350_v51 = vld [vmem:[#allocation11 + $0xc8] sm:$0xff]   ;;  %v5351_v54 = vld [vmem:[#allocation11 + $0xd0] sm:$0xff]  }
 0x160   : > { %1193 = vperm.xlu1 %5317, %v1114_v15   ;;  %v1138_v50 = vld [vmem:[#allocation5 + $0x108] sm:$0xff]  ;;  %2016 = vmatpush1.bf16.msra.mxu1 %v5349_v49  ;;  %v1139_v52 = vld [vmem:[#allocation5 + $0x110] sm:$0xff]  ;;  %v1140_v53 = vld [vmem:[#allocation5 + $0x118] sm:$0xff] }
 0x161   : > { %2017 = vmatprep.subr.bf16.mxu1 %v8031_v1  ;;  %v5352_v55 = vld [vmem:[#allocation11 + $0x150] sm:$0xff]   ;;  %v551_v56 = vld [vmem:[%s6280_s15 + $0x30] sm:$0xff]   ;;  %v553_v63 = vld [vmem:[%s6280_s15 + $0x38] sm:$0xff]  }
 0x162   : > { %4856 = vmatpush3.bf16.msra.mxu0 %v5322_v10  ;;  %v1141_v57 = vld [vmem:[#allocation5 + $0x120] sm:$0xff]  ;;  %v1142_v58 = vld [vmem:[#allocation5 + $0x128] sm:$0xff]  ;;  %v1143_v60 = vld [vmem:[#allocation5 + $0x130] sm:$0xff] }
 0x163   : > { %4857 = vmatprep.subr.bf16.mxu0 %v5880_v0  ;;  %1198 = vperm.xlu0 %5316, %v1115_v17   ;;  %v5353_v59 = vld [vmem:[#allocation11 + $0xd8] sm:$0xff]   ;;  %v1144_v61 = vld [vmem:[#allocation5 + $0x138] sm:$0xff]  ;;  %v5354_v62 = vld [vmem:[#allocation11 + $0xe0] sm:$0xff]  }
 0x164   : > { %1203 = vperm.xlu1 %5317, %v1116_v18   ;;  %2018 = vmatpush1.bf16.msra.mxu1 %v5350_v51  ;;  %v1105_v2 = vld [vmem:[#allocation5] sm:$0xff]  ;;  %v1106_v3 = vld [vmem:[#allocation5 + $0x8] sm:$0xff]  ;;  %v561_v8 = vld [vmem:[%s6280_s15 + $0x58] sm:$0xff]  }
 0x165   : > { %2019 = vmatprep.subr.bf16.mxu1 %v8031_v1  ;;  %v1145_v4 = vld [vmem:[#allocation5 + $0x140] sm:$0xf]  ;;  %v559_v7 = vld [vmem:[%s6280_s15 + $0x50] sm:$0xff]   ;;  %v5355_v9 = vld [vmem:[#allocation11 + $0xe8] sm:$0xff]  }
 0x166   : > { %4858 = vmatpush3.bf16.msra.mxu0 %v5323_v13  ;;  %v555_v5 = vld [vmem:[%s6280_s15 + $0x40] sm:$0xff]   ;;  %v557_v6 = vld [vmem:[%s6280_s15 + $0x48] sm:$0xff]   ;;  %v5358_v13 = vld [vmem:[#allocation11 + $0x100] sm:$0xff]  }
 0x167   : > { %4859 = vmatprep.subr.bf16.mxu0 %v5880_v0  ;;  %1208 = vperm.xlu0 %5316, %v1117_v20   ;;  %v5356_v10 = vld [vmem:[#allocation11 + $0xf0] sm:$0xff]   ;;  %v5357_v12 = vld [vmem:[#allocation11 + $0xf8] sm:$0xff]   ;;  %v5360_v15 = vld [vmem:[#allocation11 + $0x108] sm:$0xff]  }
 0x168   : > { %1213 = vperm.xlu1 %5317, %v1118_v21   ;;  %2020 = vmatpush1.bf16.msra.mxu1 %v5351_v54  ;;  %v563_v11 = vld [vmem:[%s6280_s15 + $0x60] sm:$0xff]   ;;  %v565_v14 = vld [vmem:[%s6280_s15 + $0x68] sm:$0xff]  }
 0x169   : > { %2021 = vmatprep.subr.bf16.mxu1 %v8031_v1  ;;  %v5361_v18 = vld [vmem:[#allocation11 + $0x110] sm:$0xff]  }
 0x16a   : > { %4860 = vmatpush3.bf16.msra.mxu0 %v5324_v16  ;;  %v5359_v16 = vld [vmem:[#allocation11 + $0x158] sm:$0xff]   ;;  %v5346_v51 = vld [vmem:[%s6280_s15 + $0xa0] ss:$0 sps:$4 sm:$0x33]  }
 0x16b   : > { %4861 = vmatprep.subr.bf16.mxu0 %v5880_v0  ;;  %1218 = vperm.xlu0 %5316, %v1119_v23  }
 0x16c   : > { %1223 = vperm.xlu1 %5317, %v1120_v24   ;;  %2022 = vmatpush1.bf16.msra.mxu1 %v5353_v59  ;;  %v5363_v24 = vld [vmem:[#allocation11 + $0x120] sm:$0xff]  }
 0x16d   : > { %2023 = vmatprep.subr.bf16.mxu1 %v8031_v1 }
 0x16e   : > { %4862 = vmatpush3.bf16.msra.mxu0 %v5325_v19  ;;  %v567_v19 = vld [vmem:[%s6280_s15 + $0x70] sm:$0xff]  }
 0x16f   : > { %1228 = vperm.xlu0 %5316, %v1121_v26   ;;  %4947 = vmatprep.subr.bf16.mxu0 %v5347_v47 }
 0x170   : > { %1233 = vperm.xlu1 %5317, %v1122_v27   ;;  %2024 = vmatpush1.bf16.msra.mxu1 %v5354_v62 }
 0x171   : > { %4864 = vmatmul.mubr.bf16.vlgmr.msra.gmra.mrb[0].mxu0 %v5326_v22  ;;  %2025 = vmatprep.subr.bf16.mxu1 %v8031_v1  ;;  %v5362_v22 = vld [vmem:[#allocation11 + $0x118] sm:$0xff]  }
 0x172   : > { %4867 = vmatprep.mubr.msk.bf16.mxu0 %vm5881_vm0, %v5880_v0  ;;  %4948 = vmatpush3.bf16.msra.mxu0 %v5347_v47  ;;  %v577_v47 = vld [vmem:[%s6280_s15 + $0x98] sm:$0xff]  }
 0x173   : > { %1238 = vperm.xlu0 %5316, %v1123_v28   ;;  %4949 = vmatprep.subr.bf16.mxu0 %v5348_v48  ;;  %v5364_v28 = vld [vmem:[#allocation11 + $0x128] sm:$0xff]  }
 0x174   : > { %1243 = vperm.xlu1 %5317, %v1124_v29   ;;  %2026 = vmatpush1.bf16.msra.mxu1 %v5355_v9  ;;  %v5365_v29 = vld [vmem:[#allocation11 + $0x160] sm:$0xff]  }
 0x175   : > { %2027 = vmatprep.subr.bf16.mxu1 %v8031_v1 }
 0x176   : > { %4950 = vmatpush3.bf16.msra.mxu0 %v5348_v48 }
 0x177   : > { %1248 = vperm.xlu0 %5316, %v1125_v31   ;;  %4951 = vmatprep.subr.bf16.mxu0 %v5352_v55  ;;  %v5366_v31 = vld [vmem:[#allocation11 + $0x130] sm:$0xff]  }
 0x178   : > { %1253 = vperm.xlu1 %5317, %v1126_v32   ;;  %2028 = vmatpush1.bf16.msra.mxu1 %v5356_v10  ;;  %v5367_v32 = vld [vmem:[#allocation11 + $0x168] sm:$0xff]  }
 0x179   : > { %4868 = vmatmul.mubr.bf16.gmra.mrb[4].mxu0 %v541_v25  ;;  %2029 = vmatprep.subr.bf16.mxu1 %v8031_v1  ;;  %v569_v25 = vld [vmem:[%s6280_s15 + $0x78] sm:$0xff]  }
 0x17a   : > { %4871 = vmatprep.mubr.msk.bf16.mxu0 %vm5881_vm0, %v5880_v0  ;;  %4952 = vmatpush3.bf16.msra.mxu0 %v5352_v55 }
 0x17b   : > { %1258 = vperm.xlu0 %5316, %v1127_v33   ;;  %4953 = vmatprep.subr.bf16.mxu0 %v5359_v16  ;;  %v571_v33 = vld [vmem:[%s6280_s15 + $0x80] sm:$0xff]  }
 0x17c   : > { %1263 = vperm.xlu1 %5317, %v1128_v34   ;;  %2030 = vmatpush1.bf16.msra.mxu1 %v5357_v12 }
 0x17d   : > { %2031 = vmatprep.subr.bf16.mxu1 %v8031_v1 }
 0x17e   : > { %4954 = vmatpush3.bf16.msra.mxu0 %v5359_v16 }
 0x17f   : > { %1268 = vperm.xlu0 %5316, %v1129_v36   ;;  %4955 = vmatprep.subr.bf16.mxu0 %v5365_v29  ;;  %v5369_v36 = vld [vmem:[#allocation11 + $0x170] sm:$0xff]  }
 0x180   : > { %1273 = vperm.xlu1 %5317, %v1130_v37   ;;  %2032 = vmatpush1.bf16.msra.mxu1 %v5358_v13 }
 0x181   : > { %4872 = vmatmul.mubr.bf16.gmra.mrb[8].mxu0 %v543_v30  ;;  %2033 = vmatprep.subr.bf16.mxu1 %v8031_v1 }
 0x182   : > { %4875 = vmatprep.mubr.msk.bf16.mxu0 %vm5881_vm0, %v5880_v0  ;;  %4956 = vmatpush3.bf16.msra.mxu0 %v5365_v29 }
 0x183   : > { %1278 = vperm.xlu0 %5316, %v1131_v38   ;;  %4957 = vmatprep.subr.bf16.mxu0 %v5367_v32 }
 0x184   : > { %1283 = vperm.xlu1 %5317, %v1132_v39   ;;  %2034 = vmatpush1.bf16.msra.mxu1 %v5360_v15  ;;  %v573_v39 = vld [vmem:[%s6280_s15 + $0x88] sm:$0xff]  }
 0x185   : > { %2035 = vmatprep.subr.bf16.mxu1 %v8031_v1 }
 0x186   : > { %4958 = vmatpush3.bf16.msra.mxu0 %v5367_v32 }
 0x187   : > { %1288 = vperm.xlu0 %5316, %v1133_v41   ;;  %4959 = vmatprep.subr.bf16.mxu0 %v5369_v36 }
 0x188   : > { %1293 = vperm.xlu1 %5317, %v1134_v42   ;;  %2036 = vmatpush1.bf16.msra.mxu1 %v5361_v18 }
 0x189   : > { %4876 = vmatmul.mubr.bf16.gmra.mrb[12].mxu0 %v545_v35  ;;  %2037 = vmatprep.subr.bf16.mxu1 %v8031_v1  ;;  %v5368_v35 = vld [vmem:[#allocation11 + $0x138] sm:$0xff]  }
 0x18a   : > { %4879 = vmatprep.mubr.msk.bf16.mxu0 %vm5881_vm0, %v5880_v0  ;;  %4960 = vmatpush3.bf16.msra.mxu0 %v5369_v36 }
 0x18b   : > { %1298 = vperm.xlu0 %5316, %v1135_v43   ;;  %v575_v43 = vld [vmem:[%s6280_s15 + $0x90] sm:$0xff]  }
 0x18c   : > { %1303 = vperm.xlu1 %5317, %v1136_v44   ;;  %2038 = vmatpush1.bf16.msra.mxu1 %v5362_v22 }
 0x18d   : > { %2039 = vmatprep.subr.bf16.mxu1 %v8031_v1 }
 0x18f   : > { %1308 = vperm.xlu0 %5316, %v1137_v46  }
 0x190   : > { %1313 = vperm.xlu1 %5317, %v1138_v50   ;;  %2040 = vmatpush1.bf16.msra.mxu1 %v5363_v24 }
 0x191   : > { %4880 = vmatmul.mubr.bf16.gmra.mrb[16].mxu0 %v547_v40  ;;  %2041 = vmatprep.subr.bf16.mxu1 %v8031_v1  ;;  %v5371_v40 = vld [vmem:[#allocation11 + $0x178] sm:$0xff]  }
 0x192   : > { %4883 = vmatprep.mubr.msk.bf16.mxu0 %vm5881_vm0, %v5880_v0  ;;  %4961 = vmatprep.subr.bf16.mxu0 %v5371_v40 }
 0x193   : > { %1318 = vperm.xlu0 %5316, %v1139_v52   ;;  %4962 = vmatpush3.bf16.msra.mxu0 %v5371_v40 }
 0x194   : > { %1323 = vperm.xlu1 %5317, %v1140_v53   ;;  %2042 = vmatpush1.bf16.msra.mxu1 %v5364_v28 }
 0x195   : > { %2043 = vmatprep.subr.bf16.mxu1 %v8031_v1 }
 0x197   : > { %1328 = vperm.xlu0 %5316, %v1141_v57  }
 0x198   : > { %1333 = vperm.xlu1 %5317, %v1142_v58   ;;  %2044 = vmatpush1.bf16.msra.mxu1 %v5366_v31 }
 0x199   : > { %4884 = vmatmul.mubr.bf16.gmra.mrb[20].mxu0 %v549_v45  ;;  %2045 = vmatprep.subr.bf16.mxu1 %v8031_v1 }
 0x19a   : > { %4887 = vmatprep.mubr.msk.bf16.mxu0 %vm5881_vm0, %v5880_v0 }
 0x19b   : > { %1338 = vperm.xlu0 %5316, %v1143_v60  }
 0x19c   : > { %1343 = vperm.xlu1 %5317, %v1144_v61   ;;  %2046 = vmatpush1.bf16.msra.mxu1 %v5368_v35 }
 0x19d   : > { %2513 = vmatprep.subr.bf16.mxu1 %v8031_v1 }
 0x19f   : > { %1148 = vperm.xlu0 %5316, %v1105_v2  }
 0x1a0   : > { %1153 = vperm.xlu1 %5317, %v1106_v3  }
 0x1a1   : > { %4888 = vmatmul.mubr.bf16.gmra.mrb[24].mxu0 %v551_v56 }
 0x1a2   : > { %4891 = vmatprep.mubr.msk.bf16.mxu0 %vm5881_vm0, %v5880_v0 }
 0x1a3   : > { %1348 = vperm.xlu0 %5316, %v1145_v4  }
 0x1a9   : > { %4892 = vmatmul.mubr.bf16.gmra.mrb[28].mxu0 %v553_v63 }
 0x1aa   : > { %4895 = vmatprep.mubr.msk.bf16.mxu0 %vm5881_vm0, %v5880_v0 }
 0x1b1   : > { %4896 = vmatmul.mubr.bf16.gmra.mrb[32].mxu0 %v555_v5 }
 0x1b2   : > { %4899 = vmatprep.mubr.msk.bf16.mxu0 %vm5881_vm0, %v5880_v0 }
 0x1b9   : > { %4900 = vmatmul.mubr.bf16.gmra.mrb[36].mxu0 %v557_v6 }
 0x1ba   : > { %4903 = vmatprep.mubr.msk.bf16.mxu0 %vm5881_vm0, %v5880_v0 }
 0x1c1   : > { %4904 = vmatmul.mubr.bf16.gmra.mrb[40].mxu0 %v559_v7  ;;  %v6468_v7 = vld [vmem:[#allocation11 + $0x80] sm:$0xff]  }
 0x1c2   : > { %4907 = vmatprep.mubr.msk.bf16.mxu0 %vm5881_vm0, %v5880_v0  ;;  %4999 = vmatprep.subr.bf16.mxu0 %v6468_v7 }
 0x1c9   : > { %4908 = vmatmul.mubr.bf16.gmra.mrb[44].mxu0 %v561_v8  ;;  %v6471_v8 = vld [vmem:[#allocation8] ss:$0 sm:$0xff] }
 0x1ca   : > { %4911 = vmatprep.mubr.msk.bf16.mxu0 %vm5881_vm0, %v5880_v0 }
 0x1d1   : > { %4912 = vmatmul.mubr.bf16.gmra.mrb[48].mxu0 %v563_v11  ;;  %v6475_v11 = vld [vmem:[#allocation10] ss:$0 sm:$0xff] }
 0x1d2   : > { %4915 = vmatprep.mubr.msk.bf16.mxu0 %vm5881_vm0, %v5880_v0  ;;  %v6369_v17 = vpop.permute.xlu0 %1158 }
 0x1d3   : > { %v6374_v20 = vpop.permute.xlu1 %1168 }
 0x1d6   : > { %v6377_v21 = vpop.permute.xlu0 %1163 }
 0x1d7   : > { %v6379_v23 = vpop.permute.xlu1 %1173 }
 0x1d9   : > { %4916 = vmatmul.mubr.bf16.gmra.mrb[52].mxu0 %v565_v14 }
 0x1da   : > { %4919 = vmatprep.mubr.msk.bf16.mxu0 %vm5881_vm0, %v5880_v0  ;;  %v6385_v26 = vpop.permute.xlu0 %1178 }
 0x1db   : > { %v6387_v27 = vpop.permute.xlu1 %1183 }
 0x1de   : > { %v6391_v30 = vpop.permute.xlu0 %1188 }
 0x1df   : > { %v6396_v34 = vpop.permute.xlu1 %1193 }
 0x1e1   : > { %4920 = vmatmul.mubr.bf16.gmra.mrb[56].mxu0 %v567_v19 }
 0x1e2   : > { %4923 = vmatprep.mubr.msk.bf16.mxu0 %vm5881_vm0, %v5880_v0  ;;  %v6399_v37 = vpop.permute.xlu0 %1198 }
 0x1e3   : > { %v6401_v38 = vpop.permute.xlu1 %1203 }
 0x1e6   : > { %v6407_v41 = vpop.permute.xlu0 %1208 }
 0x1e7   : > { %v6409_v42 = vpop.permute.xlu1 %1213 }
 0x1e9   : > { %4924 = vmatmul.mubr.bf16.gmra.mrb[60].mxu0 %v569_v25 }
 0x1ea   : > { %4927 = vmatprep.mubr.msk.bf16.mxu0 %vm5881_vm0, %v5880_v0  ;;  %v6414_v44 = vpop.permute.xlu0 %1218 }
 0x1eb   : > { %v6416_v45 = vpop.permute.xlu1 %1223 }
 0x1ee   : > { %v6418_v46 = vpop.permute.xlu0 %1228 }
 0x1ef   : > { %v6423_v48 = vpop.permute.xlu1 %1233 }
 0x1f1   : > { %4928 = vmatmul.mubr.bf16.gmra.mrb[64].mxu0 %v571_v33 }
 0x1f2   : > { %4931 = vmatprep.mubr.msk.bf16.mxu0 %vm5881_vm0, %v5880_v0  ;;  %v6425_v49 = vpop.permute.xlu0 %1238 }
 0x1f3   : > { %v6427_v50 = vpop.permute.xlu1 %1243 }
 0x1f6   : > { %v6432_v52 = vpop.permute.xlu0 %1248 }
 0x1f7   : > { %v6434_v53 = vpop.permute.xlu1 %1253 }
 0x1f9   : > { %4932 = vmatmul.mubr.bf16.gmra.mrb[68].mxu0 %v573_v39 }
 0x1fa   : > { %4935 = vmatprep.mubr.msk.bf16.mxu0 %vm5881_vm0, %v5880_v0  ;;  %v6436_v54 = vpop.permute.xlu0 %1258 }
 0x1fb   : > { %v6438_v55 = vpop.permute.xlu1 %1263 }
 0x1fe   : > { %v6440_v56 = vpop.permute.xlu0 %1268 }
 0x1ff   : > { %v6442_v57 = vpop.permute.xlu1 %1273 }
 0x201   : > { %4936 = vmatmul.mubr.bf16.gmra.mrb[72].mxu0 %v575_v43 }
 0x202   : > { %4939 = vmatprep.mubr.msk.bf16.mxu0 %vm5881_vm0, %v5880_v0  ;;  %v6444_v58 = vpop.permute.xlu0 %1278 }
 0x203   : > { %v6446_v59 = vpop.permute.xlu1 %1283 }
 0x206   : > { %v6448_v60 = vpop.permute.xlu0 %1288 }
 0x209   : > { %4940 = vmatmul.mubr.bf16.gmra.mrb[76].mxu0 %v577_v47 }
 0x20a   : > { %4943 = vmatprep.mubr.msk.bf16.mxu0 %vm5881_vm0, %v5880_v0  ;;  %v6450_v0 = vpop.permute.xlu1 %1293  ;;  %v6452_v61 = vpop.permute.xlu0 %1298 }
 0x20e   : > { %v6454_v62 = vpop.permute.xlu1 %1303  ;;  %v6456_v63 = vpop.permute.xlu0 %1308 }
 0x211   : > { %4944 = vmatmul.mubr.bf16.gmra.mrb[80].mxu0 %v5346_v51 }
 0x212   : > { %v6458_v2 = vpop.permute.xlu1 %1313  ;;  %v6460_v3 = vpop.permute.xlu0 %1318 }
 0x216   : > { %v6462_v4 = vpop.permute.xlu1 %1323  ;;  %v6464_v5 = vpop.permute.xlu0 %1328 }
 0x21a   : > { %v6466_v6 = vpop.permute.xlu1 %1333  ;;  %v6473_v9 = vpop.permute.xlu0 %1338 }
 0x21e   : > { %v6477_v12 = vpop.permute.xlu1 %1343  ;;  %v1149_v25 = vpop.permute.xlu0 %1148 }
 0x222   : > { %v1154_v28 = vpop.permute.xlu1 %1153 }
 0x244   : > { %v802_v10 = vpop.f32.mrb[0].mxu0 }
 0x245   : > { %v975_v13 = vmul.f32 %v6471_v8, %v802_v10  ;;  %v4865_v14 = vpop.f32.mrb[1].mxu0 }
 0x246   : > { %v805_v15 = vpop.f32.mrb[2].mxu0 }
 0x247   : > { %v1023_v16 = vadd.f32 %v6475_v11, %v975_v13  ;;  %v976_v18 = vmul.f32 %v6471_v8, %v805_v15  ;;  %v4866_v19 = vpop.f32.mrb[3].mxu0 }
 0x249   : > { %v1024_v22 = vadd.f32 %v6475_v11, %v976_v18  ;;  %v1064_v24 = vmax.f32 %v1023_v16, 0.0 }
 0x24b   : > { %v1065_v29 = vmax.f32 %v1024_v22, 0.0  ;;  %v1351_v32 = vmul.f32 %v1149_v25, %v1064_v24 }
 0x24c   : > { %v810_v31 = vpop.f32.mrb[4].mxu0 }
 0x24d   : > { %v1352_v33 = vmul.f32 %v1154_v28, %v1065_v29  ;;  %v977_v35 = vmul.f32 %v6471_v8, %v810_v31  ;;  %v4869_v36 = vpop.f32.mrb[5].mxu0 }
 0x24e   : > { %v813_v39 = vpop.f32.mrb[6].mxu0 }
 0x24f   : > { %v6484_v40 = vpack.c.bf16 %v1352_v33, %v1351_v32  ;;  %v1025_v43 = vadd.f32 %v6475_v11, %v977_v35  ;;  %v978_v47 = vmul.f32 %v6471_v8, %v813_v39  ;;  %v4870_v51 = vpop.f32.mrb[7].mxu0 }
 0x251   : > { %v1066_v10 = vmax.f32 %v1025_v43, 0.0  ;;  %v1026_v13 = vadd.f32 %v6475_v11, %v978_v47  ;;  %v1417_v15 = vshll.u32 %v6484_v40, 16  ;;  %v1594_v35 = vrot.slane %v6484_v40, 1 }
 0x252   : > { %v1415_v36 = vshrl.u32 %v6484_v40, 16 }
 0x253   : > { %v1067_v14 = vmax.f32 %v1026_v13, 0.0  ;;  %v1353_v18 = vmul.f32 %v6369_v17, %v1066_v10  ;;  %v1419_v33 = vrot.slane %v1417_v15, 1 }
 0x254   : > { %v818_v16 = vpop.f32.mrb[8].mxu0 }
 0x255   : > { %v1354_v19 = vmul.f32 %v6377_v21, %v1067_v14  ;;  %v979_v22 = vmul.f32 %v6471_v8, %v818_v16  ;;  %v4873_v24 = vpop.f32.mrb[9].mxu0  ;;  %v1420_v13 = vor.u32 %v1419_v33, %v1415_v36 }
 0x256   : > { %v821_v25 = vpop.f32.mrb[10].mxu0 }
 0x257   : > { %v6493_v28 = vpack.c.bf16 %v1354_v19, %v1353_v18  ;;  %v1027_v29 = vadd.f32 %v6475_v11, %v979_v22  ;;  %v980_v31 = vmul.f32 %v6471_v8, %v821_v25  ;;  %v4874_v32 = vpop.f32.mrb[11].mxu0 }
 0x259   : > { %v1068_v17 = vmax.f32 %v1027_v29, 0.0  ;;  %v1028_v21 = vadd.f32 %v6475_v11, %v980_v31  ;;  %v1595_v39 = vrot.slane %v6493_v28, 1  ;;  %v1422_v43 = vshll.u32 %v6493_v28, 16 }
 0x25b   : > { %v1069_v47 = vmax.f32 %v1028_v21, 0.0  ;;  %v1424_v51 = vrot.slane %v1422_v43, 1  ;;  %v6503_v10 = vsel %vm1593_vm1, %v1594_v35, %v1595_v39  ;;  %v1355_v15 = vmul.f32 %v6374_v20, %v1068_v17 }
 0x25c   : > { %v826_v14 = vpop.f32.mrb[12].mxu0 }
 0x25d   : > { %v1356_v16 = vmul.f32 %v6379_v23, %v1069_v47  ;;  %v981_v18 = vmul.f32 %v6471_v8, %v826_v14  ;;  %v4877_v19 = vpop.f32.mrb[13].mxu0  ;;  %v6509_v22 = vsel %vm1413_vm2, %v1420_v13, %v1424_v51 }
 0x25e   : > { %v829_v24 = vpop.f32.mrb[14].mxu0 }
 0x25f   : > { %v6511_v25 = vpack.c.bf16 %v1356_v16, %v1355_v15  ;;  %v1029_v29 = vadd.f32 %v6475_v11, %v981_v18  ;;  %v982_v31 = vmul.f32 %v6471_v8, %v829_v24  ;;  %v4878_v32 = vpop.f32.mrb[15].mxu0  ;;  %v1426_v15 = vshrl.u32 %v6493_v28, 16 }
 0x261   : > { %8105 = vst [vmem:[#allocation29_spill] sm:$0xff] %v6511_v25  ;;  %v1070_v33 = vmax.f32 %v1029_v29, 0.0  ;;  %v1030_v35 = vadd.f32 %v6475_v11, %v982_v31  ;;  %v1430_v20 = vshll.u32 %v6511_v25, 16  ;;  %v1597_v17 = vrot.slane %v6511_v25, 1 }
 0x263   : > { %v1071_v23 = vmax.f32 %v1030_v35, 0.0  ;;  %v1357_v21 = vmul.f32 %v6385_v26, %v1070_v33  ;;  %v1432_v16 = vrot.slane %v1430_v20, 1  ;;  %v6527_v31 = vsel %vm1593_vm1, %v1595_v39, %v1597_v17 }
 0x264   : > { %v834_v36 = vpop.f32.mrb[16].mxu0  ;;  %v1428_v26 = vor.u32 %v1426_v15, %v1424_v51  ;;  %v1766_v51 = vrot.slane %v6527_v31, 1 }
 0x265   : > { %v1358_v43 = vmul.f32 %v6387_v27, %v1071_v23  ;;  %v983_v47 = vmul.f32 %v6471_v8, %v834_v36  ;;  %v4881_v13 = vpop.f32.mrb[17].mxu0  ;;  %v1434_v27 = vshrl.u32 %v6511_v25, 16 }
 0x266   : > { %v837_v14 = vpop.f32.mrb[18].mxu0  ;;  %v6534_v23 = vsel %vm1413_vm2, %v1428_v26, %v1432_v16 }
 0x267   : > { %v6522_v18 = vpack.c.bf16 %v1358_v43, %v1357_v21  ;;  %v1031_v19 = vadd.f32 %v6475_v11, %v983_v47  ;;  %v984_v24 = vmul.f32 %v6471_v8, %v837_v14  ;;  %v4882_v29 = vpop.f32.mrb[19].mxu0  ;;  %v1436_v43 = vor.u32 %v1434_v27, %v1432_v16 }
 0x268   : > { %v1763_v16 = vrot.slane %v6534_v23, 1 }
 0x269   : > { %8106 = vst [vmem:[#allocation30_spill] sm:$0xff] %v6522_v18  ;;  %v1072_v32 = vmax.f32 %v1031_v19, 0.0  ;;  %v1032_v33 = vadd.f32 %v6475_v11, %v984_v24  ;;  %v1599_v35 = vrot.slane %v6522_v18, 1  ;;  %v1438_v20 = vshll.u32 %v6522_v18, 16 }
 0x26b   : > { %v1073_v36 = vmax.f32 %v1032_v33, 0.0  ;;  %v6537_v21 = vsel %vm1593_vm1, %v1597_v17, %v1599_v35  ;;  %v1440_v39 = vrot.slane %v1438_v20, 1  ;;  %v1359_v14 = vmul.f32 %v6391_v30, %v1072_v32  ;;  %v5370_v32 = vld [vmem:[#allocation11] sm:$0xff]  }
 0x26c   : > { %v842_v47 = vpop.f32.mrb[20].mxu0  ;;  %v1767_v13 = vrot.slane %v6537_v21, 1 }
 0x26d   : > { %v1360_v15 = vmul.f32 %v6396_v34, %v1073_v36  ;;  %v985_v19 = vmul.f32 %v6471_v8, %v842_v47  ;;  %v4885_v24 = vpop.f32.mrb[21].mxu0  ;;  %v6545_v29 = vsel %vm1413_vm2, %v1436_v43, %v1440_v39  ;;  %v1442_v43 = vshrl.u32 %v6522_v18, 16 }
 0x26e   : > { %v845_v26 = vpop.f32.mrb[22].mxu0  ;;  %v1768_v17 = vsel %vm1593_vm1, %v1766_v51, %v1767_v13  ;;  %v1764_v27 = vrot.slane %v6545_v29, 1 }
 0x26f   : > { %v6550_v33 = vpack.c.bf16 %v1360_v15, %v1359_v14  ;;  %v1033_v20 = vadd.f32 %v6475_v11, %v985_v19  ;;  %v986_v30 = vmul.f32 %v6471_v8, %v845_v26  ;;  %v4886_v34 = vpop.f32.mrb[23].mxu0  ;;  %4963 = vmatprep.mubr.bf16.mxu0 %v1768_v17  ;;  %v1444_v26 = vor.u32 %v1442_v43, %v1440_v39 }
 0x270   : > { %v1765_v36 = vsel %vm1593_vm1, %v1763_v16, %v1764_v27  ;;  %v5372_v16 = vld [vmem:[#allocation11 + $0x8] sm:$0xff]  }
 0x271   : > { %8107 = vst [vmem:[#allocation31_spill] sm:$0xff] %v6550_v33  ;;  %v1074_v47 = vmax.f32 %v1033_v20, 0.0  ;;  %v1034_v51 = vadd.f32 %v6475_v11, %v986_v30  ;;  %2047 = vmatprep.mubr.bf16.mxu1 %v1765_v36  ;;  %v1601_v24 = vrot.slane %v6550_v33, 1  ;;  %v1446_v14 = vshll.u32 %v6550_v33, 16 }
 0x272   : > { %2048 = vmatmul.mubr.bf16.vlgmr.msra.gmra.mrb[0].mxu1 %v6527_v31 }
 0x273   : > { %v1075_v15 = vmax.f32 %v1034_v51, 0.0  ;;  %2514 = vmatpush1.bf16.msra.mxu1 %v5370_v32  ;;  %v6561_v19 = vsel %vm1593_vm1, %v1599_v35, %v1601_v24  ;;  %v1448_v17 = vrot.slane %v1446_v14, 1  ;;  %v1361_v30 = vmul.f32 %v6399_v37, %v1074_v47  ;;  %v5382_v35 = vld [vmem:[#allocation11 + $0x88] sm:$0xff]  }
 0x274   : > { %v850_v34 = vpop.f32.mrb[24].mxu0  ;;  %v1771_v20 = vrot.slane %v6561_v19, 1  ;;  %2515 = vmatprep.subr.bf16.mxu1 %v8031_v1 }
 0x275   : > { %v1362_v36 = vmul.f32 %v6401_v38, %v1075_v15  ;;  %v987_v18 = vmul.f32 %v6471_v8, %v850_v34  ;;  %v4889_v25 = vpop.f32.mrb[25].mxu0  ;;  %v6569_v32 = vsel %vm1413_vm2, %v1444_v26, %v1448_v17  ;;  %v5373_v38 = vld [vmem:[#allocation11 + $0x10] sm:$0xff]   ;;  %v1450_v15 = vshrl.u32 %v6550_v33, 16 }
 0x276   : > { %8108 = vst [vmem:[#allocation32_spill] sm:$0xff] %v6569_v32  ;;  %v853_v51 = vpop.f32.mrb[26].mxu0  ;;  %v1772_v39 = vsel %vm1593_vm1, %v1767_v13, %v1771_v20  ;;  %v1769_v43 = vrot.slane %v6569_v32, 1  ;;  %v8110_v26 = vmov 0  }
 0x277   : > { %v6573_v14 = vpack.c.bf16 %v1362_v36, %v1361_v30  ;;  %v1035_v1 = vadd.f32 %v6475_v11, %v987_v18  ;;  %v988_v37 = vmul.f32 %v6471_v8, %v853_v51  ;;  %v4890_v47 = vpop.f32.mrb[27].mxu0  ;;  %4964 = vmatmul.mubr.bf16.vlgmr.msra.gmra.mrb[84].mxu0 %v1772_v39  ;;  %2516 = vmatpush1.bf16.msra.mxu1 %v5372_v16  ;;  %v5384_v36 = vld [vmem:[#allocation11 + $0x90] sm:$0xff]  }
 0x278   : > { %v1770_v25 = vsel %vm1593_vm1, %v1764_v27, %v1769_v43  ;;  %2517 = vmatprep.subr.bf16.mxu1 %v8110_v26  ;;  %5000 = vmatpush3.bf16.msra.mxu0 %v6468_v7  ;;  %v1452_v51 = vor.u32 %v1450_v15, %v1448_v17  ;;  %v5374_v7 = vld [vmem:[#allocation11 + $0x18] sm:$0xff]  }
 0x279   : > { %8109 = vst [vmem:[#allocation33_spill] sm:$0xff] %v6573_v14  ;;  %v1076_v13 = vmax.f32 %v1035_v1, 0.0  ;;  %v1036_v34 = vadd.f32 %v6475_v11, %v988_v37  ;;  %2055 = vmatprep.mubr.bf16.mxu1 %v1770_v25  ;;  %v1603_v18 = vrot.slane %v6573_v14, 1  ;;  %v1454_v30 = vshll.u32 %v6573_v14, 16  ;;  %5001 = vmatprep.subr.bf16.mxu0 %v5382_v35  ;;  %v5386_v17 = vld [vmem:[#allocation11 + $0x98] sm:$0xff]  }
 0x27a   : > { %2056 = vmatmul.mubr.bf16.gmra.mrb[4].mxu1 %v6537_v21 }
 0x27b   : > { %v1077_v16 = vmax.f32 %v1036_v34, 0.0  ;;  %v6586_v27 = vsel %vm1593_vm1, %v1601_v24, %v1603_v18  ;;  %v1456_v39 = vrot.slane %v1454_v30, 1  ;;  %2518 = vmatpush1.bf16.msra.mxu1 %v5373_v38  ;;  %v1363_v47 = vmul.f32 %v6407_v41, %v1076_v13  ;;  %v5375_v13 = vld [vmem:[#allocation11 + $0x20] sm:$0xff]  }
 0x27c   : > { %v858_v1 = vpop.f32.mrb[28].mxu0  ;;  %v1775_v37 = vrot.slane %v6586_v27, 1  ;;  %2519 = vmatprep.subr.bf16.mxu1 %v8110_v26  ;;  %5002 = vmatpush3.bf16.msra.mxu0 %v5382_v35 }
 0x27d   : > { %v1364_v25 = vmul.f32 %v6409_v42, %v1077_v16  ;;  %v989_v33 = vmul.f32 %v6471_v8, %v858_v1  ;;  %v4893_v34 = vpop.f32.mrb[29].mxu0  ;;  %v6594_v24 = vsel %vm1413_vm2, %v1452_v51, %v1456_v39  ;;  %5003 = vmatprep.subr.bf16.mxu0 %v5384_v36  ;;  %v1458_v51 = vshrl.u32 %v6573_v14, 16 }
 0x27e   : > { %v861_v38 = vpop.f32.mrb[30].mxu0  ;;  %v1776_v15 = vsel %vm1593_vm1, %v1771_v20, %v1775_v37  ;;  %v1773_v30 = vrot.slane %v6594_v24, 1 }
 0x27f   : > { %v6598_v32 = vpack.c.bf16 %v1364_v25, %v1363_v47  ;;  %v1037_v35 = vadd.f32 %v6475_v11, %v989_v33  ;;  %v990_v41 = vmul.f32 %v6471_v8, %v861_v38  ;;  %v4894_v42 = vpop.f32.mrb[31].mxu0  ;;  %4967 = vmatprep.mubr.bf16.mxu0 %v1776_v15  ;;  %2520 = vmatpush1.bf16.msra.mxu1 %v5374_v7  ;;  %v5388_v25 = vld [vmem:[#allocation11 + $0xa0] sm:$0xff]  }
 0x280   : > { %v1774_v16 = vsel %vm1593_vm1, %v1769_v43, %v1773_v30  ;;  %2521 = vmatprep.subr.bf16.mxu1 %v8110_v26  ;;  %5004 = vmatpush3.bf16.msra.mxu0 %v5384_v36  ;;  %v1460_v34 = vor.u32 %v1458_v51, %v1456_v39  ;;  %v5376_v36 = vld [vmem:[#allocation11 + $0x28] sm:$0xff]  }
 0x281   : > { %8111 = vst [vmem:[#allocation34_spill] sm:$0xff] %v6598_v32  ;;  %v1078_v20 = vmax.f32 %v1037_v35, 0.0  ;;  %v1038_v1 = vadd.f32 %v6475_v11, %v990_v41  ;;  %2063 = vmatprep.mubr.bf16.mxu1 %v1774_v16  ;;  %v1605_v47 = vrot.slane %v6598_v32, 1  ;;  %v1462_v33 = vshll.u32 %v6598_v32, 16  ;;  %5005 = vmatprep.subr.bf16.mxu0 %v5386_v17  ;;  %v5390_v39 = vld [vmem:[#allocation11 + $0xa8] sm:$0xff]  }
 0x282   : > { %2064 = vmatmul.mubr.bf16.gmra.mrb[8].mxu1 %v6561_v19 }
 0x283   : > { %v1079_v7 = vmax.f32 %v1038_v1, 0.0  ;;  %v6610_v43 = vsel %vm1593_vm1, %v1603_v18, %v1605_v47  ;;  %v1464_v38 = vrot.slane %v1462_v33, 1  ;;  %2522 = vmatpush1.bf16.msra.mxu1 %v5375_v13  ;;  %v1365_v41 = vmul.f32 %v6414_v44, %v1078_v20  ;;  %v5377_v20 = vld [vmem:[#allocation11 + $0x30] sm:$0xff]  }
 0x284   : > { %v866_v15 = vpop.f32.mrb[32].mxu0  ;;  %v1779_v35 = vrot.slane %v6610_v43, 1  ;;  %2523 = vmatprep.subr.bf16.mxu1 %v8110_v26  ;;  %5006 = vmatpush3.bf16.msra.mxu0 %v5386_v17 }
 0x285   : > { %v1366_v42 = vmul.f32 %v6416_v45, %v1079_v7  ;;  %v991_v16 = vmul.f32 %v6471_v8, %v866_v15  ;;  %v4897_v1 = vpop.f32.mrb[33].mxu0  ;;  %v6618_v18 = vsel %vm1413_vm2, %v1460_v34, %v1464_v38  ;;  %5007 = vmatprep.subr.bf16.mxu0 %v5388_v25  ;;  %v1466_v34 = vshrl.u32 %v6598_v32, 16 }
 0x286   : > { %v869_v13 = vpop.f32.mrb[34].mxu0  ;;  %v1780_v51 = vsel %vm1593_vm1, %v1775_v37, %v1779_v35  ;;  %v1777_v33 = vrot.slane %v6618_v18, 1 }
 0x287   : > { %v6622_v14 = vpack.c.bf16 %v1366_v42, %v1365_v41  ;;  %v1039_v17 = vadd.f32 %v6475_v11, %v991_v16  ;;  %v992_v44 = vmul.f32 %v6471_v8, %v869_v13  ;;  %v4898_v45 = vpop.f32.mrb[35].mxu0  ;;  %4968 = vmatmul.mubr.bf16.gmra.mrb[88].mxu0 %v1780_v51  ;;  %2524 = vmatpush1.bf16.msra.mxu1 %v5376_v36  ;;  %v5392_v16 = vld [vmem:[#allocation11 + $0xb0] sm:$0xff]  }
 0x288   : > { %v1778_v7 = vsel %vm1593_vm1, %v1773_v30, %v1777_v33  ;;  %2525 = vmatprep.subr.bf16.mxu1 %v8110_v26  ;;  %5008 = vmatpush3.bf16.msra.mxu0 %v5388_v25  ;;  %v1468_v1 = vor.u32 %v1466_v34, %v1464_v38  ;;  %v5378_v25 = vld [vmem:[#allocation11 + $0x38] sm:$0xff]  }
 0x289   : > { %v1080_v37 = vmax.f32 %v1039_v17, 0.0  ;;  %v1040_v15 = vadd.f32 %v6475_v11, %v992_v44  ;;  %2071 = vmatprep.mubr.bf16.mxu1 %v1778_v7  ;;  %v1607_v41 = vrot.slane %v6622_v14, 1  ;;  %v1470_v42 = vshll.u32 %v6622_v14, 16  ;;  %5009 = vmatprep.subr.bf16.mxu0 %v5390_v39  ;;  %v5393_v38 = vld [vmem:[#allocation11 + $0xb8] sm:$0xff]  }
 0x28a   : > { %2072 = vmatmul.mubr.bf16.gmra.mrb[12].mxu1 %v6586_v27 }
 0x28b   : > { %v1081_v36 = vmax.f32 %v1040_v15, 0.0  ;;  %v6634_v30 = vsel %vm1593_vm1, %v1605_v47, %v1607_v41  ;;  %v1472_v13 = vrot.slane %v1470_v42, 1  ;;  %2526 = vmatpush1.bf16.msra.mxu1 %v5377_v20  ;;  %v1367_v44 = vmul.f32 %v6418_v46, %v1080_v37  ;;  %v5379_v37 = vld [vmem:[#allocation11 + $0x40] sm:$0xff]  }
 0x28c   : > { %v874_v51 = vpop.f32.mrb[36].mxu0  ;;  %v1783_v17 = vrot.slane %v6634_v30, 1  ;;  %2527 = vmatprep.subr.bf16.mxu1 %v8110_v26  ;;  %5010 = vmatpush3.bf16.msra.mxu0 %v5390_v39 }
 0x28d   : > { %v1368_v45 = vmul.f32 %v6423_v48, %v1081_v36  ;;  %v993_v7 = vmul.f32 %v6471_v8, %v874_v51  ;;  %v4901_v15 = vpop.f32.mrb[37].mxu0  ;;  %v6642_v47 = vsel %vm1413_vm2, %v1468_v1, %v1472_v13  ;;  %5011 = vmatprep.subr.bf16.mxu0 %v5392_v16  ;;  %v1474_v1 = vshrl.u32 %v6622_v14, 16 }
 0x28e   : > { %v877_v20 = vpop.f32.mrb[38].mxu0  ;;  %v1784_v34 = vsel %vm1593_vm1, %v1779_v35, %v1783_v17  ;;  %v1781_v42 = vrot.slane %v6642_v47, 1 }
 0x28f   : > { %v6646_v32 = vpack.c.bf16 %v1368_v45, %v1367_v44  ;;  %v1041_v39 = vadd.f32 %v6475_v11, %v993_v7  ;;  %v994_v46 = vmul.f32 %v6471_v8, %v877_v20  ;;  %v4902_v48 = vpop.f32.mrb[39].mxu0  ;;  %4971 = vmatprep.mubr.bf16.mxu0 %v1784_v34  ;;  %2528 = vmatpush1.bf16.msra.mxu1 %v5378_v25  ;;  %v5381_v20 = vld [vmem:[#allocation11 + $0x48] sm:$0xff]  }
 0x290   : > { %v1782_v36 = vsel %vm1593_vm1, %v1777_v33, %v1781_v42  ;;  %2529 = vmatprep.subr.bf16.mxu1 %v8110_v26  ;;  %5012 = vmatpush3.bf16.msra.mxu0 %v5392_v16  ;;  %v1476_v33 = vor.u32 %v1474_v1, %v1472_v13 }
 0x291   : > { %8112 = vst [vmem:[#allocation35_spill] sm:$0xff] %v6646_v32  ;;  %v1082_v35 = vmax.f32 %v1041_v39, 0.0  ;;  %v1042_v51 = vadd.f32 %v6475_v11, %v994_v46  ;;  %2079 = vmatprep.mubr.bf16.mxu1 %v1782_v36  ;;  %v1609_v44 = vrot.slane %v6646_v32, 1  ;;  %v1478_v45 = vshll.u32 %v6646_v32, 16  ;;  %5013 = vmatprep.subr.bf16.mxu0 %v5393_v38 }
 0x292   : > { %2080 = vmatmul.mubr.bf16.gmra.mrb[16].mxu1 %v6610_v43 }
 0x293   : > { %v1083_v25 = vmax.f32 %v1042_v51, 0.0  ;;  %v6658_v7 = vsel %vm1593_vm1, %v1607_v41, %v1609_v44  ;;  %v1480_v15 = vrot.slane %v1478_v45, 1  ;;  %2530 = vmatpush1.bf16.msra.mxu1 %v5379_v37  ;;  %v1369_v39 = vmul.f32 %v6425_v49, %v1082_v35  ;;  %v5383_v35 = vld [vmem:[#allocation11 + $0x50] sm:$0xff]  }
 0x294   : > { %v882_v16 = vpop.f32.mrb[40].mxu0  ;;  %v1787_v34 = vrot.slane %v6658_v7, 1  ;;  %2531 = vmatprep.subr.bf16.mxu1 %v8110_v26  ;;  %5014 = vmatpush3.bf16.msra.mxu0 %v5393_v38 }
 0x295   : > { %v1370_v46 = vmul.f32 %v6427_v50, %v1083_v25  ;;  %v995_v48 = vmul.f32 %v6471_v8, %v882_v16  ;;  %v4905_v36 = vpop.f32.mrb[41].mxu0  ;;  %v6666_v41 = vsel %vm1413_vm2, %v1476_v33, %v1480_v15  ;;  %3240 = vmatprep.subr.bf16.mxu0 %v8110_v26  ;;  %v1482_v25 = vshrl.u32 %v6646_v32, 16 }
 0x296   : > { %v885_v13 = vpop.f32.mrb[42].mxu0  ;;  %v1788_v37 = vsel %vm1593_vm1, %v1783_v17, %v1787_v34  ;;  %v1785_v1 = vrot.slane %v6666_v41, 1  ;;  %v5385_v36 = vld [vmem:[#allocation11 + $0x58] sm:$0xff]  }
 0x297   : > { %v6671_v51 = vpack.c.bf16 %v1370_v46, %v1369_v39  ;;  %v1043_v38 = vadd.f32 %v6475_v11, %v995_v48  ;;  %v996_v49 = vmul.f32 %v6471_v8, %v885_v13  ;;  %v4906_v50 = vpop.f32.mrb[43].mxu0  ;;  %4972 = vmatmul.mubr.bf16.gmra.mrb[92].mxu0 %v1788_v37  ;;  %2532 = vmatpush1.bf16.msra.mxu1 %v5381_v20 }
 0x298   : > { %v1786_v45 = vsel %vm1593_vm1, %v1781_v42, %v1785_v1  ;;  %2533 = vmatprep.subr.bf16.mxu1 %v8110_v26  ;;  %v1484_v48 = vor.u32 %v1482_v25, %v1480_v15 }
 0x299   : > { %8113 = vst [vmem:[#allocation36_spill] sm:$0xff] %v6671_v51  ;;  %v1084_v33 = vmax.f32 %v1043_v38, 0.0  ;;  %v1044_v17 = vadd.f32 %v6475_v11, %v996_v49  ;;  %2087 = vmatprep.mubr.bf16.mxu1 %v1786_v45  ;;  %v1611_v16 = vrot.slane %v6671_v51, 1  ;;  %v1486_v39 = vshll.u32 %v6671_v51, 16 }
 0x29a   : > { %2088 = vmatmul.mubr.bf16.gmra.mrb[20].mxu1 %v6634_v30 }
 0x29b   : > { %v1085_v46 = vmax.f32 %v1044_v17, 0.0  ;;  %v6683_v20 = vsel %vm1593_vm1, %v1609_v44, %v1611_v16  ;;  %v1488_v42 = vrot.slane %v1486_v39, 1  ;;  %2534 = vmatpush1.bf16.msra.mxu1 %v5383_v35  ;;  %v1371_v38 = vmul.f32 %v6432_v52, %v1084_v33 }
 0x29c   : > { %v890_v13 = vpop.f32.mrb[44].mxu0  ;;  %v1791_v37 = vrot.slane %v6683_v20, 1  ;;  %2535 = vmatprep.subr.bf16.mxu1 %v8110_v26 }
 0x29d   : > { %v1372_v49 = vmul.f32 %v6434_v53, %v1085_v46  ;;  %v997_v50 = vmul.f32 %v6471_v8, %v890_v13  ;;  %v4909_v45 = vpop.f32.mrb[45].mxu0  ;;  %v6691_v17 = vsel %vm1413_vm2, %v1484_v48, %v1488_v42  ;;  %v5387_v53 = vld [vmem:[#allocation11 + $0x60] sm:$0xff]   ;;  %v1490_v46 = vshrl.u32 %v6671_v51, 16 }
 0x29e   : > { %v893_v44 = vpop.f32.mrb[46].mxu0  ;;  %v1792_v15 = vsel %vm1593_vm1, %v1787_v34, %v1791_v37  ;;  %v1789_v35 = vrot.slane %v6691_v17, 1  ;;  %v5389_v45 = vld [vmem:[#allocation11 + $0x68] sm:$0xff]  }
 0x29f   : > { %v6695_v25 = vpack.c.bf16 %v1372_v49, %v1371_v38  ;;  %v1045_v39 = vadd.f32 %v6475_v11, %v997_v50  ;;  %v998_v32 = vmul.f32 %v6471_v8, %v893_v44  ;;  %v4910_v52 = vpop.f32.mrb[47].mxu0  ;;  %4975 = vmatprep.mubr.bf16.mxu0 %v1792_v15  ;;  %2536 = vmatpush1.bf16.msra.mxu1 %v5385_v36 }
 0x2a0   : > { %v1790_v33 = vsel %vm1593_vm1, %v1785_v1, %v1789_v35  ;;  %2537 = vmatprep.subr.bf16.mxu1 %v8110_v26  ;;  %v1492_v50 = vor.u32 %v1490_v46, %v1488_v42 }
 0x2a1   : > { %8114 = vst [vmem:[#allocation37_spill] sm:$0xff] %v6695_v25  ;;  %v1086_v48 = vmax.f32 %v1045_v39, 0.0  ;;  %v1046_v34 = vadd.f32 %v6475_v11, %v998_v32  ;;  %2095 = vmatprep.mubr.bf16.mxu1 %v1790_v33  ;;  %v1613_v13 = vrot.slane %v6695_v25, 1  ;;  %v1494_v38 = vshll.u32 %v6695_v25, 16 }
 0x2a2   : > { %2096 = vmatmul.mubr.bf16.gmra.mrb[24].mxu1 %v6658_v7 }
 0x2a3   : > { %v1087_v49 = vmax.f32 %v1046_v34, 0.0  ;;  %v6707_v36 = vsel %vm1593_vm1, %v1611_v16, %v1613_v13  ;;  %v1496_v1 = vrot.slane %v1494_v38, 1  ;;  %2538 = vmatpush1.bf16.msra.mxu1 %v5387_v53  ;;  %v1373_v32 = vmul.f32 %v6436_v54, %v1086_v48 }
 0x2a4   : > { %v898_v44 = vpop.f32.mrb[48].mxu0  ;;  %v1795_v15 = vrot.slane %v6707_v36, 1  ;;  %2539 = vmatprep.subr.bf16.mxu1 %v8110_v26 }
 0x2a5   : > { %v1374_v39 = vmul.f32 %v6438_v55, %v1087_v49  ;;  %v999_v52 = vmul.f32 %v6471_v8, %v898_v44  ;;  %v4913_v33 = vpop.f32.mrb[49].mxu0  ;;  %v6715_v34 = vsel %vm1413_vm2, %v1492_v50, %v1496_v1  ;;  %v5391_v55 = vld [vmem:[#allocation11 + $0x70] sm:$0xff]   ;;  %v1498_v49 = vshrl.u32 %v6695_v25, 16 }
 0x2a6   : > { %8115 = vst [vmem:[#allocation38_spill] sm:$0xff] %v6715_v34  ;;  %v901_v16 = vpop.f32.mrb[50].mxu0  ;;  %v1796_v42 = vsel %vm1593_vm1, %v1791_v37, %v1795_v15  ;;  %v1793_v53 = vrot.slane %v6715_v34, 1  ;;  %v5394_v33 = vld [vmem:[#allocation11 + $0x78] sm:$0xff]  }
 0x2a7   : > { %v6719_v46 = vpack.c.bf16 %v1374_v39, %v1373_v32  ;;  %v1047_v38 = vadd.f32 %v6475_v11, %v999_v52  ;;  %v1000_v51 = vmul.f32 %v6471_v8, %v901_v16  ;;  %v4914_v54 = vpop.f32.mrb[51].mxu0  ;;  %4976 = vmatmul.mubr.bf16.gmra.mrb[96].mxu0 %v1796_v42  ;;  %2540 = vmatpush1.bf16.msra.mxu1 %v5389_v45 }
 0x2a8   : > { %v1794_v48 = vsel %vm1593_vm1, %v1789_v35, %v1793_v53  ;;  %2541 = vmatprep.subr.bf16.mxu1 %v8110_v26  ;;  %v1500_v52 = vor.u32 %v1498_v49, %v1496_v1 }
 0x2a9   : > { %v1088_v50 = vmax.f32 %v1047_v38, 0.0  ;;  %v1048_v37 = vadd.f32 %v6475_v11, %v1000_v51  ;;  %2103 = vmatprep.mubr.bf16.mxu1 %v1794_v48  ;;  %v1615_v44 = vrot.slane %v6719_v46, 1  ;;  %v1502_v32 = vshll.u32 %v6719_v46, 16  ;;  %v6735_v51 = vld [vmem:[#allocation11 + $0x200] sm:$0xff]  }
 0x2aa   : > { %2104 = vmatmul.mubr.bf16.gmra.mrb[28].mxu1 %v6683_v20 }
 0x2ab   : > { %v1089_v39 = vmax.f32 %v1048_v37, 0.0  ;;  %v6731_v45 = vsel %vm1593_vm1, %v1613_v13, %v1615_v44  ;;  %v1504_v35 = vrot.slane %v1502_v32, 1  ;;  %2542 = vmatpush1.bf16.msra.mxu1 %v5391_v55  ;;  %v1375_v38 = vmul.f32 %v6440_v56, %v1088_v50 }
 0x2ac   : > { %v906_v16 = vpop.f32.mrb[52].mxu0  ;;  %v1799_v42 = vrot.slane %v6731_v45, 1  ;;  %2543 = vmatprep.subr.bf16.mxu1 %v8110_v26  ;;  %v1506_v50 = vshrl.u32 %v6719_v46, 16 }
 0x2ad   : > { %v1376_v54 = vmul.f32 %v6442_v57, %v1089_v39  ;;  %v1001_v48 = vmul.f32 %v6471_v8, %v906_v16  ;;  %v4917_v37 = vpop.f32.mrb[53].mxu0  ;;  %v6741_v13 = vsel %vm1413_vm2, %v1500_v52, %v1504_v35 }
 0x2ae   : > { %v909_v1 = vpop.f32.mrb[54].mxu0  ;;  %v1800_v55 = vsel %vm1593_vm1, %v1795_v15, %v1799_v42  ;;  %v1797_v49 = vrot.slane %v6741_v13, 1 }
 0x2af   : > { %v6745_v32 = vpack.c.bf16 %v1376_v54, %v1375_v38  ;;  %v1049_v25 = vadd.f32 %v6475_v11, %v1001_v48  ;;  %v1002_v34 = vmul.f32 %v6471_v8, %v909_v1  ;;  %v4918_v56 = vpop.f32.mrb[55].mxu0  ;;  %4979 = vmatprep.mubr.bf16.mxu0 %v1800_v55  ;;  %2544 = vmatpush1.bf16.msra.mxu1 %v5394_v33 }
 0x2b0   : > { %v1798_v57 = vsel %vm1593_vm1, %v1793_v53, %v1797_v49  ;;  %5051 = vmatprep.subr.bf16.mxu1 %v6735_v51  ;;  %v1508_v33 = vor.u32 %v1506_v50, %v1504_v35 }
 0x2b1   : > { %8116 = vst [vmem:[#allocation39_spill] sm:$0xff] %v6745_v32  ;;  %v1090_v39 = vmax.f32 %v1049_v25, 0.0  ;;  %v1050_v15 = vadd.f32 %v6475_v11, %v1002_v34  ;;  %2111 = vmatprep.mubr.bf16.mxu1 %v1798_v57  ;;  %v1617_v52 = vrot.slane %v6745_v32, 1  ;;  %v1510_v16 = vshll.u32 %v6745_v32, 16 }
 0x2b2   : > { %2112 = vmatmul.mubr.bf16.gmra.mrb[32].mxu1 %v6707_v36 }
 0x2b3   : > { %v1091_v38 = vmax.f32 %v1050_v15, 0.0  ;;  %v6757_v54 = vsel %vm1593_vm1, %v1615_v44, %v1617_v52  ;;  %v1512_v53 = vrot.slane %v1510_v16, 1  ;;  %v1377_v25 = vmul.f32 %v6444_v58, %v1090_v39 }
 0x2b4   : > { %v914_v48 = vpop.f32.mrb[56].mxu0  ;;  %v1803_v37 = vrot.slane %v6757_v54, 1  ;;  %v1514_v39 = vshrl.u32 %v6745_v32, 16 }
 0x2b5   : > { %v1378_v34 = vmul.f32 %v6446_v59, %v1091_v38  ;;  %v1003_v1 = vmul.f32 %v6471_v8, %v914_v48  ;;  %v4921_v55 = vpop.f32.mrb[57].mxu0  ;;  %v6764_v56 = vsel %vm1413_vm2, %v1508_v33, %v1512_v53 }
 0x2b6   : > { %v917_v57 = vpop.f32.mrb[58].mxu0  ;;  %v1804_v15 = vsel %vm1593_vm1, %v1799_v42, %v1803_v37  ;;  %v1801_v44 = vrot.slane %v6764_v56, 1 }
 0x2b7   : > { %v6768_v35 = vpack.c.bf16 %v1378_v34, %v1377_v25  ;;  %v1051_v50 = vadd.f32 %v6475_v11, %v1003_v1  ;;  %v1004_v16 = vmul.f32 %v6471_v8, %v917_v57  ;;  %v4922_v58 = vpop.f32.mrb[59].mxu0  ;;  %4980 = vmatmul.mubr.bf16.gmra.mrb[100].mxu0 %v1804_v15  ;;  %v1516_v1 = vor.u32 %v1514_v39, %v1512_v53 }
 0x2b8   : > { %v1802_v59 = vsel %vm1593_vm1, %v1797_v49, %v1801_v44 }
 0x2b9   : > { %8117 = vst [vmem:[#allocation40_spill] sm:$0xff] %v6768_v35  ;;  %v1092_v38 = vmax.f32 %v1051_v50, 0.0  ;;  %v1052_v33 = vadd.f32 %v6475_v11, %v1004_v16  ;;  %2119 = vmatprep.mubr.bf16.mxu1 %v1802_v59  ;;  %v1619_v42 = vrot.slane %v6768_v35, 1  ;;  %v1518_v48 = vshll.u32 %v6768_v35, 16 }
 0x2ba   : > { %2120 = vmatmul.mubr.bf16.gmra.mrb[36].mxu1 %v6731_v45 }
 0x2bb   : > { %v1093_v25 = vmax.f32 %v1052_v33, 0.0  ;;  %v6779_v34 = vsel %vm1593_vm1, %v1617_v52, %v1619_v42  ;;  %v1520_v55 = vrot.slane %v1518_v48, 1  ;;  %v1379_v15 = vmul.f32 %v6448_v60, %v1092_v38 }
 0x2bc   : > { %v922_v57 = vpop.f32.mrb[60].mxu0  ;;  %v1807_v49 = vrot.slane %v6779_v34, 1  ;;  %v1522_v38 = vshrl.u32 %v6768_v35, 16 }
 0x2bd   : > { %v1380_v50 = vmul.f32 %v6450_v0, %v1093_v25  ;;  %v1005_v16 = vmul.f32 %v6471_v8, %v922_v57  ;;  %v4925_v58 = vpop.f32.mrb[61].mxu0  ;;  %v6786_v59 = vsel %vm1413_vm2, %v1516_v1, %v1520_v55 }
 0x2be   : > { %v925_v32 = vpop.f32.mrb[62].mxu0  ;;  %v1808_v33 = vsel %vm1593_vm1, %v1803_v37, %v1807_v49  ;;  %v1805_v52 = vrot.slane %v6786_v59, 1 }
 0x2bf   : > { %v6790_v53 = vpack.c.bf16 %v1380_v50, %v1379_v15  ;;  %v1053_v39 = vadd.f32 %v6475_v11, %v1005_v16  ;;  %v1006_v48 = vmul.f32 %v6471_v8, %v925_v32  ;;  %v4926_v60 = vpop.f32.mrb[63].mxu0  ;;  %4983 = vmatprep.mubr.bf16.mxu0 %v1808_v33  ;;  %v1524_v32 = vor.u32 %v1522_v38, %v1520_v55 }
 0x2c0   : > { %v1806_v0 = vsel %vm1593_vm1, %v1801_v44, %v1805_v52 }
 0x2c1   : > { %8118 = vst [vmem:[#allocation41_spill] sm:$0xff] %v6790_v53  ;;  %v1094_v25 = vmax.f32 %v1053_v39, 0.0  ;;  %v1054_v1 = vadd.f32 %v6475_v11, %v1006_v48  ;;  %2127 = vmatprep.mubr.bf16.mxu1 %v1806_v0  ;;  %v1621_v37 = vrot.slane %v6790_v53, 1  ;;  %v1526_v57 = vshll.u32 %v6790_v53, 16 }
 0x2c2   : > { %2128 = vmatmul.mubr.bf16.gmra.mrb[40].mxu1 %v6757_v54 }
 0x2c3   : > { %v1095_v15 = vmax.f32 %v1054_v1, 0.0  ;;  %v6801_v50 = vsel %vm1593_vm1, %v1619_v42, %v1621_v37  ;;  %v1528_v16 = vrot.slane %v1526_v57, 1  ;;  %v1381_v33 = vmul.f32 %v6452_v61, %v1094_v25 }
 0x2c4   : > { %v930_v58 = vpop.f32.mrb[64].mxu0  ;;  %v1811_v44 = vrot.slane %v6801_v50, 1  ;;  %v1530_v25 = vshrl.u32 %v6790_v53, 16 }
 0x2c5   : > { %v1382_v39 = vmul.f32 %v6454_v62, %v1095_v15  ;;  %v1007_v48 = vmul.f32 %v6471_v8, %v930_v58  ;;  %v4929_v60 = vpop.f32.mrb[65].mxu0  ;;  %v6808_v0 = vsel %vm1413_vm2, %v1524_v32, %v1528_v16 }
 0x2c6   : > { %v933_v35 = vpop.f32.mrb[66].mxu0  ;;  %v1812_v1 = vsel %vm1593_vm1, %v1807_v49, %v1811_v44  ;;  %v1809_v42 = vrot.slane %v6808_v0, 1 }
 0x2c7   : > { %v6812_v55 = vpack.c.bf16 %v1382_v39, %v1381_v33  ;;  %v1055_v38 = vadd.f32 %v6475_v11, %v1007_v48  ;;  %v1008_v57 = vmul.f32 %v6471_v8, %v933_v35  ;;  %v4930_v61 = vpop.f32.mrb[67].mxu0  ;;  %4984 = vmatmul.mubr.bf16.gmra.mrb[104].mxu0 %v1812_v1  ;;  %v1532_v35 = vor.u32 %v1530_v25, %v1528_v16 }
 0x2c8   : > { %v1810_v62 = vsel %vm1593_vm1, %v1805_v52, %v1809_v42 }
 0x2c9   : > { %8119 = vst [vmem:[#allocation42_spill] sm:$0xff] %v6812_v55  ;;  %v1096_v15 = vmax.f32 %v1055_v38, 0.0  ;;  %v1056_v32 = vadd.f32 %v6475_v11, %v1008_v57  ;;  %2135 = vmatprep.mubr.bf16.mxu1 %v1810_v62  ;;  %v1623_v49 = vrot.slane %v6812_v55, 1  ;;  %v1534_v58 = vshll.u32 %v6812_v55, 16 }
 0x2ca   : > { %2136 = vmatmul.mubr.bf16.gmra.mrb[44].mxu1 %v6779_v34 }
 0x2cb   : > { %v1097_v33 = vmax.f32 %v1056_v32, 0.0  ;;  %v6823_v39 = vsel %vm1593_vm1, %v1621_v37, %v1623_v49  ;;  %v1536_v48 = vrot.slane %v1534_v58, 1  ;;  %v1383_v1 = vmul.f32 %v6456_v63, %v1096_v15 }
 0x2cc   : > { %v938_v60 = vpop.f32.mrb[68].mxu0  ;;  %v1815_v52 = vrot.slane %v6823_v39, 1  ;;  %v1538_v15 = vshrl.u32 %v6812_v55, 16 }
 0x2cd   : > { %v1384_v38 = vmul.f32 %v6458_v2, %v1097_v33  ;;  %v1009_v57 = vmul.f32 %v6471_v8, %v938_v60  ;;  %v4933_v61 = vpop.f32.mrb[69].mxu0  ;;  %v6830_v62 = vsel %vm1413_vm2, %v1532_v35, %v1536_v48 }
 0x2ce   : > { %8120 = vst [vmem:[#allocation43_spill] sm:$0xff] %v6830_v62  ;;  %v941_v53 = vpop.f32.mrb[70].mxu0  ;;  %v1816_v32 = vsel %vm1593_vm1, %v1811_v44, %v1815_v52  ;;  %v1813_v37 = vrot.slane %v6830_v62, 1 }
 0x2cf   : > { %v6834_v16 = vpack.c.bf16 %v1384_v38, %v1383_v1  ;;  %v1057_v25 = vadd.f32 %v6475_v11, %v1009_v57  ;;  %v1010_v58 = vmul.f32 %v6471_v8, %v941_v53  ;;  %v4934_v63 = vpop.f32.mrb[71].mxu0  ;;  %4987 = vmatprep.mubr.bf16.mxu0 %v1816_v32  ;;  %v1540_v8 = vor.u32 %v1538_v15, %v1536_v48  ;;  %v5446_v32 = vld [vmem:[#allocation8] ss:$0 sm:$0xff]  ;;  %v5447_v15 = vld [vmem:[#allocation10] ss:$0 sm:$0xff] }
 0x2d0   : > { %v1814_v2 = vsel %vm1593_vm1, %v1809_v42, %v1813_v37 }
 0x2d1   : > { %8121 = vst [vmem:[#allocation44_spill] sm:$0xff] %v6834_v16  ;;  %v1098_v33 = vmax.f32 %v1057_v25, 0.0  ;;  %v1058_v35 = vadd.f32 %v6475_v11, %v1010_v58  ;;  %2143 = vmatprep.mubr.bf16.mxu1 %v1814_v2  ;;  %v1625_v44 = vrot.slane %v6834_v16, 1  ;;  %v1542_v60 = vshll.u32 %v6834_v16, 16 }
 0x2d2   : > { %2144 = vmatmul.mubr.bf16.gmra.mrb[48].mxu1 %v6801_v50 }
 0x2d3   : > { %v1099_v1 = vmax.f32 %v1058_v35, 0.0  ;;  %v6845_v38 = vsel %vm1593_vm1, %v1623_v49, %v1625_v44  ;;  %v1544_v53 = vrot.slane %v1542_v60, 1  ;;  %v1385_v61 = vmul.f32 %v6460_v3, %v1098_v33 }
 0x2d4   : > { %v946_v57 = vpop.f32.mrb[72].mxu0  ;;  %v1819_v42 = vrot.slane %v6845_v38, 1 }
 0x2d5   : > { %v1386_v11 = vmul.f32 %v6462_v4, %v1099_v1  ;;  %v1011_v25 = vmul.f32 %v5446_v32, %v946_v57  ;;  %v4937_v58 = vpop.f32.mrb[73].mxu0  ;;  %v6851_v63 = vsel %vm1413_vm2, %v1540_v8, %v1544_v53  ;;  %v1546_v4 = vshrl.u32 %v6834_v16, 16 }
 0x2d6   : > { %v949_v2 = vpop.f32.mrb[74].mxu0  ;;  %v1820_v35 = vsel %vm1593_vm1, %v1815_v52, %v1819_v42  ;;  %v1817_v49 = vrot.slane %v6851_v63, 1 }
 0x2d7   : > { %v6855_v48 = vpack.c.bf16 %v1386_v11, %v1385_v61  ;;  %v1059_v60 = vadd.f32 %v5447_v15, %v1011_v25  ;;  %v1012_v55 = vmul.f32 %v5446_v32, %v949_v2  ;;  %v4938_v62 = vpop.f32.mrb[75].mxu0  ;;  %4988 = vmatmul.mubr.bf16.gmra.mrb[108].mxu0 %v1820_v35 }
 0x2d8   : > { %v1818_v3 = vsel %vm1593_vm1, %v1813_v37, %v1817_v49  ;;  %v1548_v62 = vor.u32 %v1546_v4, %v1544_v53 }
 0x2d9   : > { %8122 = vst [vmem:[#allocation45_spill] sm:$0xff] %v6855_v48  ;;  %v1100_v33 = vmax.f32 %v1059_v60, 0.0  ;;  %v1060_v1 = vadd.f32 %v5447_v15, %v1012_v55  ;;  %2151 = vmatprep.mubr.bf16.mxu1 %v1818_v3  ;;  %v6860_v8 = vrot.slane %v6855_v48, 1  ;;  %v1550_v52 = vshll.u32 %v6855_v48, 16 }
 0x2da   : > { %2152 = vmatmul.mubr.bf16.gmra.mrb[52].mxu1 %v6823_v39 }
 0x2db   : > { %v1101_v57 = vmax.f32 %v1060_v1, 0.0  ;;  %v6866_v61 = vsel %vm1593_vm1, %v1625_v44, %v6860_v8  ;;  %v1552_v11 = vrot.slane %v1550_v52, 1  ;;  %v1387_v55 = vmul.f32 %v6464_v5, %v1100_v33 }
 0x2dc   : > { %v954_v37 = vpop.f32.mrb[76].mxu0  ;;  %v1823_v25 = vrot.slane %v6866_v61, 1 }
 0x2dd   : > { %v1388_v58 = vmul.f32 %v6466_v6, %v1101_v57  ;;  %v1013_v2 = vmul.f32 %v5446_v32, %v954_v37  ;;  %v4941_v35 = vpop.f32.mrb[77].mxu0  ;;  %v6872_v60 = vsel %vm1413_vm2, %v1548_v62, %v1552_v11  ;;  %v1554_v6 = vshrl.u32 %v6855_v48, 16 }
 0x2de   : > { %8123 = vst [vmem:[#allocation46_spill] sm:$0xff] %v6872_v60  ;;  %v957_v3 = vpop.f32.mrb[78].mxu0  ;;  %v1824_v1 = vsel %vm1593_vm1, %v1819_v42, %v1823_v25  ;;  %v1821_v44 = vrot.slane %v6872_v60, 1 }
 0x2df   : > { %v6876_v16 = vpack.c.bf16 %v1388_v58, %v1387_v55  ;;  %v1061_v53 = vadd.f32 %v5447_v15, %v1013_v2  ;;  %v1014_v4 = vmul.f32 %v5446_v32, %v957_v3  ;;  %v4942_v52 = vpop.f32.mrb[79].mxu0  ;;  %4991 = vmatprep.mubr.bf16.mxu0 %v1824_v1  ;;  %v6890_v58 = vor.u32 %v1554_v6, %v1552_v11 }
 0x2e0   : > { %v1822_v5 = vsel %vm1593_vm1, %v1817_v49, %v1821_v44 }
 0x2e1   : > { %8124 = vst [vmem:[#allocation47_spill] sm:$0xff] %v6876_v16  ;;  %v1102_v33 = vmax.f32 %v1061_v53, 0.0  ;;  %v1062_v57 = vadd.f32 %v5447_v15, %v1014_v4  ;;  %2159 = vmatprep.mubr.bf16.mxu1 %v1822_v5  ;;  %v6881_v62 = vrot.slane %v6876_v16, 1  ;;  %v1696_v42 = vshll.u32 %v6876_v16, 16 }
 0x2e2   : > { %2160 = vmatmul.mubr.bf16.gmra.mrb[56].mxu1 %v6845_v38 }
 0x2e3   : > { %v1103_v37 = vmax.f32 %v1062_v57, 0.0  ;;  %v6888_v55 = vsel %vm1593_vm1, %v6860_v8, %v6881_v62  ;;  %v1698_v49 = vrot.slane %v1696_v42, 1  ;;  %v1389_v3 = vmul.f32 %v6473_v9, %v1102_v33 }
 0x2e4   : > { %v962_v2 = vpop.f32.mrb[80].mxu0  ;;  %v1827_v35 = vrot.slane %v6888_v55, 1  ;;  %v1700_v9 = vshrl.u32 %v6876_v16, 16 }
 0x2e5   : > { %v1390_v1 = vmul.f32 %v6477_v12, %v1103_v37  ;;  %v1015_v53 = vmul.f32 %v5446_v32, %v962_v2  ;;  %v6897_v4 = vsel %vm1413_vm2, %v6890_v58, %v1698_v49  ;;  %v4945_v52 = vpop.f32.mrb[81].mxu0  ;;  %v1349_v37 = vpop.permute.xlu0 %1348 }
 0x2e6   : > { %v1828_v5 = vsel %vm1593_vm1, %v1823_v25, %v1827_v35  ;;  %v1825_v57 = vrot.slane %v6897_v4, 1  ;;  %v965_v11 = vpop.f32.mrb[82].mxu0  ;;  %v1702_v2 = vor.u32 %v1700_v9, %v1698_v49  ;;  %v8065_v25 = vrot.slane %v6876_v16, 2 }
 0x2e7   : > { %v1411_v6 = vpack.c.bf16 %v1390_v1, %v1389_v3  ;;  %v1063_v42 = vadd.f32 %v5447_v15, %v1015_v53  ;;  %4992 = vmatmul.mubr.bf16.gmra.mrb[112].mxu0 %v1828_v5  ;;  %v4946_v48 = vpop.f32.mrb[83].mxu0  ;;  %v8067_v53 = vrot.slane %v6888_v55, 2 }
 0x2e8   : > { %v1826_v60 = vsel %vm1593_vm1, %v1821_v44, %v1825_v57 }
 0x2e9   : > { %v1104_v12 = vmax.f32 %v1063_v42, 0.0  ;;  %2167 = vmatprep.mubr.bf16.mxu1 %v1826_v60  ;;  %v1712_v32 = vrot.slane %v1411_v6, 1  ;;  %v1704_v33 = vshll.u32 %v1411_v6, 16  ;;  %v3030_v52 = vrot.slane %v1411_v6, 2 }
 0x2ea   : > { %2168 = vmatmul.mubr.bf16.gmra.mrb[60].mxu1 %v6866_v61  ;;  %v2867_v44 = vshrl.u32 %v1411_v6, 16  ;;  %v8068_v42 = vrot.slane %v6897_v4, 2 }
 0x2eb   : > { %v1391_v3 = vmul.f32 %v1349_v37, %v1104_v12  ;;  %v1713_v48 = vsel %vm1593_vm1, %v6881_v62, %v1712_v32  ;;  %v1706_v15 = vrot.slane %v1704_v33, 1  ;;  %v6910_v60 = vsel %vm2930_vm3, %v8065_v25, %v3030_v52 }
 0x2ec   : > { %v1831_v1 = vrot.slane %v1713_v48, 1  ;;  %8125 = vst [vmem:[#allocation48_spill] sm:$0xff] %v6910_v60  ;;  %v3028_v5 = vrot.slane %v1713_v48, 2 }
 0x2ed   : > { %v1412_v49 = vpack.c.bf16 %v1391_v3, %v1391_v3  ;;  %v1707_v11 = vsel %vm1413_vm2, %v1702_v2, %v1706_v15  ;;  %v2869_v9 = vor.u32 %v2867_v44, %v1706_v15 }
 0x2ee   : > { %v1832_v12 = vsel %vm1593_vm1, %v1827_v35, %v1831_v1  ;;  %v1829_v37 = vrot.slane %v1707_v11, 1  ;;  %v3026_v33 = vrot.slane %v1707_v11, 2  ;;  %v6919_v6 = vsel %vm2930_vm3, %v8067_v53, %v3028_v5 }
 0x2ef   : > { %4995 = vmatprep.mubr.bf16.mxu0 %v1832_v12  ;;  %v2871_v25 = vshll.u32 %v1412_v49, 16  ;;  %v3036_v60 = vrot.slane %v1412_v49, 2  ;;  %v2879_v16 = vrot.slane %v1412_v49, 1  ;;  %v2875_v35 = vshrl.u32 %v1412_v49, 16 }
 0x2f0   : > { %4996 = vmatmul.mubr.bf16.gmra.mrb[116].mxu0 %v1831_v1  ;;  %v1830_v3 = vsel %vm1593_vm1, %v1825_v57, %v1829_v37  ;;  %v6925_v2 = vsel %vm2930_vm3, %v8068_v42, %v3026_v33 }
 0x2f1   : > { %2175 = vmatprep.mubr.bf16.mxu1 %v1830_v3  ;;  %5015 = vmatprep.mubr.bf16.mxu0 %v6503_v10  ;;  %v2873_v48 = vrot.slane %v2871_v25, 1  ;;  %v6929_v15 = vsel %vm2930_vm3, %v3030_v52, %v3036_v60  ;;  %v2880_v44 = vsel %vm1593_vm1, %v1712_v32, %v2879_v16  ;;  %v3040_v11 = vrot.slane %v2879_v16, 2  ;;  %v5395_v25 = vld [vmem:[#allocation11 + $0x180] sm:$0xff]   ;;  %v5397_v32 = vld [vmem:[#allocation11 + $0x188] sm:$0xff]  }
 0x2f2   : > { %2176 = vmatmul.mubr.bf16.gmra.mrb[64].mxu1 %v6888_v55  ;;  %v3034_v1 = vrot.slane %v2880_v44, 2  ;;  %v8127_v3 = vld [vmem:[#allocation32_spill] sm:$0xff]  ;;  %v5418_v44 = vld [vmem:[#allocation11 + $0x238] sm:$0xff]  }
 0x2f3   : > { %2183 = vmatprep.mubr.bf16.mxu1 %v1829_v37  ;;  %v2874_v57 = vsel %vm1413_vm2, %v2869_v9, %v2873_v48  ;;  %v2877_v12 = vor.u32 %v2875_v35, %v2873_v48  ;;  %v5412_v9 = vld [vmem:[#allocation11 + $0x218] sm:$0xff]   ;;  %v5416_v37 = vld [vmem:[#allocation11 + $0x228] sm:$0xff]   ;;  %v5417_v35 = vld [vmem:[#allocation11 + $0x230] sm:$0xff]  }
 0x2f4   : > { %v3032_v53 = vrot.slane %v2874_v57, 2  ;;  %v6935_v49 = vsel %vm2930_vm3, %v3028_v5, %v3034_v1  ;;  %v6938_v10 = vsel %vm2930_vm3, %v3034_v1, %v3040_v11  ;;  %v5398_v5 = vld [vmem:[#allocation11 + $0x190] sm:$0xff]   ;;  %v5405_v48 = vld [vmem:[#allocation11 + $0x1c0] sm:$0xff]   ;;  %v5406_v11 = vld [vmem:[#allocation11 + $0x1c8] sm:$0xff]  }
 0x2f5   : > { %v3038_v52 = vrot.slane %v2877_v12, 2  ;;  %v8128_v1 = vld [vmem:[#allocation30_spill] sm:$0xff]  ;;  %v5409_v12 = vld [vmem:[#allocation11 + $0x1d8] sm:$0xff]  }
 0x2f6   : > { %v6941_v60 = vsel %vm2930_vm3, %v3026_v33, %v3032_v53  ;;  %v8126_v33 = vld [vmem:[#allocation29_spill] sm:$0xff]  ;;  %v5408_v57 = vld [vmem:[#allocation11 + $0x1d0] sm:$0xff]  }
 0x2f7   : > { %v6944_v16 = vsel %vm2930_vm3, %v3032_v53, %v3038_v52  ;;  %v5401_v53 = vld [vmem:[#allocation11 + $0x208] sm:$0xff]   ;;  %v5410_v52 = vld [vmem:[#allocation11 + $0x1e0] sm:$0xff]  }
 0x2f8   : > { %5016 = vmatmul.mubr.bf16.vlgmr.msra.gmra.mrb[120].mxu0 %v6527_v31  ;;  %v5399_v31 = vld [vmem:[#allocation11 + $0x198] sm:$0xff]  }
 0x2f9   : > { %5019 = vmatprep.mubr.bf16.mxu0 %v6537_v21  ;;  %3241 = vmatpush1.bf16.msra.mxu0 %v5395_v25  ;;  %v8129_v25 = vld [vmem:[#allocation31_spill] sm:$0xff] }
 0x2fa   : > { %2184 = vmatmul.mubr.bf16.gmra.mrb[68].mxu1 %v6881_v62  ;;  %3242 = vmatprep.subr.bf16.mxu0 %v8110_v26  ;;  %v5400_v62 = vld [vmem:[#allocation11 + $0x1a0] sm:$0xff]  }
 0x2fb   : > { %2545 = vmatprep.mubr.bf16.mxu1 %v6509_v22  ;;  %v5407_v22 = vld [vmem:[#allocation11 + $0x210] sm:$0xff]  }
 0x2fd   : > { %3243 = vmatpush1.bf16.msra.mxu0 %v5397_v32  ;;  %v5411_v32 = vld [vmem:[#allocation11 + $0x1e8] sm:$0xff]  }
 0x2fe   : > { %3244 = vmatprep.subr.bf16.mxu0 %v8110_v26 }
 0x300   : > { %5020 = vmatmul.mubr.bf16.gmra.mrb[124].mxu0 %v6561_v19 }
 0x301   : > { %5023 = vmatprep.mubr.bf16.mxu0 %v6586_v27  ;;  %3245 = vmatpush1.bf16.msra.mxu0 %v5398_v5  ;;  %v8130_v5 = vld [vmem:[#allocation33_spill] sm:$0xff] }
 0x302   : > { %2546 = vmatmul.mubr.bf16.vlgmr.msra.gmra.mrb[72].mxu1 %v6484_v40  ;;  %3246 = vmatprep.subr.bf16.mxu0 %v8110_v26  ;;  %v5402_v40 = vld [vmem:[#allocation11 + $0x1a8] sm:$0xff]  }
 0x303   : > { %5052 = vmatpush3.bf16.msra.mxu1 %v6735_v51  ;;  %2553 = vmatprep.mubr.bf16.mxu1 %v6534_v23  ;;  %v5415_v23 = vld [vmem:[#allocation11 + $0x220] sm:$0xff]   ;;  %v5403_v51 = vld [vmem:[#allocation11 + $0x1b0] sm:$0xff]  }
 0x304   : > { %5053 = vmatprep.subr.bf16.mxu1 %v5401_v53 }
 0x305   : > { %3247 = vmatpush1.bf16.msra.mxu0 %v5399_v31  ;;  %v5414_v31 = vld [vmem:[#allocation11 + $0x1f8] sm:$0xff]  }
 0x306   : > { %3248 = vmatprep.subr.bf16.mxu0 %v8110_v26 }
 0x307   : > { %5054 = vmatpush3.bf16.msra.mxu1 %v5401_v53  ;;  %v5413_v53 = vld [vmem:[#allocation11 + $0x1f0] sm:$0xff]  }
 0x308   : > { %5024 = vmatmul.mubr.bf16.gmra.mrb[128].mxu0 %v6610_v43  ;;  %5055 = vmatprep.subr.bf16.mxu1 %v5407_v22 }
 0x309   : > { %5027 = vmatprep.mubr.bf16.mxu0 %v6634_v30  ;;  %3249 = vmatpush1.bf16.msra.mxu0 %v5400_v62  ;;  %v2935_v62 = vrot.slane %v8127_v3, 2 }
 0x30a   : > { %2554 = vmatmul.mubr.bf16.gmra.mrb[76].mxu1 %v6493_v28  ;;  %3250 = vmatprep.subr.bf16.mxu0 %v8110_v26  ;;  %v5404_v28 = vld [vmem:[#allocation11 + $0x1b8] sm:$0xff]  }
 0x30b   : > { %2561 = vmatprep.mubr.bf16.mxu1 %v6545_v29  ;;  %5056 = vmatpush3.bf16.msra.mxu1 %v5407_v22  ;;  %v8131_v22 = vld [vmem:[#allocation34_spill] sm:$0xff] }
 0x30c   : > { %5057 = vmatprep.subr.bf16.mxu1 %v5412_v9 }
 0x30d   : > { %3251 = vmatpush1.bf16.msra.mxu0 %v5402_v40 }
 0x30e   : > { %3252 = vmatprep.subr.bf16.mxu0 %v8110_v26 }
 0x30f   : > { %5058 = vmatpush3.bf16.msra.mxu1 %v5412_v9  ;;  %v2934_v9 = vrot.slane %v6545_v29, 2 }
 0x310   : > { %5028 = vmatmul.mubr.bf16.gmra.mrb[132].mxu0 %v6658_v7  ;;  %5059 = vmatprep.subr.bf16.mxu1 %v5415_v23 }
 0x311   : > { %5031 = vmatprep.mubr.bf16.mxu0 %v6683_v20  ;;  %3253 = vmatpush1.bf16.msra.mxu0 %v5403_v51  ;;  %v2936_v40 = vsel %vm2930_vm3, %v2934_v9, %v2935_v62  ;;  %v2931_v51 = vrot.slane %v8126_v33, 2 }
 0x312   : > { %2562 = vmatmul.mubr.bf16.gmra.mrb[80].mxu1 %v8126_v33  ;;  %3254 = vmatprep.subr.bf16.mxu0 %v8110_v26 }
 0x313   : > { %2569 = vmatprep.mubr.bf16.mxu1 %v8127_v3  ;;  %5060 = vmatpush3.bf16.msra.mxu1 %v5415_v23  ;;  %v2932_v23 = vrot.slane %v8128_v1, 2  ;;  %v2940_v3 = vrot.slane %v8129_v25, 2 }
 0x314   : > { %5061 = vmatprep.subr.bf16.mxu1 %v5416_v37 }
 0x315   : > { %3255 = vmatpush1.bf16.msra.mxu0 %v5404_v28  ;;  %v8133_v28 = vld [vmem:[#allocation38_spill] sm:$0xff] }
 0x316   : > { %3256 = vmatprep.subr.bf16.mxu0 %v8110_v26 }
 0x317   : > { %5062 = vmatpush3.bf16.msra.mxu1 %v5416_v37  ;;  %v2933_v37 = vsel %vm2930_vm3, %v2931_v51, %v2932_v23 }
 0x318   : > { %5032 = vmatmul.mubr.bf16.gmra.mrb[136].mxu0 %v6707_v36  ;;  %5063 = vmatprep.subr.bf16.mxu1 %v5417_v35 }
 0x319   : > { %5035 = vmatprep.mubr.bf16.mxu0 %v6731_v45  ;;  %3257 = vmatpush1.bf16.msra.mxu0 %v5405_v48 }
 0x31a   : > { %2570 = vmatmul.mubr.bf16.gmra.mrb[84].mxu1 %v8128_v1  ;;  %3258 = vmatprep.subr.bf16.mxu0 %v8110_v26 }
 0x31b   : > { %2577 = vmatprep.mubr.bf16.mxu1 %v6594_v24  ;;  %5064 = vmatpush3.bf16.msra.mxu1 %v5417_v35  ;;  %v2948_v35 = vrot.slane %v6618_v18, 2 }
 0x31c   : > { %5065 = vmatprep.subr.bf16.mxu1 %v5418_v44 }
 0x31d   : > { %3259 = vmatpush1.bf16.msra.mxu0 %v5406_v11 }
 0x31e   : > { %3260 = vmatprep.subr.bf16.mxu0 %v8110_v26 }
 0x31f   : > { %5066 = vmatpush3.bf16.msra.mxu1 %v5418_v44 }
 0x320   : > { %5036 = vmatmul.mubr.bf16.gmra.mrb[140].mxu0 %v6757_v54 }
 0x321   : > { %5039 = vmatprep.mubr.bf16.mxu0 %v6779_v34  ;;  %3261 = vmatpush1.bf16.msra.mxu0 %v5408_v57 }
 0x322   : > { %2578 = vmatmul.mubr.bf16.gmra.mrb[88].mxu1 %v8129_v25  ;;  %3262 = vmatprep.subr.bf16.mxu0 %v8110_v26  ;;  %v2946_v25 = vrot.slane %v8130_v5, 2 }
 0x323   : > { %2585 = vmatprep.mubr.bf16.mxu1 %v6618_v18 }
 0x324   : > { %v2947_v51 = vsel %vm2930_vm3, %v2940_v3, %v2946_v25 }
 0x325   : > { %3263 = vmatpush1.bf16.msra.mxu0 %v5409_v12  ;;  %v8134_v12 = vld [vmem:[#allocation36_spill] sm:$0xff] }
 0x326   : > { %3264 = vmatprep.subr.bf16.mxu0 %v8110_v26 }
 0x328   : > { %5040 = vmatmul.mubr.bf16.gmra.mrb[144].mxu0 %v6801_v50 }
 0x329   : > { %5043 = vmatprep.mubr.bf16.mxu0 %v6823_v39  ;;  %3265 = vmatpush1.bf16.msra.mxu0 %v5410_v52 }
 0x32a   : > { %2586 = vmatmul.mubr.bf16.gmra.mrb[92].mxu1 %v8130_v5  ;;  %3266 = vmatprep.subr.bf16.mxu0 %v8110_v26 }
 0x32b   : > { %2593 = vmatprep.mubr.bf16.mxu1 %v6642_v47 }
 0x32d   : > { %3267 = vmatpush1.bf16.msra.mxu0 %v5411_v32 }
 0x32e   : > { %3268 = vmatprep.subr.bf16.mxu0 %v8110_v26 }
 0x330   : > { %5044 = vmatmul.mubr.bf16.gmra.mrb[148].mxu0 %v6845_v38 }
 0x331   : > { %5047 = vmatprep.mubr.bf16.mxu0 %v6866_v61  ;;  %3269 = vmatpush1.bf16.msra.mxu0 %v5413_v53  ;;  %v2954_v53 = vrot.slane %v6642_v47, 2  ;;  %v2952_v47 = vrot.slane %v8131_v22, 2 }
 0x332   : > { %2594 = vmatmul.mubr.bf16.gmra.mrb[96].mxu1 %v8131_v22  ;;  %3270 = vmatprep.subr.bf16.mxu0 %v8110_v26  ;;  %v2942_v26 = vrot.slane %v6594_v24, 2  ;;  %v2941_v24 = vsel %vm2930_vm3, %v2932_v23, %v2940_v3  ;;  %v2958_v22 = vrot.slane %v6622_v14, 2 }
 0x333   : > { %2601 = vmatprep.mubr.bf16.mxu1 %v6666_v41  ;;  %v2955_v5 = vsel %vm2930_vm3, %v2948_v35, %v2954_v53  ;;  %v2953_v3 = vsel %vm2930_vm3, %v2946_v25, %v2952_v47 }
 0x334   : > { %v2943_v29 = vsel %vm2930_vm3, %v2935_v62, %v2942_v26  ;;  %v2949_v1 = vsel %vm2930_vm3, %v2942_v26, %v2948_v35 }
 0x335   : > { %3271 = vmatpush1.bf16.msra.mxu0 %v5414_v31 }
 0x338   : > { %5048 = vmatmul.mubr.bf16.gmra.mrb[152].mxu0 %v6860_v8  ;;  %v8132_v8 = vld [vmem:[#allocation35_spill] sm:$0xff] }
 0x339   : > { %3272 = vmatprep.mubr.bf16.mxu0 %v2936_v40 }
 0x33a   : > { %2602 = vmatmul.mubr.bf16.gmra.mrb[100].mxu1 %v6622_v14 }
 0x33b   : > { %2609 = vmatprep.mubr.bf16.mxu1 %v6691_v17 }
 0x340   : > { %3273 = vmatmul.mubr.bf16.vlgmr.msra.gmra.mrb[156].mxu0 %v2933_v37 }
 0x341   : > { %3280 = vmatprep.mubr.bf16.mxu0 %v2943_v29 }
 0x342   : > { %2610 = vmatmul.mubr.bf16.gmra.mrb[104].mxu1 %v8132_v8 }
 0x343   : > { %2617 = vmatprep.mubr.bf16.mxu1 %v8133_v28 }
 0x345   : > { %v2049_v48 = vpop.f32.mrb[0].mxu1 }
 0x346   : > { %v2051_v44 = vpop.f32.mrb[1].mxu1 }
 0x347   : > { %v2052_v11 = vpop.f32.mrb[2].mxu1  ;;  %v2960_v44 = vrot.slane %v6666_v41, 2 }
 0x348   : > { %v2054_v33 = vpop.f32.mrb[3].mxu1  ;;  %3281 = vmatmul.mubr.bf16.gmra.mrb[160].mxu0 %v2941_v24 }
 0x349   : > { %3288 = vmatprep.mubr.bf16.mxu0 %v2949_v1 }
 0x34a   : > { %v4965_v57 = vpop.f32.mrb[84].mxu0  ;;  %2618 = vmatmul.mubr.bf16.gmra.mrb[108].mxu1 %v8134_v12 }
 0x34b   : > { %v2226_v52 = vpop.f32.mrb[85].mxu0  ;;  %2625 = vmatprep.mubr.bf16.mxu1 %v6741_v13 }
 0x34c   : > { %v7014_v32 = vadd.f32 %v2226_v52, %v2049_v48  ;;  %v4966_v18 = vpop.f32.mrb[86].mxu0  ;;  %v8135_v48 = vld [vmem:[#allocation37_spill] sm:$0xff] }
 0x34d   : > { %v2057_v31 = vpop.f32.mrb[4].mxu1  ;;  %v2229_v62 = vpop.f32.mrb[87].mxu0 }
 0x34e   : > { %v7017_v9 = vadd.f32 %v4965_v57, %v2057_v31  ;;  %v7019_v40 = vadd.f32 %v2229_v62, %v2052_v11  ;;  %v2059_v23 = vpop.f32.mrb[5].mxu1  ;;  %v2961_v57 = vsel %vm2930_vm3, %v2954_v53, %v2960_v44  ;;  %v2966_v31 = vrot.slane %v6691_v17, 2 }
 0x34f   : > { %v2060_v26 = vpop.f32.mrb[6].mxu1  ;;  %v2964_v17 = vrot.slane %v8132_v8, 2  ;;  %v2970_v8 = vrot.slane %v8134_v12, 2 }
 0x350   : > { %v7022_v37 = vadd.f32 %v4966_v18, %v2060_v26  ;;  %v2062_v29 = vpop.f32.mrb[7].mxu1  ;;  %3289 = vmatmul.mubr.bf16.gmra.mrb[164].mxu0 %v2947_v51  ;;  %v2967_v14 = vsel %vm2930_vm3, %v2960_v44, %v2966_v31 }
 0x351   : > { %3296 = vmatprep.mubr.bf16.mxu0 %v2955_v5  ;;  %v2959_v29 = vsel %vm2930_vm3, %v2952_v47, %v2958_v22  ;;  %v2965_v47 = vsel %vm2930_vm3, %v2958_v22, %v2964_v17 }
 0x352   : > { %2626 = vmatmul.mubr.bf16.gmra.mrb[112].mxu1 %v8135_v48 }
 0x353   : > { %2633 = vmatprep.mubr.bf16.mxu1 %v6764_v56 }
 0x355   : > { %v2065_v11 = vpop.f32.mrb[8].mxu1 }
 0x356   : > { %v2067_v24 = vpop.f32.mrb[9].mxu1 }
 0x357   : > { %v2068_v33 = vpop.f32.mrb[10].mxu1 }
 0x358   : > { %v2070_v1 = vpop.f32.mrb[11].mxu1  ;;  %3297 = vmatmul.mubr.bf16.gmra.mrb[168].mxu0 %v2953_v3 }
 0x359   : > { %3304 = vmatprep.mubr.bf16.mxu0 %v2961_v57 }
 0x35a   : > { %v4969_v35 = vpop.f32.mrb[88].mxu0  ;;  %2634 = vmatmul.mubr.bf16.gmra.mrb[116].mxu1 %v6719_v46 }
 0x35b   : > { %v2242_v52 = vpop.f32.mrb[89].mxu0  ;;  %2641 = vmatprep.mubr.bf16.mxu1 %v6786_v59 }
 0x35c   : > { %v7034_v18 = vadd.f32 %v2242_v52, %v2065_v11  ;;  %v4970_v41 = vpop.f32.mrb[90].mxu0  ;;  %v8136_v11 = vld [vmem:[#allocation39_spill] sm:$0xff] }
 0x35d   : > { %v2073_v62 = vpop.f32.mrb[12].mxu1  ;;  %v2245_v25 = vpop.f32.mrb[91].mxu0 }
 0x35e   : > { %v7037_v23 = vadd.f32 %v4969_v35, %v2073_v62  ;;  %v7039_v26 = vadd.f32 %v2245_v25, %v2068_v33  ;;  %v2075_v53 = vpop.f32.mrb[13].mxu1  ;;  %v2972_v33 = vrot.slane %v8133_v28, 2  ;;  %v8138_v25 = vld [vmem:[#allocation43_spill] sm:$0xff] }
 0x35f   : > { %v2076_v51 = vpop.f32.mrb[14].mxu1 }
 0x360   : > { %v7042_v5 = vadd.f32 %v4970_v41, %v2076_v51  ;;  %v2078_v24 = vpop.f32.mrb[15].mxu1  ;;  %3305 = vmatmul.mubr.bf16.gmra.mrb[172].mxu0 %v2959_v29  ;;  %v2973_v52 = vsel %vm2930_vm3, %v2966_v31, %v2972_v33  ;;  %v8137_v41 = vld [vmem:[#allocation40_spill] sm:$0xff]  ;;  %v2978_v51 = vrot.slane %v6741_v13, 2  ;;  %v2976_v13 = vrot.slane %v8135_v48, 2 }
 0x361   : > { %3312 = vmatprep.mubr.bf16.mxu0 %v2967_v14  ;;  %v2982_v48 = vrot.slane %v6719_v46, 2 }
 0x362   : > { %2642 = vmatmul.mubr.bf16.gmra.mrb[120].mxu1 %v8136_v11  ;;  %v2979_v12 = vsel %vm2930_vm3, %v2972_v33, %v2978_v51 }
 0x363   : > { %2649 = vmatprep.mubr.bf16.mxu1 %v6808_v0  ;;  %v2983_v42 = vsel %vm2930_vm3, %v2976_v13, %v2982_v48 }
 0x365   : > { %v2081_v3 = vpop.f32.mrb[16].mxu1 }
 0x366   : > { %v2083_v1 = vpop.f32.mrb[17].mxu1 }
 0x367   : > { %v2084_v57 = vpop.f32.mrb[18].mxu1 }
 0x368   : > { %v2086_v35 = vpop.f32.mrb[19].mxu1  ;;  %3313 = vmatmul.mubr.bf16.gmra.mrb[176].mxu0 %v2965_v47  ;;  %v2971_v47 = vsel %vm2930_vm3, %v2964_v17, %v2970_v8  ;;  %v2977_v17 = vsel %vm2930_vm3, %v2970_v8, %v2976_v13 }
 0x369   : > { %3320 = vmatprep.mubr.bf16.mxu0 %v2973_v52 }
 0x36a   : > { %v4973_v44 = vpop.f32.mrb[92].mxu0  ;;  %2650 = vmatmul.mubr.bf16.gmra.mrb[124].mxu1 %v8137_v41 }
 0x36b   : > { %v2258_v62 = vpop.f32.mrb[93].mxu0  ;;  %2657 = vmatprep.mubr.bf16.mxu1 %v8138_v25 }
 0x36c   : > { %v7054_v53 = vadd.f32 %v2258_v62, %v2081_v3  ;;  %v4974_v28 = vpop.f32.mrb[94].mxu0  ;;  %v8141_v3 = vld [vmem:[#allocation41_spill] sm:$0xff] }
 0x36d   : > { %v2089_v29 = vpop.f32.mrb[20].mxu1  ;;  %v2261_v22 = vpop.f32.mrb[95].mxu0 }
 0x36e   : > { %v7057_v24 = vadd.f32 %v4973_v44, %v2089_v29  ;;  %v7059_v14 = vadd.f32 %v2261_v22, %v2084_v57  ;;  %v2091_v31 = vpop.f32.mrb[21].mxu1  ;;  %v2984_v57 = vrot.slane %v6764_v56, 2 }
 0x36f   : > { %v2092_v1 = vpop.f32.mrb[22].mxu1  ;;  %v8142_v31 = vld [vmem:[#allocation42_spill] sm:$0xff] }
 0x370   : > { %8139 = vst [vmem:[#allocation29_spill] sm:$0xff] %v7057_v24  ;;  %v7062_v35 = vadd.f32 %v4974_v28, %v2092_v1  ;;  %v2094_v52 = vpop.f32.mrb[23].mxu1  ;;  %3321 = vmatmul.mubr.bf16.gmra.mrb[180].mxu0 %v2971_v47  ;;  %v2985_v22 = vsel %vm2930_vm3, %v2978_v51, %v2984_v57  ;;  %v8143_v47 = vld [vmem:[#allocation46_spill] sm:$0xff] }
 0x371   : > { %3328 = vmatprep.mubr.bf16.mxu0 %v2979_v12  ;;  %v2990_v12 = vrot.slane %v6786_v59, 2  ;;  %v2988_v59 = vrot.slane %v8136_v11, 2 }
 0x372   : > { %8140 = vst [vmem:[#allocation32_spill] sm:$0xff] %v7062_v35  ;;  %2658 = vmatmul.mubr.bf16.gmra.mrb[128].mxu1 %v8141_v3 }
 0x373   : > { %2665 = vmatprep.mubr.bf16.mxu1 %v6851_v63  ;;  %v2991_v46 = vsel %vm2930_vm3, %v2984_v57, %v2990_v12  ;;  %v2937_v57 = vrot.slane %v6537_v21, 2 }
 0x375   : > { %v2097_v44 = vpop.f32.mrb[24].mxu1 }
 0x376   : > { %v2099_v62 = vpop.f32.mrb[25].mxu1 }
 0x377   : > { %v2100_v29 = vpop.f32.mrb[26].mxu1 }
 0x378   : > { %v2102_v28 = vpop.f32.mrb[27].mxu1  ;;  %3329 = vmatmul.mubr.bf16.gmra.mrb[184].mxu0 %v2977_v17 }
 0x379   : > { %3336 = vmatprep.mubr.bf16.mxu0 %v2985_v22 }
 0x37a   : > { %v4977_v33 = vpop.f32.mrb[96].mxu0  ;;  %2666 = vmatmul.mubr.bf16.gmra.mrb[132].mxu1 %v8142_v31 }
 0x37b   : > { %v2274_v1 = vpop.f32.mrb[97].mxu0  ;;  %2673 = vmatprep.mubr.bf16.mxu1 %v8143_v47 }
 0x37c   : > { %v7074_v52 = vadd.f32 %v2274_v1, %v2097_v44  ;;  %v4978_v56 = vpop.f32.mrb[98].mxu0  ;;  %v8144_v44 = vld [vmem:[#allocation44_spill] sm:$0xff] }
 0x37d   : > { %v2105_v62 = vpop.f32.mrb[28].mxu1  ;;  %v2277_v8 = vpop.f32.mrb[99].mxu0 }
 0x37e   : > { %v7077_v28 = vadd.f32 %v4977_v33, %v2105_v62  ;;  %v7079_v17 = vadd.f32 %v2277_v8, %v2100_v29  ;;  %v2107_v51 = vpop.f32.mrb[29].mxu1  ;;  %v2996_v29 = vrot.slane %v6808_v0, 2  ;;  %v2938_v62 = vrot.slane %v6561_v19, 2 }
 0x37f   : > { %v2108_v22 = vpop.f32.mrb[30].mxu1  ;;  %v2994_v51 = vrot.slane %v8137_v41, 2 }
 0x380   : > { %v7082_v35 = vadd.f32 %v4978_v56, %v2108_v22  ;;  %v2110_v24 = vpop.f32.mrb[31].mxu1  ;;  %3337 = vmatmul.mubr.bf16.gmra.mrb[188].mxu0 %v2983_v42  ;;  %v2989_v56 = vsel %vm2930_vm3, %v2982_v48, %v2988_v59  ;;  %v2997_v42 = vsel %vm2930_vm3, %v2990_v12, %v2996_v29  ;;  %v2939_v11 = vsel %vm2930_vm3, %v2937_v57, %v2938_v62 }
 0x381   : > { %3344 = vmatprep.mubr.bf16.mxu0 %v2991_v46  ;;  %v3002_v48 = vrot.slane %v8138_v25, 2  ;;  %v2944_v12 = vrot.slane %v6586_v27, 2 }
 0x382   : > { %2674 = vmatmul.mubr.bf16.gmra.mrb[136].mxu1 %v8144_v44 }
 0x383   : > { %2681 = vmatprep.mubr.bf16.mxu1 %v6890_v58  ;;  %v8145_v58 = vld [vmem:[#allocation45_spill] sm:$0xff]  ;;  %v3003_v25 = vsel %vm2930_vm3, %v2996_v29, %v3002_v48 }
 0x385   : > { %v2113_v33 = vpop.f32.mrb[32].mxu1 }
 0x386   : > { %v2115_v1 = vpop.f32.mrb[33].mxu1 }
 0x387   : > { %v2116_v13 = vpop.f32.mrb[34].mxu1 }
 0x388   : > { %v2118_v24 = vpop.f32.mrb[35].mxu1  ;;  %3345 = vmatmul.mubr.bf16.gmra.mrb[192].mxu0 %v2989_v56 }
 0x389   : > { %3352 = vmatprep.mubr.bf16.mxu0 %v2997_v42  ;;  %v2950_v42 = vrot.slane %v6610_v43, 2  ;;  %v3008_v43 = vrot.slane %v6851_v63, 2 }
 0x38a   : > { %v4981_v8 = vpop.f32.mrb[100].mxu0  ;;  %2682 = vmatmul.mubr.bf16.gmra.mrb[140].mxu1 %v8145_v58 }
 0x38b   : > { %v2290_v0 = vpop.f32.mrb[101].mxu0  ;;  %5067 = vmatprep.mubr.bf16.mxu1 %v2939_v11  ;;  %v2995_v11 = vsel %vm2930_vm3, %v2988_v59, %v2994_v51  ;;  %v2951_v27 = vsel %vm2930_vm3, %v2944_v12, %v2950_v42  ;;  %v2956_v59 = vrot.slane %v6634_v30, 2  ;;  %v3006_v30 = vrot.slane %v8142_v31, 2 }
 0x38c   : > { %v7096_v19 = vadd.f32 %v2290_v0, %v2113_v33  ;;  %v4982_v22 = vpop.f32.mrb[102].mxu0  ;;  %v2945_v0 = vsel %vm2930_vm3, %v2938_v62, %v2944_v12  ;;  %v3009_v62 = vsel %vm2930_vm3, %v3002_v48, %v3008_v43  ;;  %v2968_v48 = vrot.slane %v6683_v20, 2 }
 0x38d   : > { %v2121_v46 = vpop.f32.mrb[36].mxu1  ;;  %v2293_v1 = vpop.f32.mrb[103].mxu0  ;;  %v2957_v12 = vsel %vm2930_vm3, %v2950_v42, %v2956_v59 }
 0x38e   : > { %v7100_v21 = vadd.f32 %v4981_v8, %v2121_v46  ;;  %v7102_v56 = vadd.f32 %v2293_v1, %v2116_v13  ;;  %v2123_v24 = vpop.f32.mrb[37].mxu1  ;;  %v3000_v13 = vrot.slane %v8141_v3, 2  ;;  %v2962_v46 = vrot.slane %v6658_v7, 2 }
 0x38f   : > { %v2124_v57 = vpop.f32.mrb[38].mxu1 }
 0x390   : > { %v7106_v41 = vadd.f32 %v4982_v22, %v2124_v57  ;;  %v2126_v33 = vpop.f32.mrb[39].mxu1  ;;  %3353 = vmatmul.mubr.bf16.gmra.mrb[196].mxu0 %v2995_v11  ;;  %v3001_v29 = vsel %vm2930_vm3, %v2994_v51, %v3000_v13  ;;  %v2963_v63 = vsel %vm2930_vm3, %v2956_v59, %v2962_v46  ;;  %v3014_v51 = vrot.slane %v8143_v47, 2 }
 0x391   : > { %3360 = vmatprep.mubr.bf16.mxu0 %v3003_v25  ;;  %v2974_v59 = vrot.slane %v6707_v36, 2  ;;  %v2980_v36 = vrot.slane %v6731_v45, 2 }
 0x392   : > { %5068 = vmatmul.mubr.bf16.vlgmr.msra.gmra.mrb[144].mxu1 %v2945_v0  ;;  %v3015_v47 = vsel %vm2930_vm3, %v3008_v43, %v3014_v51  ;;  %v8146_v43 = vrot.slane %v6897_v4, 2  ;;  %v2992_v4 = vrot.slane %v6779_v34, 2 }
 0x393   : > { %5071 = vmatprep.mubr.bf16.mxu1 %v2951_v27  ;;  %v2975_v20 = vsel %vm2930_vm3, %v2968_v48, %v2974_v59 }
 0x395   : > { %v2129_v8 = vpop.f32.mrb[40].mxu1 }
 0x396   : > { %v2131_v22 = vpop.f32.mrb[41].mxu1 }
 0x397   : > { %v2132_v1 = vpop.f32.mrb[42].mxu1 }
 0x398   : > { %v2134_v24 = vpop.f32.mrb[43].mxu1  ;;  %3361 = vmatmul.mubr.bf16.gmra.mrb[200].mxu0 %v3001_v29  ;;  %v3007_v29 = vsel %vm2930_vm3, %v3000_v13, %v3006_v30  ;;  %v2986_v13 = vrot.slane %v6757_v54, 2  ;;  %v3018_v54 = vrot.slane %v8145_v58, 2 }
 0x399   : > { %3368 = vmatprep.mubr.bf16.mxu0 %v3009_v62  ;;  %v2969_v24 = vsel %vm2930_vm3, %v2962_v46, %v2968_v48  ;;  %v3021_v46 = vsel %vm2930_vm3, %v3014_v51, %v8146_v43 }
 0x39a   : > { %v4985_v57 = vpop.f32.mrb[104].mxu0  ;;  %5072 = vmatmul.mubr.bf16.gmra.mrb[148].mxu1 %v2957_v12 }
 0x39b   : > { %v2306_v3 = vpop.f32.mrb[105].mxu0  ;;  %5075 = vmatprep.mubr.bf16.mxu1 %v2963_v63 }
 0x39c   : > { %v7120_v11 = vadd.f32 %v2306_v3, %v2129_v8  ;;  %v4986_v7 = vpop.f32.mrb[106].mxu0 }
 0x39d   : > { %v2137_v33 = vpop.f32.mrb[44].mxu1  ;;  %v2309_v25 = vpop.f32.mrb[107].mxu0 }
 0x39e   : > { %v7124_v0 = vadd.f32 %v4985_v57, %v2137_v33  ;;  %v7126_v42 = vadd.f32 %v2309_v25, %v2132_v1  ;;  %v2139_v27 = vpop.f32.mrb[45].mxu1  ;;  %v3012_v1 = vrot.slane %v8144_v44, 2  ;;  %v2987_v44 = vsel %vm2930_vm3, %v2980_v36, %v2986_v13 }
 0x39f   : > { %v2140_v22 = vpop.f32.mrb[46].mxu1 }
 0x3a0   : > { %v7130_v31 = vadd.f32 %v4986_v7, %v2140_v22  ;;  %v2142_v8 = vpop.f32.mrb[47].mxu1  ;;  %3369 = vmatmul.mubr.bf16.gmra.mrb[204].mxu0 %v3007_v29  ;;  %v3013_v63 = vsel %vm2930_vm3, %v3006_v30, %v3012_v1  ;;  %v2981_v7 = vsel %vm2930_vm3, %v2974_v59, %v2980_v36  ;;  %v2998_v29 = vrot.slane %v6801_v50, 2 }
 0x3a1   : > { %3376 = vmatprep.mubr.bf16.mxu0 %v3015_v47  ;;  %v3019_v47 = vsel %vm2930_vm3, %v3012_v1, %v3018_v54  ;;  %v3004_v50 = vrot.slane %v6823_v39, 2  ;;  %v3010_v1 = vrot.slane %v6845_v38, 2 }
 0x3a2   : > { %5076 = vmatmul.mubr.bf16.gmra.mrb[152].mxu1 %v2969_v24  ;;  %v2999_v34 = vsel %vm2930_vm3, %v2992_v4, %v2998_v29 }
 0x3a3   : > { %5079 = vmatprep.mubr.bf16.mxu1 %v2975_v20  ;;  %v5419_v20 = vld [vmem:[#allocation16] sm:$0xff]  }
 0x3a4   : > { %5103 = vmatprep.subr.bf16.mxu1 %v5419_v20 }
 0x3a5   : > { %v2145_v62 = vpop.f32.mrb[48].mxu1  ;;  %5104 = vmatpush3.bf16.msra.mxu1 %v5419_v20  ;;  %v5421_v20 = vld [vmem:[#allocation16 + $0x10] sm:$0xff]  }
 0x3a6   : > { %v2147_v12 = vpop.f32.mrb[49].mxu1 }
 0x3a7   : > { %v2148_v57 = vpop.f32.mrb[50].mxu1 }
 0x3a8   : > { %v2150_v3 = vpop.f32.mrb[51].mxu1  ;;  %3377 = vmatmul.mubr.bf16.gmra.mrb[208].mxu0 %v3013_v63  ;;  %v8147_v63 = vld [vmem:[#allocation47_spill] sm:$0xff] }
 0x3a9   : > { %3384 = vmatprep.mubr.bf16.mxu0 %v3021_v46  ;;  %v8148_v3 = vrot.slane %v8147_v63, 2  ;;  %v3005_v46 = vsel %vm2930_vm3, %v2998_v29, %v3004_v50 }
 0x3aa   : > { %v4989_v33 = vpop.f32.mrb[108].mxu0  ;;  %5080 = vmatmul.mubr.bf16.gmra.mrb[156].mxu1 %v2981_v7 }
 0x3ab   : > { %v2322_v45 = vpop.f32.mrb[109].mxu0  ;;  %5083 = vmatprep.mubr.bf16.mxu1 %v2987_v44  ;;  %v3025_v43 = vsel %vm2930_vm3, %v3018_v54, %v8148_v3 }
 0x3ac   : > { %v7145_v25 = vadd.f32 %v2322_v45, %v2145_v62  ;;  %v4990_v30 = vpop.f32.mrb[110].mxu0  ;;  %v2993_v62 = vsel %vm2930_vm3, %v2986_v13, %v2992_v4  ;;  %v5420_v13 = vld [vmem:[#allocation16 + $0x8] sm:$0xff]  }
 0x3ad   : > { %v2153_v48 = vpop.f32.mrb[52].mxu1  ;;  %v2325_v27 = vpop.f32.mrb[111].mxu0  ;;  %5105 = vmatprep.subr.bf16.mxu1 %v5420_v13 }
 0x3ae   : > { %v7148_v22 = vadd.f32 %v4989_v33, %v2153_v48  ;;  %v7150_v51 = vadd.f32 %v2325_v27, %v2148_v57  ;;  %v2155_v59 = vpop.f32.mrb[53].mxu1  ;;  %v3011_v33 = vsel %vm2930_vm3, %v3004_v50, %v3010_v1  ;;  %5106 = vmatpush3.bf16.msra.mxu1 %v5420_v13 }
 0x3af   : > { %v2156_v8 = vpop.f32.mrb[54].mxu1  ;;  %5107 = vmatprep.subr.bf16.mxu1 %v5421_v20 }
 0x3b0   : > { %v7154_v24 = vadd.f32 %v4990_v30, %v2156_v8  ;;  %v2158_v58 = vpop.f32.mrb[55].mxu1  ;;  %3385 = vmatmul.mubr.bf16.gmra.mrb[212].mxu0 %v3019_v47  ;;  %v3016_v30 = vrot.slane %v6866_v61, 2  ;;  %v8149_v8 = vld [vmem:[#allocation48_spill] sm:$0xff] }
 0x3b1   : > { %3392 = vmatprep.mubr.bf16.mxu0 %v6925_v2  ;;  %v8150_v58 = vrot.slane %v6888_v55, 2  ;;  %v5422_v55 = vld [vmem:[#allocation16 + $0x18] sm:$0xff]  }
 0x3b2   : > { %5084 = vmatmul.mubr.bf16.gmra.mrb[160].mxu1 %v2993_v62  ;;  %v3017_v47 = vsel %vm2930_vm3, %v3010_v1, %v3016_v30 }
 0x3b3   : > { %5087 = vmatprep.mubr.bf16.mxu1 %v2999_v34  ;;  %v3023_v61 = vsel %vm2930_vm3, %v3016_v30, %v8150_v58  ;;  %5108 = vmatpush3.bf16.msra.mxu1 %v5421_v20 }
 0x3b4   : > { %5109 = vmatprep.subr.bf16.mxu1 %v5422_v55 }
 0x3b5   : > { %v2161_v36 = vpop.f32.mrb[56].mxu1 }
 0x3b6   : > { %v2163_v12 = vpop.f32.mrb[57].mxu1 }
 0x3b7   : > { %v2164_v57 = vpop.f32.mrb[58].mxu1  ;;  %5110 = vmatpush3.bf16.msra.mxu1 %v5422_v55 }
 0x3b8   : > { %v2166_v2 = vpop.f32.mrb[59].mxu1  ;;  %3393 = vmatmul.mubr.bf16.gmra.mrb[216].mxu0 %v3025_v43 }
 0x3b9   : > { %3400 = vmatprep.mubr.bf16.mxu0 %v6941_v60 }
 0x3ba   : > { %v4993_v7 = vpop.f32.mrb[112].mxu0  ;;  %5088 = vmatmul.mubr.bf16.gmra.mrb[164].mxu1 %v3005_v46 }
 0x3bb   : > { %v2338_v39 = vpop.f32.mrb[113].mxu0  ;;  %5091 = vmatprep.mubr.bf16.mxu1 %v3011_v33 }
 0x3bc   : > { %v7167_v38 = vadd.f32 %v2338_v39, %v2161_v36  ;;  %v4994_v44 = vpop.f32.mrb[114].mxu0 }
 0x3bd   : > { %v2169_v45 = vpop.f32.mrb[60].mxu1  ;;  %v2341_v54 = vpop.f32.mrb[115].mxu0 }
 0x3be   : > { %v7170_v48 = vadd.f32 %v4993_v7, %v2169_v45  ;;  %v7172_v60 = vadd.f32 %v2341_v54, %v2164_v57  ;;  %v2171_v27 = vpop.f32.mrb[61].mxu1 }
 0x3bf   : > { %v2172_v4 = vpop.f32.mrb[62].mxu1 }
 0x3c0   : > { %v7174_v59 = vadd.f32 %v4994_v44, %v2172_v4  ;;  %v2174_v29 = vpop.f32.mrb[63].mxu1  ;;  %3401 = vmatmul.mubr.bf16.gmra.mrb[220].mxu0 %v8149_v8 }
 0x3c1   : > { %3408 = vmatprep.mubr.bf16.mxu0 %v6944_v16 }
 0x3c2   : > { %5092 = vmatmul.mubr.bf16.gmra.mrb[168].mxu1 %v3017_v47 }
 0x3c3   : > { %v4997_v62 = vpop.f32.mrb[116].mxu0  ;;  %5095 = vmatprep.mubr.bf16.mxu1 %v3023_v61 }
 0x3c4   : > { %v2354_v34 = vpop.f32.mrb[117].mxu0 }
 0x3c5   : > { %v2177_v36 = vpop.f32.mrb[64].mxu1  ;;  %v4998_v50 = vpop.f32.mrb[118].mxu0 }
 0x3c6   : > { %v7182_v12 = vadd.f32 %v2354_v34, %v2177_v36  ;;  %v2179_v57 = vpop.f32.mrb[65].mxu1  ;;  %v2357_v63 = vpop.f32.mrb[119].mxu0 }
 0x3c7   : > { %v2180_v16 = vpop.f32.mrb[66].mxu1 }
 0x3c8   : > { %v7184_v3 = vadd.f32 %v2357_v63, %v2180_v16  ;;  %v2182_v1 = vpop.f32.mrb[67].mxu1  ;;  %3409 = vmatmul.mubr.bf16.gmra.mrb[224].mxu0 %v6929_v15 }
 0x3ca   : > { %5096 = vmatmul.mubr.bf16.gmra.mrb[172].mxu1 %v6919_v6  ;;  %v5423_v6 = vld [vmem:[#allocation16 + $0x20] sm:$0xff]  }
 0x3cb   : > { %v5017_v43 = vpop.f32.mrb[120].mxu0  ;;  %5099 = vmatprep.mubr.bf16.mxu1 %v6935_v49  ;;  %5111 = vmatprep.subr.bf16.mxu1 %v5423_v6 }
 0x3cc   : > { %v2724_v2 = vpop.f32.mrb[121].mxu0  ;;  %5112 = vmatpush3.bf16.msra.mxu1 %v5423_v6 }
 0x3cd   : > { %v2185_v13 = vpop.f32.mrb[68].mxu1  ;;  %v5018_v46 = vpop.f32.mrb[122].mxu0 }
 0x3ce   : > { %v7189_v7 = vadd.f32 %v4997_v62, %v2185_v13  ;;  %v2187_v33 = vpop.f32.mrb[69].mxu1  ;;  %v2727_v39 = vpop.f32.mrb[123].mxu0 }
 0x3cf   : > { %v2188_v44 = vpop.f32.mrb[70].mxu1 }
 0x3d0   : > { %v7191_v45 = vadd.f32 %v4998_v50, %v2188_v44  ;;  %v2190_v54 = vpop.f32.mrb[71].mxu1 }
 0x3d2   : > { %5100 = vmatmul.mubr.bf16.gmra.mrb[176].mxu1 %v6938_v10  ;;  %v5424_v10 = vld [vmem:[#allocation16 + $0x28] sm:$0xff]  }
 0x3d3   : > { %v5021_v15 = vpop.f32.mrb[124].mxu0  ;;  %5113 = vmatprep.subr.bf16.mxu1 %v5424_v10 }
 0x3d4   : > { %v2740_v30 = vpop.f32.mrb[125].mxu0  ;;  %5114 = vmatpush3.bf16.msra.mxu1 %v5424_v10 }
 0x3d5   : > { %v2547_v49 = vpop.f32.mrb[72].mxu1  ;;  %v5022_v27 = vpop.f32.mrb[126].mxu0 }
 0x3d6   : > { %v2548_v4 = vadd.f32 %v2547_v49, %v7014_v32  ;;  %v2549_v29 = vpop.f32.mrb[73].mxu1  ;;  %v2743_v8 = vpop.f32.mrb[127].mxu0 }
 0x3d7   : > { %v2550_v47 = vpop.f32.mrb[74].mxu1 }
 0x3d8   : > { %v7195_v58 = vadd.f32 %v2724_v2, %v2548_v4  ;;  %v2551_v61 = vadd.f32 %v2550_v47, %v7019_v40  ;;  %v2552_v20 = vpop.f32.mrb[75].mxu1 }
 0x3da   : > { %v7198_v62 = vadd.f32 %v2727_v39, %v2551_v61  ;;  %v5425_v39 = vld [vmem:[#allocation16 + $0x30] sm:$0xff]  }
 0x3db   : > { %v7200_v34 = vpop.f32.mrb[128].mxu0  ;;  %5115 = vmatprep.subr.bf16.mxu1 %v5425_v39 }
 0x3dc   : > { %v2756_v36 = vpop.f32.mrb[129].mxu0  ;;  %5116 = vmatpush3.bf16.msra.mxu1 %v5425_v39 }
 0x3dd   : > { %v2555_v50 = vpop.f32.mrb[76].mxu1  ;;  %v7202_v57 = vpop.f32.mrb[130].mxu0 }
 0x3de   : > { %v2556_v32 = vadd.f32 %v2555_v50, %v7017_v9  ;;  %v2557_v63 = vpop.f32.mrb[77].mxu1  ;;  %v2759_v16 = vpop.f32.mrb[131].mxu0 }
 0x3df   : > { %v2558_v1 = vpop.f32.mrb[78].mxu1 }
 0x3e0   : > { %v7205_v55 = vadd.f32 %v5017_v43, %v2556_v32  ;;  %v2559_v40 = vadd.f32 %v2558_v1, %v7022_v37  ;;  %v2560_v2 = vpop.f32.mrb[79].mxu1 }
 0x3e2   : > { %v7208_v13 = vadd.f32 %v5018_v46, %v2559_v40 }
 0x3e3   : > { %v7210_v33 = vpop.f32.mrb[132].mxu0 }
 0x3e4   : > { %v2772_v44 = vpop.f32.mrb[133].mxu0 }
 0x3e5   : > { %v2563_v54 = vpop.f32.mrb[80].mxu1  ;;  %v7212_v6 = vpop.f32.mrb[134].mxu0 }
 0x3e6   : > { %v2564_v9 = vadd.f32 %v2563_v54, %v7034_v18  ;;  %v2565_v49 = vpop.f32.mrb[81].mxu1  ;;  %v2775_v4 = vpop.f32.mrb[135].mxu0 }
 0x3e7   : > { %v2566_v43 = vpop.f32.mrb[82].mxu1 }
 0x3e8   : > { %v7215_v29 = vadd.f32 %v2740_v30, %v2564_v9  ;;  %v2567_v37 = vadd.f32 %v2566_v43, %v7039_v26  ;;  %v2568_v46 = vpop.f32.mrb[83].mxu1 }
 0x3ea   : > { %v7218_v47 = vadd.f32 %v2743_v8, %v2567_v37  ;;  %v5426_v8 = vld [vmem:[#allocation16 + $0x38] sm:$0xff]  }
 0x3eb   : > { %v7220_v61 = vpop.f32.mrb[136].mxu0  ;;  %5117 = vmatprep.subr.bf16.mxu1 %v5426_v8 }
 0x3ec   : > { %8151 = vst [vmem:[#allocation30_spill] sm:$0xff] %v7218_v47  ;;  %v7222_v20 = vpop.f32.mrb[137].mxu0  ;;  %5118 = vmatpush3.bf16.msra.mxu1 %v5426_v8 }
 0x3ed   : > { %v2571_v10 = vpop.f32.mrb[84].mxu1  ;;  %v7224_v50 = vpop.f32.mrb[138].mxu0 }
 0x3ee   : > { %v2572_v18 = vadd.f32 %v2571_v10, %v7037_v23  ;;  %v2573_v32 = vpop.f32.mrb[85].mxu1  ;;  %v7227_v63 = vpop.f32.mrb[139].mxu0 }
 0x3ef   : > { %v2574_v1 = vpop.f32.mrb[86].mxu1 }
 0x3f0   : > { %v7229_v30 = vadd.f32 %v5021_v15, %v2572_v18  ;;  %v2575_v26 = vadd.f32 %v2574_v1, %v7042_v5  ;;  %v2576_v40 = vpop.f32.mrb[87].mxu1 }
 0x3f1   : > { %v8154_v40 = vld [vmem:[#allocation29_spill] sm:$0xff] }
 0x3f2   : > { %v7232_v2 = vadd.f32 %v5022_v27, %v2575_v26 }
 0x3f3   : > { %v7234_v39 = vpop.f32.mrb[140].mxu0 }
 0x3f4   : > { %v7236_v54 = vpop.f32.mrb[141].mxu0 }
 0x3f5   : > { %v2579_v9 = vpop.f32.mrb[88].mxu1  ;;  %v7238_v23 = vpop.f32.mrb[142].mxu0 }
 0x3f6   : > { %v2580_v49 = vadd.f32 %v2579_v9, %v7054_v53  ;;  %v2581_v43 = vpop.f32.mrb[89].mxu1  ;;  %v7241_v15 = vpop.f32.mrb[143].mxu0 }
 0x3f7   : > { %v2582_v37 = vpop.f32.mrb[90].mxu1 }
 0x3f8   : > { %v7243_v5 = vadd.f32 %v2756_v36, %v2580_v49  ;;  %v2583_v27 = vadd.f32 %v2582_v37, %v7059_v14  ;;  %v2584_v46 = vpop.f32.mrb[91].mxu1  ;;  %v8156_v14 = vld [vmem:[#allocation32_spill] sm:$0xff] }
 0x3fa   : > { %8152 = vst [vmem:[#allocation31_spill] sm:$0xff] %v7243_v5  ;;  %v7246_v10 = vadd.f32 %v2759_v16, %v2583_v27 }
 0x3fb   : > { %v7248_v18 = vpop.f32.mrb[144].mxu0 }
 0x3fc   : > { %8153 = vst [vmem:[#allocation33_spill] sm:$0xff] %v7246_v10  ;;  %v7250_v32 = vpop.f32.mrb[145].mxu0 }
 0x3fd   : > { %v2587_v1 = vpop.f32.mrb[92].mxu1  ;;  %v7252_v26 = vpop.f32.mrb[146].mxu0 }
 0x3fe   : > { %v2588_v53 = vadd.f32 %v2587_v1, %v8154_v40  ;;  %v2589_v8 = vpop.f32.mrb[93].mxu1  ;;  %v7255_v9 = vpop.f32.mrb[147].mxu0 }
 0x3ff   : > { %v2590_v43 = vpop.f32.mrb[94].mxu1 }
 0x400   : > { %v7258_v36 = vadd.f32 %v7200_v34, %v2588_v53  ;;  %v2591_v49 = vadd.f32 %v2590_v43, %v8156_v14  ;;  %v2592_v16 = vpop.f32.mrb[95].mxu1 }
 0x402   : > { %8155 = vst [vmem:[#allocation34_spill] sm:$0xff] %v7258_v36  ;;  %v7262_v37 = vadd.f32 %v7202_v57, %v2591_v49 }
 0x403   : > { %v7264_v27 = vpop.f32.mrb[148].mxu0 }
 0x404   : > { %8157 = vst [vmem:[#allocation35_spill] sm:$0xff] %v7262_v37  ;;  %v7266_v46 = vpop.f32.mrb[149].mxu0 }
 0x405   : > { %v2595_v10 = vpop.f32.mrb[96].mxu1  ;;  %v7268_v5 = vpop.f32.mrb[150].mxu0 }
 0x406   : > { %v2596_v1 = vadd.f32 %v2595_v10, %v7074_v52  ;;  %v2597_v40 = vpop.f32.mrb[97].mxu1  ;;  %v7271_v8 = vpop.f32.mrb[151].mxu0 }
 0x407   : > { %v2598_v34 = vpop.f32.mrb[98].mxu1 }
 0x408   : > { %v7273_v53 = vadd.f32 %v2772_v44, %v2596_v1  ;;  %v2599_v43 = vadd.f32 %v2598_v34, %v7079_v17  ;;  %v2600_v14 = vpop.f32.mrb[99].mxu1 }
 0x40a   : > { %8158 = vst [vmem:[#allocation38_spill] sm:$0xff] %v7273_v53  ;;  %v7276_v57 = vadd.f32 %v2775_v4, %v2599_v43 }
 0x40b   : > { %v7278_v49 = vpop.f32.mrb[152].mxu0 }
 0x40c   : > { %8159 = vst [vmem:[#allocation36_spill] sm:$0xff] %v7276_v57  ;;  %v7280_v16 = vpop.f32.mrb[153].mxu0 }
 0x40d   : > { %v2603_v37 = vpop.f32.mrb[100].mxu1  ;;  %v7282_v36 = vpop.f32.mrb[154].mxu0 }
 0x40e   : > { %v2604_v52 = vadd.f32 %v2603_v37, %v7077_v28  ;;  %v2605_v10 = vpop.f32.mrb[101].mxu1  ;;  %v7285_v40 = vpop.f32.mrb[155].mxu0 }
 0x40f   : > { %v2606_v47 = vpop.f32.mrb[102].mxu1 }
 0x410   : > { %v7288_v44 = vadd.f32 %v7210_v33, %v2604_v52  ;;  %v2607_v17 = vadd.f32 %v2606_v47, %v7082_v35  ;;  %v2608_v4 = vpop.f32.mrb[103].mxu1 }
 0x412   : > { %v7292_v1 = vadd.f32 %v7212_v6, %v2607_v17 }
 0x413   : > { %v7294_v34 = vpop.f32.mrb[156].mxu0 }
 0x414   : > { %v3276_v43 = vpop.f32.mrb[157].mxu0 }
 0x415   : > { %v2611_v14 = vpop.f32.mrb[104].mxu1  ;;  %v7296_v57 = vpop.f32.mrb[158].mxu0 }
 0x416   : > { %v2612_v28 = vadd.f32 %v2611_v14, %v7096_v19  ;;  %v2613_v37 = vpop.f32.mrb[105].mxu1  ;;  %v3279_v10 = vpop.f32.mrb[159].mxu0 }
 0x417   : > { %v2614_v53 = vpop.f32.mrb[106].mxu1 }
 0x418   : > { %v7300_v33 = vadd.f32 %v7222_v20, %v2612_v28  ;;  %v2615_v35 = vadd.f32 %v2614_v53, %v7102_v56  ;;  %v2616_v47 = vpop.f32.mrb[107].mxu1 }
 0x41a   : > { %v7304_v6 = vadd.f32 %v7227_v63, %v2615_v35 }
 0x41b   : > { %v7306_v52 = vpop.f32.mrb[160].mxu0 }
 0x41c   : > { %v3284_v17 = vpop.f32.mrb[161].mxu0 }
 0x41d   : > { %v2619_v4 = vpop.f32.mrb[108].mxu1  ;;  %v7308_v43 = vpop.f32.mrb[162].mxu0 }
 0x41e   : > { %v2620_v19 = vadd.f32 %v2619_v4, %v7100_v21  ;;  %v2621_v14 = vpop.f32.mrb[109].mxu1  ;;  %v3287_v37 = vpop.f32.mrb[163].mxu0 }
 0x41f   : > { %v2622_v10 = vpop.f32.mrb[110].mxu1 }
 0x420   : > { %v7312_v20 = vadd.f32 %v7220_v61, %v2620_v19  ;;  %v2623_v56 = vadd.f32 %v2622_v10, %v7106_v41  ;;  %v2624_v53 = vpop.f32.mrb[111].mxu1 }
 0x422   : > { %v7316_v63 = vadd.f32 %v7224_v50, %v2623_v56 }
 0x423   : > { %v7318_v28 = vpop.f32.mrb[164].mxu0 }
 0x424   : > { %v3292_v35 = vpop.f32.mrb[165].mxu0 }
 0x425   : > { %v2627_v47 = vpop.f32.mrb[112].mxu1  ;;  %v7320_v17 = vpop.f32.mrb[166].mxu0 }
 0x426   : > { %v2628_v21 = vadd.f32 %v2627_v47, %v7120_v11  ;;  %v2629_v4 = vpop.f32.mrb[113].mxu1  ;;  %v3295_v14 = vpop.f32.mrb[167].mxu0 }
 0x427   : > { %v2630_v37 = vpop.f32.mrb[114].mxu1 }
 0x428   : > { %v7324_v61 = vadd.f32 %v7236_v54, %v2628_v21  ;;  %v2631_v41 = vadd.f32 %v2630_v37, %v7126_v42  ;;  %v2632_v19 = vpop.f32.mrb[115].mxu1 }
 0x42a   : > { %v7328_v50 = vadd.f32 %v7241_v15, %v2631_v41 }
 0x42b   : > { %v7330_v10 = vpop.f32.mrb[168].mxu0 }
 0x42c   : > { %v3300_v56 = vpop.f32.mrb[169].mxu0 }
 0x42d   : > { %v2635_v53 = vpop.f32.mrb[116].mxu1  ;;  %v7332_v35 = vpop.f32.mrb[170].mxu0 }
 0x42e   : > { %v2636_v11 = vadd.f32 %v2635_v53, %v7124_v0  ;;  %v2637_v47 = vpop.f32.mrb[117].mxu1  ;;  %v3303_v4 = vpop.f32.mrb[171].mxu0 }
 0x42f   : > { %v2638_v14 = vpop.f32.mrb[118].mxu1 }
 0x430   : > { %v7336_v54 = vadd.f32 %v7234_v39, %v2636_v11  ;;  %v2639_v42 = vadd.f32 %v2638_v14, %v7130_v31  ;;  %v2640_v21 = vpop.f32.mrb[119].mxu1 }
 0x432   : > { %v7340_v15 = vadd.f32 %v7238_v23, %v2639_v42 }
 0x433   : > { %v7342_v37 = vpop.f32.mrb[172].mxu0 }
 0x434   : > { %v3308_v41 = vpop.f32.mrb[173].mxu0 }
 0x435   : > { %v2643_v19 = vpop.f32.mrb[120].mxu1  ;;  %v7344_v56 = vpop.f32.mrb[174].mxu0 }
 0x436   : > { %v2644_v0 = vadd.f32 %v2643_v19, %v7145_v25  ;;  %v2645_v53 = vpop.f32.mrb[121].mxu1  ;;  %v3311_v47 = vpop.f32.mrb[175].mxu0 }
 0x437   : > { %v2646_v4 = vpop.f32.mrb[122].mxu1 }
 0x438   : > { %v7348_v39 = vadd.f32 %v7250_v32, %v2644_v0  ;;  %v2647_v31 = vadd.f32 %v2646_v4, %v7150_v51  ;;  %v2648_v11 = vpop.f32.mrb[123].mxu1 }
 0x43a   : > { %v7352_v23 = vadd.f32 %v7255_v9, %v2647_v31 }
 0x43b   : > { %v7354_v14 = vpop.f32.mrb[176].mxu0 }
 0x43c   : > { %v3316_v42 = vpop.f32.mrb[177].mxu0 }
 0x43d   : > { %v2651_v21 = vpop.f32.mrb[124].mxu1  ;;  %v7356_v41 = vpop.f32.mrb[178].mxu0 }
 0x43e   : > { %v2652_v25 = vadd.f32 %v2651_v21, %v7148_v22  ;;  %v2653_v19 = vpop.f32.mrb[125].mxu1  ;;  %v3319_v53 = vpop.f32.mrb[179].mxu0 }
 0x43f   : > { %v2654_v47 = vpop.f32.mrb[126].mxu1 }
 0x440   : > { %v7360_v32 = vadd.f32 %v7248_v18, %v2652_v25  ;;  %v2655_v51 = vadd.f32 %v2654_v47, %v7154_v24  ;;  %v2656_v0 = vpop.f32.mrb[127].mxu1 }
 0x442   : > { %v7364_v9 = vadd.f32 %v7252_v26, %v2655_v51 }
 0x443   : > { %v7366_v4 = vpop.f32.mrb[180].mxu0 }
 0x444   : > { %v3324_v31 = vpop.f32.mrb[181].mxu0 }
 0x445   : > { %v2659_v11 = vpop.f32.mrb[128].mxu1  ;;  %v7368_v42 = vpop.f32.mrb[182].mxu0 }
 0x446   : > { %v2660_v22 = vadd.f32 %v2659_v11, %v7167_v38  ;;  %v2661_v21 = vpop.f32.mrb[129].mxu1  ;;  %v3327_v19 = vpop.f32.mrb[183].mxu0 }
 0x447   : > { %v2662_v53 = vpop.f32.mrb[130].mxu1 }
 0x448   : > { %v7372_v18 = vadd.f32 %v7266_v46, %v2660_v22  ;;  %v2663_v24 = vadd.f32 %v2662_v53, %v7172_v60  ;;  %v2664_v25 = vpop.f32.mrb[131].mxu1 }
 0x44a   : > { %v7376_v26 = vadd.f32 %v7271_v8, %v2663_v24 }
 0x44b   : > { %v7378_v47 = vpop.f32.mrb[184].mxu0 }
 0x44c   : > { %v3332_v51 = vpop.f32.mrb[185].mxu0 }
 0x44d   : > { %v2667_v0 = vpop.f32.mrb[132].mxu1  ;;  %v7380_v31 = vpop.f32.mrb[186].mxu0 }
 0x44e   : > { %v2668_v38 = vadd.f32 %v2667_v0, %v7170_v48  ;;  %v2669_v11 = vpop.f32.mrb[133].mxu1  ;;  %v3335_v21 = vpop.f32.mrb[187].mxu0 }
 0x44f   : > { %v2670_v19 = vpop.f32.mrb[134].mxu1 }
 0x450   : > { %v7384_v46 = vadd.f32 %v7264_v27, %v2668_v38  ;;  %v2671_v60 = vadd.f32 %v2670_v19, %v7174_v59  ;;  %v2672_v22 = vpop.f32.mrb[135].mxu1 }
 0x452   : > { %v7388_v8 = vadd.f32 %v7268_v5, %v2671_v60 }
 0x453   : > { %v7390_v53 = vpop.f32.mrb[188].mxu0 }
 0x454   : > { %v3340_v24 = vpop.f32.mrb[189].mxu0 }
 0x455   : > { %v2675_v25 = vpop.f32.mrb[136].mxu1  ;;  %v7392_v51 = vpop.f32.mrb[190].mxu0 }
 0x456   : > { %v2676_v48 = vadd.f32 %v2675_v25, %v7182_v12  ;;  %v2677_v0 = vpop.f32.mrb[137].mxu1  ;;  %v3343_v11 = vpop.f32.mrb[191].mxu0 }
 0x457   : > { %v2678_v21 = vpop.f32.mrb[138].mxu1 }
 0x458   : > { %v7396_v27 = vadd.f32 %v7280_v16, %v2676_v48  ;;  %v2679_v59 = vadd.f32 %v2678_v21, %v7184_v3  ;;  %v2680_v38 = vpop.f32.mrb[139].mxu1 }
 0x45a   : > { %v7400_v5 = vadd.f32 %v7285_v40, %v2679_v59 }
 0x45b   : > { %v7402_v19 = vpop.f32.mrb[192].mxu0 }
 0x45c   : > { %8160 = vst [vmem:[#allocation37_spill] sm:$0xff] %v7400_v5  ;;  %v3348_v60 = vpop.f32.mrb[193].mxu0 }
 0x45d   : > { %v2683_v22 = vpop.f32.mrb[140].mxu1  ;;  %v7404_v24 = vpop.f32.mrb[194].mxu0 }
 0x45e   : > { %v2684_v12 = vadd.f32 %v2683_v22, %v7189_v7  ;;  %v2685_v25 = vpop.f32.mrb[141].mxu1  ;;  %v3351_v0 = vpop.f32.mrb[195].mxu0 }
 0x45f   : > { %v2686_v11 = vpop.f32.mrb[142].mxu1  ;;  %v7419_v0 = vld [vmem:[#allocation13] ss:$0 sm:$0xff] }
 0x460   : > { %v7408_v16 = vadd.f32 %v7278_v49, %v2684_v12  ;;  %v2687_v3 = vadd.f32 %v2686_v11, %v7191_v45  ;;  %v2688_v48 = vpop.f32.mrb[143].mxu1 }
 0x462   : > { %v7412_v40 = vadd.f32 %v7282_v36, %v2687_v3  ;;  %v7424_v3 = vld [vmem:[#allocation14] ss:$0 sm:$0xff] }
 0x463   : > { %v7414_v21 = vpop.f32.mrb[196].mxu0 }
 0x464   : > { %8161 = vst [vmem:[#allocation39_spill] sm:$0xff] %v7412_v40  ;;  %v3356_v59 = vpop.f32.mrb[197].mxu0 }
 0x465   : > { %v7416_v38 = vpop.f32.mrb[198].mxu0  ;;  %v5069_v60 = vpop.f32.mrb[144].mxu1 }
 0x466   : > { %v3460_v7 = vadd.f32 %v5069_v60, %v7306_v52  ;;  %v3359_v22 = vpop.f32.mrb[199].mxu0  ;;  %v3451_v25 = vpop.f32.mrb[145].mxu1 }
 0x467   : > { %v3452_v49 = vadd.f32 %v3451_v25, %v7294_v34  ;;  %v5070_v12 = vpop.f32.mrb[146].mxu1 }
 0x468   : > { %v3596_v45 = vadd.f32 %v3460_v7, %v7205_v55  ;;  %v3463_v36 = vadd.f32 %v5070_v12, %v7308_v43  ;;  %v3454_v11 = vpop.f32.mrb[147].mxu1 }
 0x469   : > { %v3594_v48 = vadd.f32 %v3452_v49, %v7195_v58  ;;  %v3455_v59 = vadd.f32 %v3454_v11, %v7296_v57 }
 0x46a   : > { %v3639_v52 = vmul.f32 %v7419_v0, %v3596_v45  ;;  %v3597_v60 = vadd.f32 %v3463_v36, %v7208_v13 }
 0x46b   : > { %v3637_v22 = vmul.f32 %v7419_v0, %v3594_v48  ;;  %v3595_v34 = vadd.f32 %v3455_v59, %v7198_v62  ;;  %v7432_v25 = vpop.f32.mrb[200].mxu0 }
 0x46c   : > { %v3682_v55 = vadd.f32 %v7424_v3, %v3639_v52  ;;  %v3640_v43 = vmul.f32 %v7419_v0, %v3597_v60  ;;  %v3364_v7 = vpop.f32.mrb[201].mxu0 }
 0x46d   : > { %v3638_v12 = vmul.f32 %v7419_v0, %v3595_v34  ;;  %v7437_v58 = vpop.f32.mrb[202].mxu0  ;;  %v5073_v57 = vpop.f32.mrb[148].mxu1  ;;  %v3680_v49 = vadd.f32 %v7424_v3, %v3637_v22 }
 0x46e   : > { %v3683_v13 = vadd.f32 %v7424_v3, %v3640_v43  ;;  %v3476_v45 = vadd.f32 %v5073_v57, %v7330_v10  ;;  %v3367_v36 = vpop.f32.mrb[203].mxu0  ;;  %v3467_v62 = vpop.f32.mrb[149].mxu1  ;;  %v3718_v52 = vmax.f32 %v3682_v55, 0.0  ;;  %v8162_v55 = vld [vmem:[#allocation30_spill] sm:$0xff] }
 0x46f   : > { %v3468_v11 = vadd.f32 %v3467_v62, %v7318_v28  ;;  %v5074_v48 = vpop.f32.mrb[150].mxu1  ;;  %v3681_v59 = vadd.f32 %v7424_v3, %v3638_v12  ;;  %v3716_v40 = vmax.f32 %v3680_v49, 0.0 }
 0x470   : > { %v3719_v60 = vmax.f32 %v3683_v13, 0.0  ;;  %v3600_v34 = vadd.f32 %v3476_v45, %v7229_v30  ;;  %v3479_v7 = vadd.f32 %v5074_v48, %v7332_v35  ;;  %v3470_v5 = vpop.f32.mrb[151].mxu1 }
 0x471   : > { %v3598_v22 = vadd.f32 %v3468_v11, %v7215_v29  ;;  %v3471_v43 = vadd.f32 %v3470_v5, %v7320_v17  ;;  %v3717_v10 = vmax.f32 %v3681_v59, 0.0 }
 0x472   : > { %v3753_v57 = vpack.c.bf16 %v3719_v60, %v3718_v52  ;;  %v3643_v36 = vmul.f32 %v7419_v0, %v3600_v34  ;;  %v3601_v28 = vadd.f32 %v3479_v7, %v7232_v2  ;;  %v8163_v7 = vld [vmem:[#allocation34_spill] sm:$0xff] }
 0x473   : > { %v3641_v12 = vmul.f32 %v7419_v0, %v3598_v22  ;;  %v3599_v13 = vadd.f32 %v3471_v43, %v8162_v55  ;;  %v7452_v62 = vpop.f32.mrb[204].mxu0  ;;  %v3752_v30 = vpack.c.bf16 %v3717_v10, %v3716_v40 }
 0x474   : > { %v3644_v35 = vmul.f32 %v7419_v0, %v3601_v28  ;;  %v3372_v45 = vpop.f32.mrb[205].mxu0  ;;  %v3686_v29 = vadd.f32 %v7424_v3, %v3643_v36 }
 0x475   : > { %v3642_v17 = vmul.f32 %v7419_v0, %v3599_v13  ;;  %v7457_v5 = vpop.f32.mrb[206].mxu0  ;;  %v5077_v49 = vpop.f32.mrb[152].mxu1  ;;  %5119 = vmatprep.mubr.bf16.mxu1 %v3752_v30  ;;  %v3684_v2 = vadd.f32 %v7424_v3, %v3641_v12  ;;  %v8164_v12 = vld [vmem:[#allocation31_spill] sm:$0xff] }
 0x476   : > { %v3492_v11 = vadd.f32 %v5077_v49, %v7354_v14  ;;  %v3375_v48 = vpop.f32.mrb[207].mxu0  ;;  %v3483_v59 = vpop.f32.mrb[153].mxu1  ;;  %5120 = vmatmul.mubr.bf16.vlgmr.msra.gmra.mrb[180].mxu1 %v3753_v57  ;;  %v3687_v40 = vadd.f32 %v7424_v3, %v3644_v35  ;;  %v3722_v36 = vmax.f32 %v3686_v29, 0.0  ;;  %v8165_v35 = vld [vmem:[#allocation35_spill] sm:$0xff]  ;;  %v8166_v49 = vld [vmem:[#allocation33_spill] sm:$0xff] }
 0x477   : > { %v3484_v52 = vadd.f32 %v3483_v59, %v7342_v37  ;;  %v5078_v60 = vpop.f32.mrb[154].mxu1  ;;  %v3685_v34 = vadd.f32 %v7424_v3, %v3642_v17  ;;  %v3720_v13 = vmax.f32 %v3684_v2, 0.0 }
 0x478   : > { %v3604_v22 = vadd.f32 %v3492_v11, %v8163_v7  ;;  %v3495_v43 = vadd.f32 %v5078_v60, %v7356_v41  ;;  %v3486_v10 = vpop.f32.mrb[155].mxu1  ;;  %v3723_v28 = vmax.f32 %v3687_v40, 0.0 }
 0x479   : > { %v3602_v55 = vadd.f32 %v3484_v52, %v8164_v12  ;;  %v3487_v14 = vadd.f32 %v3486_v10, %v7344_v56  ;;  %v3721_v57 = vmax.f32 %v3685_v34, 0.0 }
 0x47a   : > { %v3647_v30 = vmul.f32 %v7419_v0, %v3604_v22  ;;  %v3605_v37 = vadd.f32 %v3495_v43, %v8165_v35  ;;  %v3755_v45 = vpack.c.bf16 %v3723_v28, %v3722_v36 }
 0x47b   : > { %v3645_v17 = vmul.f32 %v7419_v0, %v3602_v55  ;;  %v3603_v11 = vadd.f32 %v3487_v14, %v8166_v49  ;;  %v7472_v48 = vpop.f32.mrb[208].mxu0  ;;  %v3754_v41 = vpack.c.bf16 %v3721_v57, %v3720_v13 }
 0x47c   : > { %v3648_v29 = vmul.f32 %v7419_v0, %v3605_v37  ;;  %v3380_v59 = vpop.f32.mrb[209].mxu0  ;;  %v3690_v40 = vadd.f32 %v7424_v3, %v3647_v30  ;;  %v8167_v30 = vld [vmem:[#allocation38_spill] sm:$0xff] }
 0x47d   : > { %v3646_v56 = vmul.f32 %v7419_v0, %v3603_v11  ;;  %v7477_v2 = vpop.f32.mrb[210].mxu0  ;;  %v5081_v52 = vpop.f32.mrb[156].mxu1  ;;  %5123 = vmatprep.mubr.bf16.mxu1 %v3754_v41  ;;  %v3688_v60 = vadd.f32 %v7424_v3, %v3645_v17  ;;  %v8168_v41 = vld [vmem:[#allocation36_spill] sm:$0xff] }
 0x47e   : > { %v3508_v34 = vadd.f32 %v5081_v52, %v7378_v47  ;;  %v3383_v7 = vpop.f32.mrb[211].mxu0  ;;  %v3499_v22 = vpop.f32.mrb[157].mxu1  ;;  %5124 = vmatmul.mubr.bf16.gmra.mrb[184].mxu1 %v3755_v45  ;;  %v3691_v43 = vadd.f32 %v7424_v3, %v3648_v29  ;;  %v3726_v13 = vmax.f32 %v3690_v40, 0.0 }
 0x47f   : > { %v3500_v10 = vadd.f32 %v3499_v22, %v7366_v4  ;;  %v5082_v36 = vpop.f32.mrb[158].mxu1  ;;  %v3689_v28 = vadd.f32 %v7424_v3, %v3646_v56  ;;  %v3724_v37 = vmax.f32 %v3688_v60, 0.0 }
 0x480   : > { %v3608_v12 = vadd.f32 %v3508_v34, %v7288_v44  ;;  %v3511_v55 = vadd.f32 %v5082_v36, %v7380_v31  ;;  %v3502_v14 = vpop.f32.mrb[159].mxu1  ;;  %v3727_v57 = vmax.f32 %v3691_v43, 0.0 }
 0x481   : > { %v3606_v35 = vadd.f32 %v3500_v10, %v8167_v30  ;;  %v3503_v47 = vadd.f32 %v3502_v14, %v7368_v42  ;;  %v3725_v45 = vmax.f32 %v3689_v28, 0.0 }
 0x482   : > { %v3651_v17 = vmul.f32 %v7419_v0, %v3608_v12  ;;  %v3609_v4 = vadd.f32 %v3511_v55, %v7292_v1  ;;  %v3757_v49 = vpack.c.bf16 %v3727_v57, %v3726_v13 }
 0x483   : > { %v3649_v11 = vmul.f32 %v7419_v0, %v3606_v35  ;;  %v3607_v44 = vadd.f32 %v3503_v47, %v8168_v41  ;;  %v7492_v29 = vpop.f32.mrb[212].mxu0  ;;  %v3756_v31 = vpack.c.bf16 %v3725_v45, %v3724_v37 }
 0x484   : > { %v3652_v59 = vmul.f32 %v7419_v0, %v3609_v4  ;;  %v3388_v40 = vpop.f32.mrb[213].mxu0  ;;  %v3694_v56 = vadd.f32 %v7424_v3, %v3651_v17 }
 0x485   : > { %v3650_v42 = vmul.f32 %v7419_v0, %v3607_v44  ;;  %v7497_v52 = vpop.f32.mrb[214].mxu0  ;;  %v5085_v60 = vpop.f32.mrb[160].mxu1  ;;  %5127 = vmatprep.mubr.bf16.mxu1 %v3756_v31  ;;  %v3692_v1 = vadd.f32 %v7424_v3, %v3649_v11 }
 0x486   : > { %v3524_v34 = vadd.f32 %v5085_v60, %v7402_v19  ;;  %v3391_v7 = vpop.f32.mrb[215].mxu0  ;;  %v3515_v22 = vpop.f32.mrb[161].mxu1  ;;  %5128 = vmatmul.mubr.bf16.gmra.mrb[188].mxu1 %v3757_v49  ;;  %v3695_v43 = vadd.f32 %v7424_v3, %v3652_v59  ;;  %v3730_v13 = vmax.f32 %v3694_v56, 0.0 }
 0x487   : > { %v3516_v10 = vadd.f32 %v3515_v22, %v7390_v53  ;;  %v5086_v36 = vpop.f32.mrb[162].mxu1  ;;  %v3693_v28 = vadd.f32 %v7424_v3, %v3650_v42  ;;  %v3728_v35 = vmax.f32 %v3692_v1, 0.0 }
 0x488   : > { %v3612_v12 = vadd.f32 %v3524_v34, %v7312_v20  ;;  %v3527_v55 = vadd.f32 %v5086_v36, %v7404_v24  ;;  %v3518_v14 = vpop.f32.mrb[163].mxu1  ;;  %v3731_v57 = vmax.f32 %v3695_v43, 0.0 }
 0x489   : > { %v3610_v30 = vadd.f32 %v3516_v10, %v7300_v33  ;;  %v3519_v19 = vadd.f32 %v3518_v14, %v7392_v51  ;;  %v3729_v47 = vmax.f32 %v3693_v28, 0.0 }
 0x48a   : > { %v3655_v37 = vmul.f32 %v7419_v0, %v3612_v12  ;;  %v3613_v53 = vadd.f32 %v3527_v55, %v7316_v63  ;;  %v3759_v45 = vpack.c.bf16 %v3731_v57, %v3730_v13 }
 0x48b   : > { %v3653_v17 = vmul.f32 %v7419_v0, %v3610_v30  ;;  %v3611_v20 = vadd.f32 %v3519_v19, %v7304_v6  ;;  %v7512_v4 = vpop.f32.mrb[216].mxu0  ;;  %v3758_v24 = vpack.c.bf16 %v3729_v47, %v3728_v35 }
 0x48c   : > { %v3656_v49 = vmul.f32 %v7419_v0, %v3613_v53  ;;  %v3396_v11 = vpop.f32.mrb[217].mxu0  ;;  %v3698_v33 = vadd.f32 %v7424_v3, %v3655_v37 }
 0x48d   : > { %v3654_v51 = vmul.f32 %v7419_v0, %v3611_v20  ;;  %v7517_v41 = vpop.f32.mrb[218].mxu0  ;;  %v5089_v44 = vpop.f32.mrb[164].mxu1  ;;  %5131 = vmatprep.mubr.bf16.mxu1 %v3758_v24  ;;  %v3696_v63 = vadd.f32 %v7424_v3, %v3653_v17 }
 0x48e   : > { %v3540_v31 = vadd.f32 %v5089_v44, %v7432_v25  ;;  %v3399_v59 = vpop.f32.mrb[219].mxu0  ;;  %v3531_v6 = vpop.f32.mrb[165].mxu1  ;;  %5132 = vmatmul.mubr.bf16.gmra.mrb[192].mxu1 %v3759_v45  ;;  %v3699_v40 = vadd.f32 %v7424_v3, %v3656_v49  ;;  %v3734_v22 = vmax.f32 %v3698_v33, 0.0 }
 0x48f   : > { %v3532_v56 = vadd.f32 %v3531_v6, %v7414_v21  ;;  %v5090_v42 = vpop.f32.mrb[166].mxu1  ;;  %v3697_v60 = vadd.f32 %v7424_v3, %v3654_v51  ;;  %v3732_v36 = vmax.f32 %v3696_v63, 0.0 }
 0x490   : > { %v3616_v1 = vadd.f32 %v3540_v31, %v7336_v54  ;;  %v3543_v34 = vadd.f32 %v5090_v42, %v7437_v58  ;;  %v3534_v7 = vpop.f32.mrb[167].mxu1  ;;  %v3735_v43 = vmax.f32 %v3699_v40, 0.0 }
 0x491   : > { %v3614_v10 = vadd.f32 %v3532_v56, %v7324_v61  ;;  %v3535_v25 = vadd.f32 %v3534_v7, %v7416_v38  ;;  %v3733_v28 = vmax.f32 %v3697_v60, 0.0 }
 0x492   : > { %v3659_v12 = vmul.f32 %v7419_v0, %v3616_v1  ;;  %v3617_v21 = vadd.f32 %v3543_v34, %v7340_v15  ;;  %v3761_v55 = vpack.c.bf16 %v3735_v43, %v3734_v22 }
 0x493   : > { %v3657_v14 = vmul.f32 %v7419_v0, %v3614_v10  ;;  %v3615_v54 = vadd.f32 %v3535_v25, %v7328_v50  ;;  %v7532_v13 = vpop.f32.mrb[220].mxu0  ;;  %v3760_v58 = vpack.c.bf16 %v3733_v28, %v3732_v36 }
 0x494   : > { %v3660_v57 = vmul.f32 %v7419_v0, %v3617_v21  ;;  %v3404_v30 = vpop.f32.mrb[221].mxu0  ;;  %v3702_v61 = vadd.f32 %v7424_v3, %v3659_v12 }
 0x495   : > { %v3658_v38 = vmul.f32 %v7419_v0, %v3615_v54  ;;  %v7537_v19 = vpop.f32.mrb[222].mxu0  ;;  %v5093_v35 = vpop.f32.mrb[168].mxu1  ;;  %5135 = vmatprep.mubr.bf16.mxu1 %v3760_v58  ;;  %v3700_v15 = vadd.f32 %v7424_v3, %v3657_v14 }
 0x496   : > { %v3556_v47 = vadd.f32 %v5093_v35, %v7472_v48  ;;  %v3407_v37 = vpop.f32.mrb[223].mxu0  ;;  %v3547_v50 = vpop.f32.mrb[169].mxu1  ;;  %5136 = vmatmul.mubr.bf16.gmra.mrb[196].mxu1 %v3761_v55  ;;  %v3703_v53 = vadd.f32 %v7424_v3, %v3660_v57  ;;  %v3738_v33 = vmax.f32 %v3702_v61, 0.0 }
 0x497   : > { %v3548_v45 = vadd.f32 %v3547_v50, %v7452_v62  ;;  %v5094_v17 = vpop.f32.mrb[170].mxu1  ;;  %v3701_v20 = vadd.f32 %v7424_v3, %v3658_v38  ;;  %v3736_v63 = vmax.f32 %v3700_v15, 0.0 }
 0x498   : > { %v3620_v24 = vadd.f32 %v3556_v47, %v7360_v32  ;;  %v3559_v49 = vadd.f32 %v5094_v17, %v7477_v2  ;;  %v3550_v11 = vpop.f32.mrb[171].mxu1  ;;  %v3739_v51 = vmax.f32 %v3703_v53, 0.0 }
 0x499   : > { %v3618_v44 = vadd.f32 %v3548_v45, %v7348_v39  ;;  %v3551_v48 = vadd.f32 %v3550_v11, %v7457_v5  ;;  %v3737_v31 = vmax.f32 %v3701_v20, 0.0 }
 0x49a   : > { %v3663_v59 = vmul.f32 %v7419_v0, %v3620_v24  ;;  %v3621_v62 = vadd.f32 %v3559_v49, %v7364_v9  ;;  %v3763_v6 = vpack.c.bf16 %v3739_v51, %v3738_v33 }
 0x49b   : > { %v3661_v40 = vmul.f32 %v7419_v0, %v3618_v44  ;;  %v3619_v32 = vadd.f32 %v3551_v48, %v7352_v23  ;;  %v3410_v56 = vpop.f32.mrb[224].mxu0  ;;  %v3762_v2 = vpack.c.bf16 %v3737_v31, %v3736_v63  ;;  %v8169_v31 = vld [vmem:[#allocation39_spill] sm:$0xff] }
 0x49c   : > { %v3664_v42 = vmul.f32 %v7419_v0, %v3621_v62  ;;  %v3412_v60 = vpop.f32.mrb[225].mxu0  ;;  %v3706_v39 = vadd.f32 %v7424_v3, %v3663_v59 }
 0x49d   : > { %v3662_v5 = vmul.f32 %v7419_v0, %v3619_v32  ;;  %v3413_v1 = vpop.f32.mrb[226].mxu0  ;;  %v5097_v34 = vpop.f32.mrb[172].mxu1  ;;  %5139 = vmatprep.mubr.bf16.mxu1 %v3762_v2  ;;  %v3704_v7 = vadd.f32 %v7424_v3, %v3661_v40 }
 0x49e   : > { %v3572_v9 = vadd.f32 %v5097_v34, %v7512_v4  ;;  %v3415_v22 = vpop.f32.mrb[227].mxu0  ;;  %v3563_v43 = vpop.f32.mrb[173].mxu1  ;;  %5140 = vmatmul.mubr.bf16.gmra.mrb[200].mxu1 %v3763_v6  ;;  %v3707_v23 = vadd.f32 %v7424_v3, %v3664_v42  ;;  %v3742_v55 = vmax.f32 %v3706_v39, 0.0  ;;  %v8170_v6 = vld [vmem:[#allocation37_spill] sm:$0xff] }
 0x49f   : > { %v3564_v10 = vadd.f32 %v3563_v43, %v7492_v29  ;;  %v5098_v25 = vpop.f32.mrb[174].mxu1  ;;  %v3705_v36 = vadd.f32 %v7424_v3, %v3662_v5  ;;  %v3740_v58 = vmax.f32 %v3704_v7, 0.0  ;;  %v5449_v22 = vld [vmem:[%s6280_s15 + $0x10] sm:$0xff]  }
 0x4a0   : > { %v3624_v28 = vadd.f32 %v3572_v9, %v7384_v46  ;;  %v3575_v12 = vadd.f32 %v5098_v25, %v7517_v41  ;;  %v3566_v21 = vpop.f32.mrb[175].mxu1  ;;  %v3743_v14 = vmax.f32 %v3707_v23, 0.0  ;;  %v4100_v43 = vunpack.c.h.bf16 %v5449_v22  ;;  %v7591_v23 = vld [vmem:[%s6280_s15 + $0x8] sm:$0xff]  }
 0x4a1   : > { %v3622_v54 = vadd.f32 %v3564_v10, %v7372_v18  ;;  %v3567_v4 = vadd.f32 %v3566_v21, %v7497_v52  ;;  %v3741_v57 = vmax.f32 %v3705_v36, 0.0  ;;  %v4098_v10 = vunpack.c.h.bf16 %v7591_v23  ;;  %v5451_v21 = vld [vmem:[%s6280_s15 + $0x28] sm:$0xff]  }
 0x4a2   : > { %v3667_v30 = vmul.f32 %v7419_v0, %v3624_v28  ;;  %v3625_v29 = vadd.f32 %v3575_v12, %v7388_v8  ;;  %v3765_v61 = vpack.c.bf16 %v3743_v14, %v3742_v55  ;;  %v4099_v25 = vunpack.c.l.bf16 %v5449_v22 }
 0x4a3   : > { %v3665_v38 = vmul.f32 %v7419_v0, %v3622_v54  ;;  %v3623_v46 = vadd.f32 %v3567_v4, %v7376_v26  ;;  %v3764_v35 = vpack.c.bf16 %v3741_v57, %v3740_v58  ;;  %v7596_v36 = vrot.slane %v4100_v43, 3  ;;  %v5452_v4 = vld [vmem:[%s6280_s15 + $0x20] sm:$0xff]  }
 0x4a4   : > { %v3668_v41 = vmul.f32 %v7419_v0, %v3625_v29  ;;  %v3710_v15 = vadd.f32 %v7424_v3, %v3667_v30  ;;  %v7598_v28 = vrot.slane %v4098_v10, 3  ;;  %v7600_v12 = vrot.slane %v4099_v25, 3 }
 0x4a5   : > { %v3666_v18 = vmul.f32 %v7419_v0, %v3623_v46  ;;  %v5101_v47 = vpop.f32.mrb[176].mxu1  ;;  %5143 = vmatprep.mubr.bf16.mxu1 %v3764_v35  ;;  %v3708_v52 = vadd.f32 %v7424_v3, %v3665_v38  ;;  %v4105_v55 = vunpack.c.l.bf16 %v5451_v21  ;;  %v4104_v58 = vunpack.c.h.bf16 %v5452_v4  ;;  %v5453_v35 = vld [vmem:[%s6280_s15 + $0x38] sm:$0xff]  }
 0x4a6   : > { %v3588_v37 = vadd.f32 %v5101_v47, %v3410_v56  ;;  %v3579_v50 = vpop.f32.mrb[177].mxu1  ;;  %5144 = vmatmul.mubr.bf16.gmra.mrb[204].mxu1 %v3765_v61  ;;  %v3711_v8 = vadd.f32 %v7424_v3, %v3668_v41  ;;  %v3746_v49 = vmax.f32 %v3710_v15, 0.0  ;;  %v7611_v54 = vsel %vm4171_vm4, %v7598_v28, %v7600_v12  ;;  %v5454_v47 = vld [vmem:[%s6280_s15 + $0x30] sm:$0xff]  }
 0x4a7   : > { %v3580_v53 = vadd.f32 %v3579_v50, %v7532_v13  ;;  %v5102_v45 = vpop.f32.mrb[178].mxu1  ;;  %v3709_v26 = vadd.f32 %v7424_v3, %v3666_v18  ;;  %v3744_v44 = vmax.f32 %v3708_v52, 0.0  ;;  %v4103_v30 = vunpack.c.l.bf16 %v5452_v4 }
 0x4a8   : > { %v3628_v17 = vadd.f32 %v3588_v37, %v7408_v16  ;;  %v3591_v20 = vadd.f32 %v5102_v45, %v3413_v1  ;;  %v3582_v24 = vpop.f32.mrb[179].mxu1  ;;  %v3747_v11 = vmax.f32 %v3711_v8, 0.0  ;;  %v7614_v29 = vrot.slane %v4105_v55, 3  ;;  %v5461_v55 = vld [vmem:[%s6280_s15 + $0x78] sm:$0xff]  }
 0x4a9   : > { %v3626_v33 = vadd.f32 %v3580_v53, %v7396_v27  ;;  %v3583_v51 = vadd.f32 %v3582_v24, %v7537_v19  ;;  %v3745_v48 = vmax.f32 %v3709_v26, 0.0  ;;  %v7616_v61 = vrot.slane %v4104_v58, 3 }
 0x4aa   : > { %v3671_v63 = vmul.f32 %v7419_v0, %v3628_v17  ;;  %v3629_v59 = vadd.f32 %v3591_v20, %v8169_v31  ;;  %v3767_v13 = vpack.c.bf16 %v3747_v11, %v3746_v49  ;;  %v7620_v46 = vrot.slane %v4103_v30, 3  ;;  %v5455_v17 = vld [vmem:[%s6280_s15 + $0x48] sm:$0xff]   ;;  %v5456_v11 = vld [vmem:[%s6280_s15 + $0x40] sm:$0xff]   ;;  %v5462_v30 = vld [vmem:[%s6280_s15 + $0x70] sm:$0xff]  }
 0x4ab   : > { %v3669_v62 = vmul.f32 %v7419_v0, %v3626_v33  ;;  %v3627_v40 = vadd.f32 %v3583_v51, %v8170_v6  ;;  %v3766_v16 = vpack.c.bf16 %v3745_v48, %v3744_v44  ;;  %v4109_v41 = vunpack.c.l.bf16 %v5453_v35 }
 0x4ac   : > { %v3672_v32 = vmul.f32 %v7419_v0, %v3629_v59  ;;  %v3714_v56 = vadd.f32 %v7424_v3, %v3671_v63  ;;  %v7626_v15 = vsel %vm4171_vm4, %v7616_v61, %v7614_v29  ;;  %v4108_v52 = vunpack.c.h.bf16 %v5454_v47 }
 0x4ad   : > { %v3670_v27 = vmul.f32 %v7419_v0, %v3627_v40  ;;  %5147 = vmatprep.mubr.bf16.mxu1 %v3766_v16  ;;  %v3712_v19 = vadd.f32 %v7424_v3, %v3669_v62  ;;  %v5448_v0 = vld [vmem:[%s6280_s15 + $0x18] sm:$0xff]   ;;  %v4106_v37 = vunpack.c.h.bf16 %v5451_v21  ;;  %v4107_v50 = vunpack.c.l.bf16 %v5454_v47  ;;  %v5458_v16 = vld [vmem:[%s6280_s15 + $0x50] sm:$0xff]  }
 0x4ae   : > { %5148 = vmatmul.mubr.bf16.gmra.mrb[208].mxu1 %v3767_v13  ;;  %v3715_v2 = vadd.f32 %v7424_v3, %v3672_v32  ;;  %v3750_v60 = vmax.f32 %v3714_v56, 0.0  ;;  %v4101_v9 = vunpack.c.l.bf16 %v5448_v0  ;;  %v4102_v57 = vunpack.c.h.bf16 %v5448_v0  ;;  %v5457_v13 = vld [vmem:[%s6280_s15 + $0x58] sm:$0xff]  }
 0x4af   : > { %v3713_v42 = vadd.f32 %v7424_v3, %v3670_v27  ;;  %v3748_v5 = vmax.f32 %v3712_v19, 0.0  ;;  %v7634_v8 = vrot.slane %v4109_v41, 3  ;;  %v7636_v53 = vrot.slane %v4108_v52, 3 }
 0x4b0   : > { %v3751_v39 = vmax.f32 %v3715_v2, 0.0  ;;  %v7594_v3 = vrot.slane %v4101_v9, 3  ;;  %v7618_v38 = vrot.slane %v4102_v57, 3  ;;  %v7638_v45 = vrot.slane %v4106_v37, 3 }
 0x4b1   : > { %v3749_v1 = vmax.f32 %v3713_v42, 0.0  ;;  %v7640_v26 = vrot.slane %v4107_v50, 3  ;;  %v4113_v20 = vunpack.c.l.bf16 %v5455_v17  ;;  %v7646_v24 = vsel %vm4171_vm4, %v7636_v53, %v7634_v8 }
 0x4b2   : > { %v3769_v34 = vpack.c.bf16 %v3751_v39, %v3750_v60  ;;  %v7606_v14 = vsel %vm4171_vm4, %v7596_v36, %v7594_v3  ;;  %v7631_v18 = vsel %vm4171_vm4, %v7618_v38, %v7620_v46  ;;  %v4112_v33 = vunpack.c.h.bf16 %v5456_v11  ;;  %v5459_v39 = vld [vmem:[%s6280_s15 + $0x68] sm:$0xff]  }
 0x4b3   : > { %v3768_v7 = vpack.c.bf16 %v3749_v1, %v3748_v5  ;;  %v7651_v49 = vsel %vm4171_vm4, %v7638_v45, %v7640_v26  ;;  %v4110_v51 = vunpack.c.h.bf16 %v5453_v35  ;;  %v4111_v44 = vunpack.c.l.bf16 %v5456_v11 }
 0x4b4   : > { %v7654_v48 = vrot.slane %v4113_v20, 3  ;;  %v7656_v63 = vrot.slane %v4112_v33, 3  ;;  %v4117_v62 = vunpack.c.l.bf16 %v5457_v13  ;;  %v4116_v32 = vunpack.c.h.bf16 %v5458_v16  ;;  %v5463_v20 = vld [vmem:[%s6280_s15 + $0x88] sm:$0xff]  }
 0x4b5   : > { %5151 = vmatprep.mubr.bf16.mxu1 %v3768_v7  ;;  %v7658_v31 = vrot.slane %v4110_v51, 3  ;;  %v7660_v59 = vrot.slane %v4111_v44, 3  ;;  %v4114_v56 = vunpack.c.h.bf16 %v5455_v17  ;;  %v4115_v27 = vunpack.c.l.bf16 %v5458_v16  ;;  %v5460_v7 = vld [vmem:[%s6280_s15 + $0x60] sm:$0xff]  }
 0x4b6   : > { %5152 = vmatmul.mubr.bf16.gmra.mrb[212].mxu1 %v3769_v34  ;;  %v7666_v6 = vsel %vm4171_vm4, %v7656_v63, %v7654_v48  ;;  %v7674_v19 = vrot.slane %v4117_v62, 3  ;;  %v7676_v2 = vrot.slane %v4116_v32, 3  ;;  %v4121_v5 = vunpack.c.l.bf16 %v5459_v39  ;;  %v5464_v44 = vld [vmem:[%s6280_s15 + $0x80] sm:$0xff]  }
 0x4b7   : > { %v7671_v40 = vsel %vm4171_vm4, %v7658_v31, %v7660_v59  ;;  %v7678_v42 = vrot.slane %v4114_v56, 3  ;;  %v7680_v60 = vrot.slane %v4115_v27, 3  ;;  %v4120_v0 = vunpack.c.h.bf16 %v5460_v7 }
 0x4b8   : > { %v7686_v1 = vsel %vm4171_vm4, %v7676_v2, %v7674_v19  ;;  %v4118_v9 = vunpack.c.h.bf16 %v5457_v13  ;;  %v4119_v22 = vunpack.c.l.bf16 %v5460_v7  ;;  %v7694_v43 = vrot.slane %v4121_v5, 3  ;;  %v5465_v5 = vld [vmem:[%s6280_s15 + $0x98] sm:$0xff]  }
 0x4b9   : > { %v7691_v34 = vsel %vm4171_vm4, %v7678_v42, %v7680_v60  ;;  %v7696_v10 = vrot.slane %v4120_v0, 3  ;;  %v4125_v4 = vunpack.c.l.bf16 %v5461_v55  ;;  %v4124_v35 = vunpack.c.h.bf16 %v5462_v30 }
 0x4ba   : > { %v7698_v25 = vrot.slane %v4118_v9, 3  ;;  %v7700_v21 = vrot.slane %v4119_v22, 3  ;;  %v4122_v41 = vunpack.c.h.bf16 %v5459_v39  ;;  %v4123_v47 = vunpack.c.l.bf16 %v5462_v30  ;;  %v5466_v22 = vld [vmem:[%s6280_s15 + $0x90] sm:$0xff]  }
 0x4bb   : > { %v7706_v58 = vsel %vm4171_vm4, %v7696_v10, %v7694_v43  ;;  %v7714_v52 = vrot.slane %v4125_v4, 3  ;;  %v7716_v37 = vrot.slane %v4124_v35, 3  ;;  %v4129_v11 = vunpack.c.l.bf16 %v5463_v20 }
 0x4bc   : > { %v7711_v57 = vsel %vm4171_vm4, %v7698_v25, %v7700_v21  ;;  %v7718_v50 = vrot.slane %v4122_v41, 3  ;;  %v7720_v17 = vrot.slane %v4123_v47, 3  ;;  %v4128_v13 = vunpack.c.h.bf16 %v5464_v44 }
 0x4bd   : > { %v7726_v33 = vsel %vm4171_vm4, %v7716_v37, %v7714_v52  ;;  %v4126_v62 = vunpack.c.h.bf16 %v5461_v55  ;;  %v4127_v16 = vunpack.c.l.bf16 %v5464_v44  ;;  %v7734_v32 = vrot.slane %v4129_v11, 3 }
 0x4be   : > { %v7731_v51 = vsel %vm4171_vm4, %v7718_v50, %v7720_v17  ;;  %v7736_v56 = vrot.slane %v4128_v13, 3  ;;  %v4133_v7 = vunpack.c.l.bf16 %v5465_v5  ;;  %v4132_v55 = vunpack.c.h.bf16 %v5466_v22 }
 0x4bf   : > { %8171 = vst [vmem:[#allocation40_spill] sm:$0xff] %v7734_v32  ;;  %v7738_v27 = vrot.slane %v4126_v62, 3  ;;  %v7740_v39 = vrot.slane %v4127_v16, 3  ;;  %v4130_v4 = vunpack.c.h.bf16 %v5463_v20  ;;  %v4131_v30 = vunpack.c.l.bf16 %v5466_v22  ;;  %v7770_v20 = vld [vmem:[#allocation17] ss:$0 sm:$0xff] }
 0x4c0   : > { %v7746_v0 = vsel %vm4171_vm4, %v7736_v56, %v7734_v32  ;;  %v4243_v35 = vrot.slane %v4133_v7, 3  ;;  %v7754_v41 = vrot.slane %v4132_v55, 3  ;;  %v4097_v62 = vunpack.c.l.bf16 %v7591_v23  ;;  %v7772_v7 = vld [vmem:[#allocation19] ss:$0 sm:$0xff] }
 0x4c1   : > { %v7751_v9 = vsel %vm4171_vm4, %v7738_v27, %v7740_v39  ;;  %v7756_v47 = vrot.slane %v4130_v4, 3  ;;  %v7758_v11 = vrot.slane %v4131_v30, 3  ;;  %v4178_v4 = vsel %vm4171_vm4, %v7600_v12, %v7596_v36 }
 0x4c2   : > { %8172 = vst [vmem:[#allocation43_spill] sm:$0xff] %v7751_v9  ;;  %8173 = vst [vmem:[#allocation41_spill] sm:$0xff] %v7754_v41  ;;  %v7762_v44 = vsel %vm4171_vm4, %v7754_v41, %v4243_v35  ;;  %v4172_v16 = vrot.slane %v4097_v62, 3 }
 0x4c3   : > { %8174 = vst [vmem:[#allocation42_spill] sm:$0xff] %v7756_v47  ;;  %8175 = vst [vmem:[#allocation46_spill] sm:$0xff] %v7758_v11  ;;  %v7767_v13 = vsel %vm4171_vm4, %v7756_v47, %v7758_v11 }
 0x4c4   : > { %8176 = vst [vmem:[#allocation44_spill] sm:$0xff] %v7762_v44  ;;  %8177 = vst [vmem:[#allocation45_spill] sm:$0xff] %v7767_v13  ;;  %v4174_v23 = vsel %vm4171_vm4, %v4172_v16, %v7598_v28 }
 0x549   : > { %v5121_v5 = vpop.f32.mrb[180].mxu1 }
 0x54a   : > { %v4020_v22 = vmul.f32 %v5121_v5, %v7770_v20  ;;  %v3868_v55 = vpop.f32.mrb[181].mxu1 }
 0x54b   : > { %v4018_v30 = vmul.f32 %v7770_v20, %v3868_v55  ;;  %v5122_v35 = vpop.f32.mrb[182].mxu1 }
 0x54c   : > { %v4063_v13 = vadd.f32 %v7772_v7, %v4020_v22  ;;  %v4021_v62 = vmul.f32 %v5122_v35, %v7770_v20  ;;  %v3871_v44 = vpop.f32.mrb[183].mxu1 }
 0x54d   : > { %v4061_v32 = vadd.f32 %v7772_v7, %v4018_v30  ;;  %v4019_v5 = vmul.f32 %v7770_v20, %v3871_v44 }
 0x54e   : > { %v4283_v47 = vadd.f32 %v4178_v4, %v4063_v13  ;;  %v4064_v11 = vadd.f32 %v7772_v7, %v4021_v62 }
 0x54f   : > { %v4281_v41 = vadd.f32 %v4174_v23, %v4061_v32  ;;  %v4062_v36 = vadd.f32 %v7772_v7, %v4019_v5 }
 0x550   : > { %v4319_v12 = vmax.f32 %v4283_v47, 0.0  ;;  %v4284_v55 = vadd.f32 %v7606_v14, %v4064_v11  ;;  %v4186_v14 = vsel %vm4171_vm4, %v7620_v46, %v7616_v61  ;;  %v4182_v11 = vsel %vm4171_vm4, %v7594_v3, %v7618_v38 }
 0x551   : > { %v4317_v22 = vmax.f32 %v4281_v41, 0.0  ;;  %v4282_v9 = vadd.f32 %v7611_v54, %v4062_v36  ;;  %v5125_v28 = vpop.f32.mrb[184].mxu1 }
 0x552   : > { %4355 = vst [vmem:[%s7790_s25 + $0x10] sm:$0xff] %v4319_v12  ;;  %v4320_v44 = vmax.f32 %v4284_v55, 0.0  ;;  %v4024_v13 = vmul.f32 %v5125_v28, %v7770_v20  ;;  %v3884_v32 = vpop.f32.mrb[185].mxu1 }
 0x553   : > { %4353 = vst [vmem:[%s7790_s25] sm:$0xff] %v4317_v22  ;;  %v4318_v16 = vmax.f32 %v4282_v9, 0.0  ;;  %v4022_v54 = vmul.f32 %v7770_v20, %v3884_v32  ;;  %v5126_v41 = vpop.f32.mrb[186].mxu1 }
 0x554   : > { %4356 = vst [vmem:[%s7790_s25 + $0x18] sm:$0xff] %v4320_v44  ;;  %v4067_v47 = vadd.f32 %v7772_v7, %v4024_v13  ;;  %v4025_v4 = vmul.f32 %v5126_v41, %v7770_v20  ;;  %v3887_v30 = vpop.f32.mrb[187].mxu1  ;;  %v4194_v13 = vsel %vm4171_vm4, %v7640_v26, %v7636_v53 }
 0x555   : > { %4354 = vst [vmem:[%s7790_s25 + $0x8] sm:$0xff] %v4318_v16  ;;  %v4065_v9 = vadd.f32 %v7772_v7, %v4022_v54  ;;  %v4023_v61 = vmul.f32 %v7770_v20, %v3887_v30 }
 0x556   : > { %v4287_v46 = vadd.f32 %v4186_v14, %v4067_v47  ;;  %v4068_v35 = vadd.f32 %v7772_v7, %v4025_v4 }
 0x557   : > { %v4285_v23 = vadd.f32 %v4182_v11, %v4065_v9  ;;  %v4066_v62 = vadd.f32 %v7772_v7, %v4023_v61 }
 0x558   : > { %v4323_v5 = vmax.f32 %v4287_v46, 0.0  ;;  %v4288_v36 = vadd.f32 %v7626_v15, %v4068_v35 }
 0x559   : > { %v4321_v3 = vmax.f32 %v4285_v23, 0.0  ;;  %v4286_v38 = vadd.f32 %v7631_v18, %v4066_v62  ;;  %v5129_v12 = vpop.f32.mrb[188].mxu1  ;;  %v4190_v18 = vsel %vm4171_vm4, %v7614_v29, %v7638_v45 }
 0x55a   : > { %4359 = vst [vmem:[%s7790_s25 + $0x30] sm:$0xff] %v4323_v5  ;;  %v4324_v55 = vmax.f32 %v4288_v36, 0.0  ;;  %v4028_v22 = vmul.f32 %v5129_v12, %v7770_v20  ;;  %v3900_v28 = vpop.f32.mrb[189].mxu1  ;;  %v4202_v5 = vsel %vm4171_vm4, %v7660_v59, %v7656_v63 }
 0x55b   : > { %4357 = vst [vmem:[%s7790_s25 + $0x20] sm:$0xff] %v4321_v3  ;;  %v4322_v44 = vmax.f32 %v4286_v38, 0.0  ;;  %v4026_v32 = vmul.f32 %v7770_v20, %v3900_v28  ;;  %v5130_v16 = vpop.f32.mrb[190].mxu1 }
 0x55c   : > { %4360 = vst [vmem:[%s7790_s25 + $0x38] sm:$0xff] %v4324_v55  ;;  %v4071_v15 = vadd.f32 %v7772_v7, %v4028_v22  ;;  %v4029_v14 = vmul.f32 %v5130_v16, %v7770_v20  ;;  %v3903_v54 = vpop.f32.mrb[191].mxu1 }
 0x55d   : > { %4358 = vst [vmem:[%s7790_s25 + $0x28] sm:$0xff] %v4322_v44  ;;  %v4069_v41 = vadd.f32 %v7772_v7, %v4026_v32  ;;  %v4027_v53 = vmul.f32 %v7770_v20, %v3903_v54 }
 0x55e   : > { %v4291_v26 = vadd.f32 %v4194_v13, %v4071_v15  ;;  %v4072_v47 = vadd.f32 %v7772_v7, %v4029_v14 }
 0x55f   : > { %v4289_v11 = vadd.f32 %v4190_v18, %v4069_v41  ;;  %v4070_v4 = vadd.f32 %v7772_v7, %v4027_v53  ;;  %v4210_v41 = vsel %vm4171_vm4, %v7680_v60, %v7676_v2 }
 0x560   : > { %v4327_v30 = vmax.f32 %v4291_v26, 0.0  ;;  %v4292_v9 = vadd.f32 %v7646_v24, %v4072_v47 }
 0x561   : > { %v4325_v29 = vmax.f32 %v4289_v11, 0.0  ;;  %v4290_v45 = vadd.f32 %v7651_v49, %v4070_v4  ;;  %v5133_v61 = vpop.f32.mrb[192].mxu1  ;;  %v4198_v49 = vsel %vm4171_vm4, %v7634_v8, %v7658_v31 }
 0x562   : > { %4363 = vst [vmem:[%s7790_s25 + $0x50] sm:$0xff] %v4327_v30  ;;  %v4328_v46 = vmax.f32 %v4292_v9, 0.0  ;;  %v4032_v35 = vmul.f32 %v5133_v61, %v7770_v20  ;;  %v3916_v23 = vpop.f32.mrb[193].mxu1 }
 0x563   : > { %4361 = vst [vmem:[%s7790_s25 + $0x40] sm:$0xff] %v4325_v29  ;;  %v4326_v62 = vmax.f32 %v4290_v45, 0.0  ;;  %v4030_v36 = vmul.f32 %v7770_v20, %v3916_v23  ;;  %v5134_v3 = vpop.f32.mrb[194].mxu1 }
 0x564   : > { %4364 = vst [vmem:[%s7790_s25 + $0x58] sm:$0xff] %v4328_v46  ;;  %v4075_v24 = vadd.f32 %v7772_v7, %v4032_v35  ;;  %v4033_v38 = vmul.f32 %v5134_v3, %v7770_v20  ;;  %v3919_v12 = vpop.f32.mrb[195].mxu1 }
 0x565   : > { %4362 = vst [vmem:[%s7790_s25 + $0x48] sm:$0xff] %v4326_v62  ;;  %v4073_v55 = vadd.f32 %v7772_v7, %v4030_v36  ;;  %v4031_v63 = vmul.f32 %v7770_v20, %v3919_v12  ;;  %v4218_v36 = vsel %vm4171_vm4, %v7700_v21, %v7696_v10 }
 0x566   : > { %v4295_v59 = vadd.f32 %v4202_v5, %v4075_v24  ;;  %v4076_v22 = vadd.f32 %v7772_v7, %v4033_v38 }
 0x567   : > { %v4293_v28 = vadd.f32 %v4198_v49, %v4073_v55  ;;  %v4074_v44 = vadd.f32 %v7772_v7, %v4031_v63 }
 0x568   : > { %v4331_v13 = vmax.f32 %v4295_v59, 0.0  ;;  %v4296_v32 = vadd.f32 %v7666_v6, %v4076_v22 }
 0x569   : > { %v4329_v8 = vmax.f32 %v4293_v28, 0.0  ;;  %v4294_v31 = vadd.f32 %v7671_v40, %v4074_v44  ;;  %v5137_v16 = vpop.f32.mrb[196].mxu1  ;;  %v4206_v40 = vsel %vm4171_vm4, %v7654_v48, %v7678_v42 }
 0x56a   : > { %4367 = vst [vmem:[%s7790_s25 + $0x70] sm:$0xff] %v4331_v13  ;;  %v4332_v15 = vmax.f32 %v4296_v32, 0.0  ;;  %v4036_v18 = vmul.f32 %v5137_v16, %v7770_v20  ;;  %v3932_v14 = vpop.f32.mrb[197].mxu1  ;;  %v4226_v16 = vsel %vm4171_vm4, %v7720_v17, %v7716_v37 }
 0x56b   : > { %4365 = vst [vmem:[%s7790_s25 + $0x60] sm:$0xff] %v4329_v8  ;;  %v4330_v54 = vmax.f32 %v4294_v31, 0.0  ;;  %v4034_v53 = vmul.f32 %v7770_v20, %v3932_v14  ;;  %v5138_v26 = vpop.f32.mrb[198].mxu1 }
 0x56c   : > { %4368 = vst [vmem:[%s7790_s25 + $0x78] sm:$0xff] %v4332_v15  ;;  %v4079_v6 = vadd.f32 %v7772_v7, %v4036_v18  ;;  %v4037_v47 = vmul.f32 %v5138_v26, %v7770_v20  ;;  %v3935_v11 = vpop.f32.mrb[199].mxu1 }
 0x56d   : > { %4366 = vst [vmem:[%s7790_s25 + $0x68] sm:$0xff] %v4330_v54  ;;  %v4077_v4 = vadd.f32 %v7772_v7, %v4034_v53  ;;  %v4035_v2 = vmul.f32 %v7770_v20, %v3935_v11 }
 0x56e   : > { %v4299_v60 = vadd.f32 %v4210_v41, %v4079_v6  ;;  %v4080_v30 = vadd.f32 %v7772_v7, %v4037_v47 }
 0x56f   : > { %v4297_v9 = vadd.f32 %v4206_v40, %v4077_v4  ;;  %v4078_v29 = vadd.f32 %v7772_v7, %v4035_v2 }
 0x570   : > { %v4335_v45 = vmax.f32 %v4299_v60, 0.0  ;;  %v4300_v61 = vadd.f32 %v7686_v1, %v4080_v30 }
 0x571   : > { %v4333_v48 = vmax.f32 %v4297_v9, 0.0  ;;  %v4298_v42 = vadd.f32 %v7691_v34, %v4078_v29  ;;  %v5141_v46 = vpop.f32.mrb[200].mxu1  ;;  %v4214_v34 = vsel %vm4171_vm4, %v7674_v19, %v7698_v25  ;;  %v4234_v9 = vsel %vm4171_vm4, %v7740_v39, %v7736_v56 }
 0x572   : > { %4371 = vst [vmem:[%s7790_s25 + $0x90] sm:$0xff] %v4335_v45  ;;  %v4336_v35 = vmax.f32 %v4300_v61, 0.0  ;;  %v4040_v23 = vmul.f32 %v5141_v46, %v7770_v20  ;;  %v3948_v62 = vpop.f32.mrb[201].mxu1 }
 0x573   : > { %4369 = vst [vmem:[%s7790_s25 + $0x80] sm:$0xff] %v4333_v48  ;;  %v4334_v5 = vmax.f32 %v4298_v42, 0.0  ;;  %v4038_v3 = vmul.f32 %v7770_v20, %v3948_v62  ;;  %v5142_v24 = vpop.f32.mrb[202].mxu1 }
 0x574   : > { %4372 = vst [vmem:[%s7790_s25 + $0x98] sm:$0xff] %v4336_v35  ;;  %v4083_v1 = vadd.f32 %v7772_v7, %v4040_v23  ;;  %v4041_v49 = vmul.f32 %v5142_v24, %v7770_v20  ;;  %v3951_v38 = vpop.f32.mrb[203].mxu1 }
 0x575   : > { %4370 = vst [vmem:[%s7790_s25 + $0x88] sm:$0xff] %v4334_v5  ;;  %v4081_v12 = vadd.f32 %v7772_v7, %v4038_v3  ;;  %v4039_v10 = vmul.f32 %v7770_v20, %v3951_v38  ;;  %v8179_v38 = vld [vmem:[#allocation41_spill] sm:$0xff] }
 0x576   : > { %v4303_v21 = vadd.f32 %v4218_v36, %v4083_v1  ;;  %v4084_v55 = vadd.f32 %v7772_v7, %v4041_v49 }
 0x577   : > { %v4301_v63 = vadd.f32 %v4214_v34, %v4081_v12  ;;  %v4082_v59 = vadd.f32 %v7772_v7, %v4039_v10  ;;  %v8180_v12 = vld [vmem:[#allocation46_spill] sm:$0xff] }
 0x578   : > { %v4339_v22 = vmax.f32 %v4303_v21, 0.0  ;;  %v4304_v28 = vadd.f32 %v7706_v58, %v4084_v55  ;;  %v4242_v10 = vsel %vm4171_vm4, %v8180_v12, %v8179_v38 }
 0x579   : > { %v4337_v19 = vmax.f32 %v4301_v63, 0.0  ;;  %v4302_v25 = vadd.f32 %v7711_v57, %v4082_v59  ;;  %v5145_v44 = vpop.f32.mrb[204].mxu1  ;;  %v4222_v57 = vsel %vm4171_vm4, %v7694_v43, %v7718_v50  ;;  %v8181_v63 = vld [vmem:[#allocation42_spill] sm:$0xff]  ;;  %v8182_v59 = vld [vmem:[#allocation40_spill] sm:$0xff] }
 0x57a   : > { %4375 = vst [vmem:[%s7790_s25 + $0xb0] sm:$0xff] %v4339_v22  ;;  %v4340_v13 = vmax.f32 %v4304_v28, 0.0  ;;  %v4044_v32 = vmul.f32 %v5145_v44, %v7770_v20  ;;  %v3964_v8 = vpop.f32.mrb[205].mxu1  ;;  %v4238_v22 = vsel %vm4171_vm4, %v8182_v59, %v8181_v63 }
 0x57b   : > { %4373 = vst [vmem:[%s7790_s25 + $0xa0] sm:$0xff] %v4337_v19  ;;  %v4338_v31 = vmax.f32 %v4302_v25, 0.0  ;;  %v4042_v15 = vmul.f32 %v7770_v20, %v3964_v8  ;;  %v5146_v18 = vpop.f32.mrb[206].mxu1 }
 0x57c   : > { %4376 = vst [vmem:[%s7790_s25 + $0xb8] sm:$0xff] %v4340_v13  ;;  %v4087_v58 = vadd.f32 %v7772_v7, %v4044_v32  ;;  %v4045_v14 = vmul.f32 %v5146_v18, %v7770_v20  ;;  %v3967_v54 = vpop.f32.mrb[207].mxu1 }
 0x57d   : > { %4374 = vst [vmem:[%s7790_s25 + $0xa8] sm:$0xff] %v4338_v31  ;;  %v4085_v41 = vadd.f32 %v7772_v7, %v4042_v15  ;;  %v4043_v37 = vmul.f32 %v7770_v20, %v3967_v54  ;;  %v8183_v15 = vld [vmem:[#allocation44_spill] sm:$0xff] }
 0x57e   : > { %v4307_v17 = vadd.f32 %v4226_v16, %v4087_v58  ;;  %v4088_v53 = vadd.f32 %v7772_v7, %v4045_v14 }
 0x57f   : > { %v4305_v26 = vadd.f32 %v4222_v57, %v4085_v41  ;;  %v4086_v6 = vadd.f32 %v7772_v7, %v4043_v37  ;;  %v8184_v57 = vld [vmem:[#allocation45_spill] sm:$0xff] }
 0x580   : > { %v4343_v40 = vmax.f32 %v4307_v17, 0.0  ;;  %v4308_v47 = vadd.f32 %v7726_v33, %v4088_v53 }
 0x581   : > { %v4341_v43 = vmax.f32 %v4305_v26, 0.0  ;;  %v4306_v50 = vadd.f32 %v7731_v51, %v4086_v6  ;;  %v5149_v11 = vpop.f32.mrb[208].mxu1  ;;  %v4230_v51 = vsel %vm4171_vm4, %v7714_v52, %v7738_v27  ;;  %v8178_v27 = vld [vmem:[#allocation43_spill] sm:$0xff] }
 0x582   : > { %4379 = vst [vmem:[%s7790_s25 + $0xd0] sm:$0xff] %v4343_v40  ;;  %v4344_v4 = vmax.f32 %v4308_v47, 0.0  ;;  %v4048_v2 = vmul.f32 %v5149_v11, %v7770_v20  ;;  %v3980_v60 = vpop.f32.mrb[209].mxu1 }
 0x583   : > { %4377 = vst [vmem:[%s7790_s25 + $0xc0] sm:$0xff] %v4341_v43  ;;  %v4342_v30 = vmax.f32 %v4306_v50, 0.0  ;;  %v4046_v29 = vmul.f32 %v7770_v20, %v3980_v60  ;;  %v5150_v45 = vpop.f32.mrb[210].mxu1 }
 0x584   : > { %4380 = vst [vmem:[%s7790_s25 + $0xd8] sm:$0xff] %v4344_v4  ;;  %v4091_v33 = vadd.f32 %v7772_v7, %v4048_v2  ;;  %v4049_v61 = vmul.f32 %v5150_v45, %v7770_v20  ;;  %v3983_v48 = vpop.f32.mrb[211].mxu1 }
 0x585   : > { %4378 = vst [vmem:[%s7790_s25 + $0xc8] sm:$0xff] %v4342_v30  ;;  %v4089_v42 = vadd.f32 %v7772_v7, %v4046_v29  ;;  %v4047_v56 = vmul.f32 %v7770_v20, %v3983_v48 }
 0x586   : > { %v4311_v39 = vadd.f32 %v4234_v9, %v4091_v33  ;;  %v4092_v46 = vadd.f32 %v7772_v7, %v4049_v61 }
 0x587   : > { %v4309_v35 = vadd.f32 %v4230_v51, %v4089_v42  ;;  %v4090_v23 = vadd.f32 %v7772_v7, %v4047_v56 }
 0x588   : > { %v4347_v62 = vmax.f32 %v4311_v39, 0.0  ;;  %v4312_v5 = vadd.f32 %v7746_v0, %v4092_v46 }
 0x589   : > { %v4345_v52 = vmax.f32 %v4309_v35, 0.0  ;;  %v4310_v36 = vadd.f32 %v8178_v27, %v4090_v23  ;;  %v5153_v3 = vpop.f32.mrb[212].mxu1 }
 0x58a   : > { %4383 = vst [vmem:[%s7790_s25 + $0xf0] sm:$0xff] %v4347_v62  ;;  %v4348_v24 = vmax.f32 %v4312_v5, 0.0  ;;  %v4052_v1 = vmul.f32 %v5153_v3, %v7770_v20  ;;  %v3996_v34 = vpop.f32.mrb[213].mxu1 }
 0x58b   : > { %4381 = vst [vmem:[%s7790_s25 + $0xe0] sm:$0xff] %v4345_v52  ;;  %v4346_v49 = vmax.f32 %v4310_v36, 0.0  ;;  %v4050_v0 = vmul.f32 %v7770_v20, %v3996_v34  ;;  %v5154_v21 = vpop.f32.mrb[214].mxu1 }
 0x58c   : > { %4384 = vst [vmem:[%s7790_s25 + $0xf8] sm:$0xff] %v4348_v24  ;;  %v4095_v55 = vadd.f32 %v7772_v7, %v4052_v1  ;;  %v4053_v28 = vmul.f32 %v5154_v21, %v7770_v20  ;;  %v3999_v19 = vpop.f32.mrb[215].mxu1 }
 0x58d   : > { %4382 = vst [vmem:[%s7790_s25 + $0xe8] sm:$0xff] %v4346_v49  ;;  %v4093_v25 = vadd.f32 %v7772_v7, %v4050_v0  ;;  %v4051_v44 = vmul.f32 %v7770_v20, %v3999_v19 }
 0x58e   : > { %v4315_v13 = vadd.f32 %v4242_v10, %v4095_v55  ;;  %v4096_v32 = vadd.f32 %v7772_v7, %v4053_v28 }
 0x58f   : > { %v4313_v8 = vadd.f32 %v4238_v22, %v4093_v25  ;;  %v4094_v31 = vadd.f32 %v7772_v7, %v4051_v44 }
 0x590   : > { %v4351_v16 = vmax.f32 %v4315_v13, 0.0  ;;  %v4316_v18 = vadd.f32 %v8183_v15, %v4096_v32 }
 0x591   : > { %v4349_v58 = vmax.f32 %v4313_v8, 0.0  ;;  %v4314_v14 = vadd.f32 %v8184_v57, %v4094_v31 }
 0x592   : > { %4387 = vst [vmem:[%s7790_s25 + $0x110] sm:$0xff] %v4351_v16  ;;  %v4352_v20 = vmax.f32 %v4316_v18, 0.0 }
 0x593   : > { %4385 = vst [vmem:[%s7790_s25 + $0x100] sm:$0xff] %v4349_v58  ;;  %v4350_v7 = vmax.f32 %v4314_v14, 0.0 }
 0x594   : > { %4388 = vst [vmem:[%s7790_s25 + $0x118] sm:$0x3f] %v4352_v20 }
 0x595   : > { %4386 = vst [vmem:[%s7790_s25 + $0x108] sm:$0xff] %v4350_v7 }
 0x596   : > { %5790 = shalt.err (!%p5787_p3)
}
 0x597   : > { %s5791_s15 = scalar_lea.hbm %s7958_s26, 4608  ;;  %s5795_s11 = scalar_lea.hbm %s8185_s2, 9216 }
 0x598   : > { %p5792_p6 = scmp.ne.s32.totalorder %s7958_s26, %s5791_s15  ;;  %p5796_p5 = scmp.lt.u32.totalorder %s7958_s26, %s8185_s2 }
 0x599   : > { %p5797_p10 = scmp.lt.u32.totalorder %s5795_s11, %s5791_s15  ;;  %p5799_p11 = scmp.lt.u32.totalorder %s5791_s15, %s7958_s26 }
 0x59a   : > { %p5793_p2 = pnand %p5792_p6, %p8186_p12 }
 0x59b   : > { %p5798_p1 = por %p5797_p10, %p5796_p5 }
 0x59c   : > { %p5794_p0 = pneg %p5793_p2 }
 0x59d   : > { %p5800_p13 = por %p5799_p11, %p5798_p1 }
 0x59f   : > { %p5801_p8 = pnand %p5800_p13, %p5794_p0 }
 0x5a1   : > { %5804 = shalt.err (!%p5801_p8)
}
 0x5a2   : > { %s5884_s22 = smov 128   ;;  %s5885_s21 = smov 8  }
 0x5a3   : > { %5202 = dma.vmem_to_hbm [thread:$0]  (%p8186_p12), %s7960_s3, 4608, %s7958_s26, %s4390_s23, %s5884_s22, %s5884_s22, %s5885_s21  }
 0x5a4 PF: > { %s4418_s28 = sand.u32 1, %s5851_s17   ;;  %p8187_p7 = scmp.ne.s32.totalorder %s8088_s14, 0 }
 0x5a5   : > { %p8188_p9 = scmp.ge.s32.totalorder %s5863_s20, 2  ;;  %s4419_s13 = scalar_lea.sflag [#allocation4], %s4418_s28 }
 0x5a7   : > { %p5240_p4 = pnand %p8188_p9, %p8187_p7 }
 0x5a9   : > { %5846 = dma.done.wait (!%p5240_p4), %s4419_s13, 4608  }
 0x5aa   : > { %5848 = vsyncadd (!%p5240_p4), %s4419_s13, 4294962688  ;;  %p29_p3 = scmp.ge.s32.totalorder %s6200_s27, 4   ;;  %s8189_s17 = smov %s5855_s18 }
 0x5ab   : > { %s8190_s18 = smov %s5859_s19  ;;  %s8191_s19 = smov %s6211_s29 }
 0x5ac   : > { %s8192_s20 = smov %s6200_s27  ;;  %31 = sbr.rel (!%p29_p3) target bundleno = 16 (0x10), region = 151 }
 0x5b3   :  { %4424 = vsyncpa [#allocation3], 1 }
 0x5b4   :  { %4426 = vsyncpa [#allocation3 + $0x1], 1 }
 0x5b5   :  { %4427 = vsyncpa [#allocation6], 1 }
 0x5b6   :  { %4428 = vsyncpa [#allocation9], 1 }
 0x5b7   :  { %4429 = vsyncpa [#allocation12], 1 }
 0x5b8   :  { %4430 = vsyncpa [#allocation15], 1 }
 0x5b9   :  { %4431 = vsyncpa [#allocation18], 1 }
 0x5ba   :  { %4432 = vsyncpa [#allocation4], 1 }
 0x5bb   :  { %4434 = vsyncpa [#allocation4 + $0x1], 1 }

</bundles_post_ra>
